<compile_context>
chip_gen: v7x
topology: tpu7x:2x2x1
jax: 0.10.0
libtpu: 0.0.40
codegen_flags: <defaults>
</compile_context>

<pallas_src>
import jax
import jax.numpy as jnp
import numpy as np
from jax import lax
from jax.experimental import pallas as pl
from jax.experimental.pallas import tpu as pltpu

PRIMITIVES = ("none", "skip_connect", "avg_pool_3x3", "max_pool_3x3", "conv_relu_3x3")
P = len(PRIMITIVES)
BASELINE = 0.01
NEG_BIG = -1e30      # padding surrogate for -inf (safe: real activations >> -1e29)
PAD_THRESH = -1e29   # tap <= PAD_THRESH  <=>  tap is padding


def _node_kernel(w_ref,      # SMEM scalar prefetch: (node_id * P,) gated weights
                 xp_ref,     # (1, bt, H+2, W+2, C)  NEG_BIG-padded state (NHWC)
                 cw_ref,     # (1, 9*C, C)           bf16 conv weight, rows = (dy, dx, cin)
                 o_ref,      # (bt, H, W, C)         node output (written once per b)
                 acc_ref,    # (bt, H, W, C) f32     VMEM accumulator
                 col_ref):   # (bt*H*W, 9*C) bf16    VMEM im2col buffer
    i = pl.program_id(1)              # state (incoming edge) index -- innermost
    n_states = pl.num_programs(1)

    @pl.when(i == 0)
    def _init():
        acc_ref[...] = jnp.zeros_like(acc_ref)

    xp = xp_ref[0]                    # (bt, H+2, W+2, C)
    bt, Hp, Wp, C = xp.shape
    H, W = Hp - 2, Wp - 2

    # weight gating (w < baseline -> 0) is done in the wrapper; here just read.
    w_skip = w_ref[i * P + 1]
    w_avg = w_ref[i * P + 2]
    w_max = w_ref[i * P + 3]
    w_conv = w_ref[i * P + 4]
    # PRIMITIVES[0] == "none" (Zero op): contributes exactly 0 -> nothing to do.

    # ---- skip_connect (identity at stride 1); center region has no padding --
    @pl.when(w_skip != 0.0)
    def _skip():
        acc_ref[...] = acc_ref[...] + w_skip * xp[:, 1:H + 1, 1:W + 1, :]

    # ---- avg_pool_3x3 (count_include_pad=False) + max_pool_3x3, 9 window taps
    @pl.when(jnp.logical_or(w_avg != 0.0, w_max != 0.0))
    def _pools():
        s = jnp.zeros((bt, H, W, C), jnp.float32)
        cnt = jnp.zeros((bt, H, W, C), jnp.float32)
        m = jnp.full((bt, H, W, C), NEG_BIG, jnp.float32)
        for dy in range(3):
            for dx in range(3):
                tap = xp[:, dy:dy + H, dx:dx + W, :]
                valid = tap > PAD_THRESH                 # False only on padding
                s = s + jnp.where(valid, tap, 0.0)       # zero-padded sum
                cnt = cnt + valid.astype(jnp.float32)    # valid-tap count
                m = jnp.maximum(m, tap)                  # padding == NEG_BIG
        acc_ref[...] = acc_ref[...] + w_avg * (s / cnt) + w_max * m

    # ---- conv_relu_3x3: ReLU -> Conv2d(C, C, 3, padding=1, bias=False) ------
    # relu(NEG_BIG-pad(x)) == zero-pad(relu(x)); one bf16 im2col matmul (K=9C).
    @pl.when(w_conv != 0.0)
    def _conv():
        xr = jnp.maximum(xp, 0.0).astype(jnp.bfloat16)
        for k in range(9):
            dy, dx = k // 3, k % 3
            patch = xr[:, dy:dy + H, dx:dx + W, :].reshape(bt * H * W, C)
            col_ref[:, k * C:(k + 1) * C] = patch
        y = jnp.dot(col_ref[...], cw_ref[0],
                    preferred_element_type=jnp.float32)   # (bt*H*W, C) on MXU
        acc_ref[...] = acc_ref[...] + w_conv * y.reshape(bt, H, W, C)

    @pl.when(i == n_states - 1)
    def _flush():
        o_ref[...] = acc_ref[...]


def normal_computing_node_forward(states, weights, conv_ws, *, baseline=BASELINE):
    """states: list of node_id arrays (B, C, H, W) [NCHW];
    weights: (node_id * P,); conv_ws: (node_id, Cout, Cin, 3, 3) [OIHW]."""
    # TODO(synk): channel_shuffle=True branch (split/cat + torch channel_shuffle)
    # is not implemented; this covers the default channel_shuffle=False path.
    node_id = len(states)
    x = jnp.stack(states, axis=0).astype(jnp.float32)              # (n, B, C, H, W)
    x = jnp.transpose(x, (0, 1, 3, 4, 2))                          # (n, B, H, W, C)
    n, B, H, W, C = x.shape

    # PyTorch gate: `if not w < baseline` -> keep iff w >= baseline (gated ops
    # are skipped entirely in-kernel via pl.when on the zeroed weight).
    w_eff = jnp.where(weights < baseline, 0.0, weights).astype(jnp.float32)

    # single padded copy; NEG_BIG padding serves max-pool directly, and the
    # zero-pad semantics needed by avg-pool / conv are recovered in-kernel.
    xp = jnp.pad(x, ((0, 0), (0, 0), (1, 1), (1, 1), (0, 0)),
                 constant_values=NEG_BIG)

    # conv weights OIHW -> (n, kh, kw, Cin, Cout) -> (n, 9*Cin, Cout), bf16 for MXU
    cwk = jnp.transpose(conv_ws, (0, 3, 4, 2, 1)).reshape(n, 9 * C, C)
    cwk = cwk.astype(jnp.bfloat16)

    # batch tile of 1: bounded VMEM per step, M = H*W per matmul, and a
    # "parallel" leading grid axis for megacore sharding.
    bt = 1

    grid_spec = pltpu.PrefetchScalarGridSpec(
        num_scalar_prefetch=1,
        grid=(B // bt, n),
        in_specs=[
            pl.BlockSpec((1, bt, H + 2, W + 2, C), lambda b, i, w: (i, b, 0, 0, 0)),
            pl.BlockSpec((1, 9 * C, C), lambda b, i, w: (i, 0, 0)),
        ],
        out_specs=pl.BlockSpec((bt, H, W, C), lambda b, i, w: (b, 0, 0, 0)),
        scratch_shapes=[
            pltpu.VMEM((bt, H, W, C), jnp.float32),          # accumulator
            pltpu.VMEM((bt * H * W, 9 * C), jnp.bfloat16),   # im2col buffer
        ],
    )
    out_nhwc = pl.pallas_call(
        _node_kernel,
        out_shape=jax.ShapeDtypeStruct((B, H, W, C), jnp.float32),
        grid_spec=grid_spec,
        compiler_params=pltpu.CompilerParams(
            dimension_semantics=("parallel", "arbitrary")),  # states axis accumulates
    )(w_eff, xp, cwk)

    return jnp.transpose(out_nhwc, (0, 3, 1, 2))   # back to NCHW


# ---------------- pure-JAX reference (mirrors the PyTorch forward) ------------
def _avg_pool_3x3_ref(x):  # NCHW, stride 1, pad 1, count_include_pad=False
    pads = [(0, 0), (0, 0), (1, 1), (1, 1)]
    s = lax.reduce_window(x, 0.0, lax.add, (1, 1, 3, 3), (1, 1, 1, 1), pads)
    c = lax.reduce_window(jnp.ones_like(x), 0.0, lax.add, (1, 1, 3, 3),
                          (1, 1, 1, 1), pads)
    return s / c


def _max_pool_3x3_ref(x):
    pads = [(0, 0), (0, 0), (1, 1), (1, 1)]
    return lax.reduce_window(x, -jnp.inf, lax.max, (1, 1, 3, 3), (1, 1, 1, 1), pads)


def _conv_relu_3x3_ref(x, w):
    xr = jnp.maximum(x, 0.0)
    return lax.conv_general_dilated(xr, w, (1, 1), [(1, 1), (1, 1)],
                                    dimension_numbers=("NCHW", "OIHW", "NCHW"))


def reference_forward(states, weights, conv_ws, baseline=BASELINE):
    node_id = len(states)
    state = 0.0
    for order in range(node_id * P):
        input_order = order // P   # == indicator[order]
        prim = order % P
        w = float(weights[order])
        if w < baseline:           # PyTorch: `if not w < self.baseline`
            continue
        xs = states[input_order]
        if prim == 0:
            out = jnp.zeros_like(xs)
        elif prim == 1:
            out = xs
        elif prim == 2:
            out = _avg_pool_3x3_ref(xs)
        elif prim == 3:
            out = _max_pool_3x3_ref(xs)
        else:
            out = _conv_relu_3x3_ref(xs, conv_ws[input_order])
        state = state + w * out
    return state


if __name__ == "__main__":
    key = jax.random.PRNGKey(0)
    B, C, H, W = 2, 32, 16, 16
    node_id = 2                                    # node receives 2 incoming states
    k1, k2, k3, k4 = jax.random.split(key, 4)
    states = [jax.random.normal(k1, (B, C, H, W), jnp.float32),
              jax.random.normal(k2, (B, C, H, W), jnp.float32)]
    weights = jax.random.uniform(k3, (node_id * P,), jnp.float32)
    weights = weights.at[3].set(0.001)             # below baseline -> op gated off
    conv_ws = 0.1 * jax.random.normal(k4, (node_id, C, C, 3, 3), jnp.float32)

    out = normal_computing_node_forward(states, weights, conv_ws)
    out = jax.block_until_ready(out)

    ref = reference_forward(states, weights, conv_ws)
    np.testing.assert_allclose(np.asarray(out), np.asarray(ref),
                               rtol=2e-2, atol=3e-2)
    print("KERNEL_OK")
</pallas_src>

<mosaic_0001>
module attributes {stable_mosaic.version = 11 : i64} {
  func.func @_node_kernel(%arg0: i32, %arg1: i32, %arg2: memref<10xf32, #tpu.memory_space<smem>>, %arg3: memref<1x1x18x18x32xf32, #tpu.memory_space<vmem>>, %arg4: memref<1x288x32xbf16, #tpu.memory_space<vmem>>, %arg5: memref<1x16x16x32xf32, #tpu.memory_space<vmem>>, %arg6: memref<1x16x16x32xf32, #tpu.memory_space<vmem>>, %arg7: memref<256x288xbf16, #tpu.memory_space<vmem>>) attributes {dimension_semantics = [#tpu.dimension_semantics<parallel>, #tpu.dimension_semantics<arbitrary>], iteration_bounds = array<i64: 2, 2>, scalar_prefetch = 1 : i64, scratch_operands = 2 : i64, tpu.core_type = #tpu.core_type<tc>, window_params = [{transform_indices = @transform_0, window_bounds = array<i64: 1, 1, 18, 18, 32>}, {transform_indices = @transform_1, window_bounds = array<i64: 1, 288, 32>}, {transform_indices = @transform_2, window_bounds = array<i64: 1, 16, 16, 32>}]} {
    %c0_i32 = arith.constant 0 : i32
    %0 = arith.cmpi eq, %arg1, %c0_i32 : i32
    %1 = arith.extui %0 : i1 to i32
    %c0_i32_0 = arith.constant 0 : i32
    %2 = arith.cmpi ne, %1, %c0_i32_0 : i32
    scf.if %2 {
      %cst_16 = arith.constant 0.000000e+00 : f32
      %35 = vector.broadcast %cst_16 : f32 to vector<1x16x16x32xf32>
      %c0_17 = arith.constant 0 : index
      %c0_18 = arith.constant 0 : index
      %c0_19 = arith.constant 0 : index
      %c0_20 = arith.constant 0 : index
      %36 = vector.load %arg6[%c0_17, %c0_18, %c0_19, %c0_20] : memref<1x16x16x32xf32, #tpu.memory_space<vmem>>, vector<1x16x16x32xf32>
      tpu.vector_store %arg6[%c0_17, %c0_18, %c0_19, %c0_20], %35 {strides = array<i32>} : memref<1x16x16x32xf32, #tpu.memory_space<vmem>>, vector<1x16x16x32xf32>,
    } else {
    }
    %c0 = arith.constant 0 : index
    %c0_1 = arith.constant 0 : index
    %c0_2 = arith.constant 0 : index
    %c0_3 = arith.constant 0 : index
    %c0_4 = arith.constant 0 : index
    %3 = vector.load %arg3[%c0, %c0_1, %c0_2, %c0_3, %c0_4] : memref<1x1x18x18x32xf32, #tpu.memory_space<vmem>>, vector<1x1x18x18x32xf32>
    %4 = vector.shape_cast %3 : vector<1x1x18x18x32xf32> to vector<1x18x18x32xf32>
    %c5_i32 = arith.constant 5 : i32
    %5 = arith.muli %arg1, %c5_i32 : i32
    %c1_i32 = arith.constant 1 : i32
    %6 = arith.addi %5, %c1_i32 : i32
    %7 = arith.index_cast %6 : i32 to index
    %8 = memref.load %arg2[%7] : memref<10xf32, #tpu.memory_space<smem>>
    %c5_i32_5 = arith.constant 5 : i32
    %9 = arith.muli %arg1, %c5_i32_5 : i32
    %c2_i32 = arith.constant 2 : i32
    %10 = arith.addi %9, %c2_i32 : i32
    %11 = arith.index_cast %10 : i32 to index
    %12 = memref.load %arg2[%11] : memref<10xf32, #tpu.memory_space<smem>>
    %c5_i32_6 = arith.constant 5 : i32
    %13 = arith.muli %arg1, %c5_i32_6 : i32
    %c3_i32 = arith.constant 3 : i32
    %14 = arith.addi %13, %c3_i32 : i32
    %15 = arith.index_cast %14 : i32 to index
    %16 = memref.load %arg2[%15] : memref<10xf32, #tpu.memory_space<smem>>
    %c5_i32_7 = arith.constant 5 : i32
    %17 = arith.muli %arg1, %c5_i32_7 : i32
    %c4_i32 = arith.constant 4 : i32
    %18 = arith.addi %17, %c4_i32 : i32
    %19 = arith.index_cast %18 : i32 to index
    %20 = memref.load %arg2[%19] : memref<10xf32, #tpu.memory_space<smem>>
    %cst = arith.constant 0.000000e+00 : f32
    %21 = arith.cmpf one, %8, %cst : f32
    %22 = arith.extui %21 : i1 to i32
    %c0_i32_8 = arith.constant 0 : i32
    %23 = arith.cmpi ne, %22, %c0_i32_8 : i32
    scf.if %23 {
      %c0_16 = arith.constant 0 : index
      %c0_17 = arith.constant 0 : index
      %c0_18 = arith.constant 0 : index
      %c0_19 = arith.constant 0 : index
      %35 = vector.load %arg6[%c0_16, %c0_17, %c0_18, %c0_19] : memref<1x16x16x32xf32, #tpu.memory_space<vmem>>, vector<1x16x16x32xf32>
      %36 = vector.extract_strided_slice %4 {offsets = [0, 1, 1, 0], sizes = [1, 16, 16, 32], strides = [1, 1, 1, 1]} : vector<1x18x18x32xf32> to vector<1x16x16x32xf32>
      %37 = vector.broadcast %8 : f32 to vector<1x16x16x32xf32>
      %38 = arith.mulf %37, %36 : vector<1x16x16x32xf32>
      %39 = arith.addf %35, %38 : vector<1x16x16x32xf32>
      %c0_20 = arith.constant 0 : index
      %c0_21 = arith.constant 0 : index
      %c0_22 = arith.constant 0 : index
      %c0_23 = arith.constant 0 : index
      %40 = vector.load %arg6[%c0_20, %c0_21, %c0_22, %c0_23] : memref<1x16x16x32xf32, #tpu.memory_space<vmem>>, vector<1x16x16x32xf32>
      tpu.vector_store %arg6[%c0_20, %c0_21, %c0_22, %c0_23], %39 {strides = array<i32>} : memref<1x16x16x32xf32, #tpu.memory_space<vmem>>, vector<1x16x16x32xf32>,
    } else {
    }
    %cst_9 = arith.constant 0.000000e+00 : f32
    %24 = arith.cmpf one, %12, %cst_9 : f32
    %cst_10 = arith.constant 0.000000e+00 : f32
    %25 = arith.cmpf one, %16, %cst_10 : f32
    %26 = arith.ori %24, %25 : i1
    %27 = arith.extui %26 : i1 to i32
    %c0_i32_11 = arith.constant 0 : i32
    %28 = arith.cmpi ne, %27, %c0_i32_11 : i32
    scf.if %28 {
      %cst_16 = arith.constant 0.000000e+00 : f32
      %35 = vector.broadcast %cst_16 : f32 to vector<1x16x16x32xf32>
      %cst_17 = arith.constant 0.000000e+00 : f32
      %36 = vector.broadcast %cst_17 : f32 to vector<1x16x16x32xf32>
      %cst_18 = arith.constant -1.000000e+30 : f32
      %37 = vector.broadcast %cst_18 : f32 to vector<1x16x16x32xf32>
      %38 = vector.extract_strided_slice %4 {offsets = [0, 0, 0, 0], sizes = [1, 16, 16, 32], strides = [1, 1, 1, 1]} : vector<1x18x18x32xf32> to vector<1x16x16x32xf32>
      %cst_19 = arith.constant -1.000000e+29 : f32
      %39 = vector.broadcast %cst_19 : f32 to vector<1x16x16x32xf32>
      %40 = arith.cmpf ogt, %38, %39 : vector<1x16x16x32xf32>
      %cst_20 = arith.constant 0.000000e+00 : f32
      %41 = vector.broadcast %cst_20 : f32 to vector<1x16x16x32xf32>
      %42 = arith.select %40, %38, %41 : vector<1x16x16x32xi1>, vector<1x16x16x32xf32>
      %43 = arith.addf %35, %42 : vector<1x16x16x32xf32>
      %44 = arith.extui %40 : vector<1x16x16x32xi1> to vector<1x16x16x32xi32>
      %45 = arith.sitofp %44 : vector<1x16x16x32xi32> to vector<1x16x16x32xf32>
      %46 = arith.addf %36, %45 : vector<1x16x16x32xf32>
      %47 = arith.maximumf %37, %38 : vector<1x16x16x32xf32>
      %48 = vector.extract_strided_slice %4 {offsets = [0, 0, 1, 0], sizes = [1, 16, 16, 32], strides = [1, 1, 1, 1]} : vector<1x18x18x32xf32> to vector<1x16x16x32xf32>
      %cst_21 = arith.constant -1.000000e+29 : f32
      %49 = vector.broadcast %cst_21 : f32 to vector<1x16x16x32xf32>
      %50 = arith.cmpf ogt, %48, %49 : vector<1x16x16x32xf32>
      %cst_22 = arith.constant 0.000000e+00 : f32
      %51 = vector.broadcast %cst_22 : f32 to vector<1x16x16x32xf32>
      %52 = arith.select %50, %48, %51 : vector<1x16x16x32xi1>, vector<1x16x16x32xf32>
      %53 = arith.addf %43, %52 : vector<1x16x16x32xf32>
      %54 = arith.extui %50 : vector<1x16x16x32xi1> to vector<1x16x16x32xi32>
      %55 = arith.sitofp %54 : vector<1x16x16x32xi32> to vector<1x16x16x32xf32>
      %56 = arith.addf %46, %55 : vector<1x16x16x32xf32>
      %57 = arith.maximumf %47, %48 : vector<1x16x16x32xf32>
      %58 = vector.extract_strided_slice %4 {offsets = [0, 0, 2, 0], sizes = [1, 16, 16, 32], strides = [1, 1, 1, 1]} : vector<1x18x18x32xf32> to vector<1x16x16x32xf32>
      %cst_23 = arith.constant -1.000000e+29 : f32
      %59 = vector.broadcast %cst_23 : f32 to vector<1x16x16x32xf32>
      %60 = arith.cmpf ogt, %58, %59 : vector<1x16x16x32xf32>
      %cst_24 = arith.constant 0.000000e+00 : f32
      %61 = vector.broadcast %cst_24 : f32 to vector<1x16x16x32xf32>
      %62 = arith.select %60, %58, %61 : vector<1x16x16x32xi1>, vector<1x16x16x32xf32>
      %63 = arith.addf %53, %62 : vector<1x16x16x32xf32>
      %64 = arith.extui %60 : vector<1x16x16x32xi1> to vector<1x16x16x32xi32>
      %65 = arith.sitofp %64 : vector<1x16x16x32xi32> to vector<1x16x16x32xf32>
      %66 = arith.addf %56, %65 : vector<1x16x16x32xf32>
      %67 = arith.maximumf %57, %58 : vector<1x16x16x32xf32>
      %68 = vector.extract_strided_slice %4 {offsets = [0, 1, 0, 0], sizes = [1, 16, 16, 32], strides = [1, 1, 1, 1]} : vector<1x18x18x32xf32> to vector<1x16x16x32xf32>
      %cst_25 = arith.constant -1.000000e+29 : f32
      %69 = vector.broadcast %cst_25 : f32 to vector<1x16x16x32xf32>
      %70 = arith.cmpf ogt, %68, %69 : vector<1x16x16x32xf32>
      %cst_26 = arith.constant 0.000000e+00 : f32
      %71 = vector.broadcast %cst_26 : f32 to vector<1x16x16x32xf32>
      %72 = arith.select %70, %68, %71 : vector<1x16x16x32xi1>, vector<1x16x16x32xf32>
      %73 = arith.addf %63, %72 : vector<1x16x16x32xf32>
      %74 = arith.extui %70 : vector<1x16x16x32xi1> to vector<1x16x16x32xi32>
      %75 = arith.sitofp %74 : vector<1x16x16x32xi32> to vector<1x16x16x32xf32>
      %76 = arith.addf %66, %75 : vector<1x16x16x32xf32>
      %77 = arith.maximumf %67, %68 : vector<1x16x16x32xf32>
      %78 = vector.extract_strided_slice %4 {offsets = [0, 1, 1, 0], sizes = [1, 16, 16, 32], strides = [1, 1, 1, 1]} : vector<1x18x18x32xf32> to vector<1x16x16x32xf32>
      %cst_27 = arith.constant -1.000000e+29 : f32
      %79 = vector.broadcast %cst_27 : f32 to vector<1x16x16x32xf32>
      %80 = arith.cmpf ogt, %78, %79 : vector<1x16x16x32xf32>
      %cst_28 = arith.constant 0.000000e+00 : f32
      %81 = vector.broadcast %cst_28 : f32 to vector<1x16x16x32xf32>
      %82 = arith.select %80, %78, %81 : vector<1x16x16x32xi1>, vector<1x16x16x32xf32>
      %83 = arith.addf %73, %82 : vector<1x16x16x32xf32>
      %84 = arith.extui %80 : vector<1x16x16x32xi1> to vector<1x16x16x32xi32>
      %85 = arith.sitofp %84 : vector<1x16x16x32xi32> to vector<1x16x16x32xf32>
      %86 = arith.addf %76, %85 : vector<1x16x16x32xf32>
      %87 = arith.maximumf %77, %78 : vector<1x16x16x32xf32>
      %88 = vector.extract_strided_slice %4 {offsets = [0, 1, 2, 0], sizes = [1, 16, 16, 32], strides = [1, 1, 1, 1]} : vector<1x18x18x32xf32> to vector<1x16x16x32xf32>
      %cst_29 = arith.constant -1.000000e+29 : f32
      %89 = vector.broadcast %cst_29 : f32 to vector<1x16x16x32xf32>
      %90 = arith.cmpf ogt, %88, %89 : vector<1x16x16x32xf32>
      %cst_30 = arith.constant 0.000000e+00 : f32
      %91 = vector.broadcast %cst_30 : f32 to vector<1x16x16x32xf32>
      %92 = arith.select %90, %88, %91 : vector<1x16x16x32xi1>, vector<1x16x16x32xf32>
      %93 = arith.addf %83, %92 : vector<1x16x16x32xf32>
      %94 = arith.extui %90 : vector<1x16x16x32xi1> to vector<1x16x16x32xi32>
      %95 = arith.sitofp %94 : vector<1x16x16x32xi32> to vector<1x16x16x32xf32>
      %96 = arith.addf %86, %95 : vector<1x16x16x32xf32>
      %97 = arith.maximumf %87, %88 : vector<1x16x16x32xf32>
      %98 = vector.extract_strided_slice %4 {offsets = [0, 2, 0, 0], sizes = [1, 16, 16, 32], strides = [1, 1, 1, 1]} : vector<1x18x18x32xf32> to vector<1x16x16x32xf32>
      %cst_31 = arith.constant -1.000000e+29 : f32
      %99 = vector.broadcast %cst_31 : f32 to vector<1x16x16x32xf32>
      %100 = arith.cmpf ogt, %98, %99 : vector<1x16x16x32xf32>
      %cst_32 = arith.constant 0.000000e+00 : f32
      %101 = vector.broadcast %cst_32 : f32 to vector<1x16x16x32xf32>
      %102 = arith.select %100, %98, %101 : vector<1x16x16x32xi1>, vector<1x16x16x32xf32>
      %103 = arith.addf %93, %102 : vector<1x16x16x32xf32>
      %104 = arith.extui %100 : vector<1x16x16x32xi1> to vector<1x16x16x32xi32>
      %105 = arith.sitofp %104 : vector<1x16x16x32xi32> to vector<1x16x16x32xf32>
      %106 = arith.addf %96, %105 : vector<1x16x16x32xf32>
      %107 = arith.maximumf %97, %98 : vector<1x16x16x32xf32>
      %108 = vector.extract_strided_slice %4 {offsets = [0, 2, 1, 0], sizes = [1, 16, 16, 32], strides = [1, 1, 1, 1]} : vector<1x18x18x32xf32> to vector<1x16x16x32xf32>
      %cst_33 = arith.constant -1.000000e+29 : f32
      %109 = vector.broadcast %cst_33 : f32 to vector<1x16x16x32xf32>
      %110 = arith.cmpf ogt, %108, %109 : vector<1x16x16x32xf32>
      %cst_34 = arith.constant 0.000000e+00 : f32
      %111 = vector.broadcast %cst_34 : f32 to vector<1x16x16x32xf32>
      %112 = arith.select %110, %108, %111 : vector<1x16x16x32xi1>, vector<1x16x16x32xf32>
      %113 = arith.addf %103, %112 : vector<1x16x16x32xf32>
      %114 = arith.extui %110 : vector<1x16x16x32xi1> to vector<1x16x16x32xi32>
      %115 = arith.sitofp %114 : vector<1x16x16x32xi32> to vector<1x16x16x32xf32>
      %116 = arith.addf %106, %115 : vector<1x16x16x32xf32>
      %117 = arith.maximumf %107, %108 : vector<1x16x16x32xf32>
      %118 = vector.extract_strided_slice %4 {offsets = [0, 2, 2, 0], sizes = [1, 16, 16, 32], strides = [1, 1, 1, 1]} : vector<1x18x18x32xf32> to vector<1x16x16x32xf32>
      %cst_35 = arith.constant -1.000000e+29 : f32
      %119 = vector.broadcast %cst_35 : f32 to vector<1x16x16x32xf32>
      %120 = arith.cmpf ogt, %118, %119 : vector<1x16x16x32xf32>
      %cst_36 = arith.constant 0.000000e+00 : f32
      %121 = vector.broadcast %cst_36 : f32 to vector<1x16x16x32xf32>
      %122 = arith.select %120, %118, %121 : vector<1x16x16x32xi1>, vector<1x16x16x32xf32>
      %123 = arith.addf %113, %122 : vector<1x16x16x32xf32>
      %124 = arith.extui %120 : vector<1x16x16x32xi1> to vector<1x16x16x32xi32>
      %125 = arith.sitofp %124 : vector<1x16x16x32xi32> to vector<1x16x16x32xf32>
      %126 = arith.addf %116, %125 : vector<1x16x16x32xf32>
      %127 = arith.maximumf %117, %118 : vector<1x16x16x32xf32>
      %c0_37 = arith.constant 0 : index
      %c0_38 = arith.constant 0 : index
      %c0_39 = arith.constant 0 : index
      %c0_40 = arith.constant 0 : index
      %128 = vector.load %arg6[%c0_37, %c0_38, %c0_39, %c0_40] : memref<1x16x16x32xf32, #tpu.memory_space<vmem>>, vector<1x16x16x32xf32>
      %129 = arith.divf %123, %126 : vector<1x16x16x32xf32>
      %130 = vector.broadcast %12 : f32 to vector<1x16x16x32xf32>
      %131 = arith.mulf %130, %129 : vector<1x16x16x32xf32>
      %132 = arith.addf %128, %131 : vector<1x16x16x32xf32>
      %133 = vector.broadcast %16 : f32 to vector<1x16x16x32xf32>
      %134 = arith.mulf %133, %127 : vector<1x16x16x32xf32>
      %135 = arith.addf %132, %134 : vector<1x16x16x32xf32>
      %c0_41 = arith.constant 0 : index
      %c0_42 = arith.constant 0 : index
      %c0_43 = arith.constant 0 : index
      %c0_44 = arith.constant 0 : index
      %136 = vector.load %arg6[%c0_41, %c0_42, %c0_43, %c0_44] : memref<1x16x16x32xf32, #tpu.memory_space<vmem>>, vector<1x16x16x32xf32>
      tpu.vector_store %arg6[%c0_41, %c0_42, %c0_43, %c0_44], %135 {strides = array<i32>} : memref<1x16x16x32xf32, #tpu.memory_space<vmem>>, vector<1x16x16x32xf32>,
    } else {
    }
    %cst_12 = arith.constant 0.000000e+00 : f32
    %29 = arith.cmpf one, %20, %cst_12 : f32
    %30 = arith.extui %29 : i1 to i32
    %c0_i32_13 = arith.constant 0 : i32
    %31 = arith.cmpi ne, %30, %c0_i32_13 : i32
    scf.if %31 {
      %cst_16 = arith.constant 0.000000e+00 : f32
      %35 = vector.broadcast %cst_16 : f32 to vector<1x18x18x32xf32>
      %36 = arith.maximumf %4, %35 : vector<1x18x18x32xf32>
      %37 = arith.truncf %36 : vector<1x18x18x32xf32> to vector<1x18x18x32xbf16>
      %38 = vector.extract_strided_slice %37 {offsets = [0, 0, 0, 0], sizes = [1, 16, 16, 32], strides = [1, 1, 1, 1]} : vector<1x18x18x32xbf16> to vector<1x16x16x32xbf16>
      %39 = vector.shape_cast %38 : vector<1x16x16x32xbf16> to vector<256x32xbf16>
      %c0_17 = arith.constant 0 : index
      %c0_18 = arith.constant 0 : index
      %40 = vector.load %arg7[%c0_17, %c0_18] : memref<256x288xbf16, #tpu.memory_space<vmem>>, vector<256x32xbf16>
      tpu.vector_store %arg7[%c0_17, %c0_18], %39 {strides = array<i32>} : memref<256x288xbf16, #tpu.memory_space<vmem>>, vector<256x32xbf16>,
      %41 = vector.extract_strided_slice %37 {offsets = [0, 0, 1, 0], sizes = [1, 16, 16, 32], strides = [1, 1, 1, 1]} : vector<1x18x18x32xbf16> to vector<1x16x16x32xbf16>
      %42 = vector.shape_cast %41 : vector<1x16x16x32xbf16> to vector<256x32xbf16>
      %c0_19 = arith.constant 0 : index
      %c32 = arith.constant 32 : index
      %43 = vector.load %arg7[%c0_19, %c32] : memref<256x288xbf16, #tpu.memory_space<vmem>>, vector<256x32xbf16>
      tpu.vector_store %arg7[%c0_19, %c32], %42 {strides = array<i32>} : memref<256x288xbf16, #tpu.memory_space<vmem>>, vector<256x32xbf16>,
      %44 = vector.extract_strided_slice %37 {offsets = [0, 0, 2, 0], sizes = [1, 16, 16, 32], strides = [1, 1, 1, 1]} : vector<1x18x18x32xbf16> to vector<1x16x16x32xbf16>
      %45 = vector.shape_cast %44 : vector<1x16x16x32xbf16> to vector<256x32xbf16>
      %c0_20 = arith.constant 0 : index
      %c64 = arith.constant 64 : index
      %46 = vector.load %arg7[%c0_20, %c64] : memref<256x288xbf16, #tpu.memory_space<vmem>>, vector<256x32xbf16>
      tpu.vector_store %arg7[%c0_20, %c64], %45 {strides = array<i32>} : memref<256x288xbf16, #tpu.memory_space<vmem>>, vector<256x32xbf16>,
      %47 = vector.extract_strided_slice %37 {offsets = [0, 1, 0, 0], sizes = [1, 16, 16, 32], strides = [1, 1, 1, 1]} : vector<1x18x18x32xbf16> to vector<1x16x16x32xbf16>
      %48 = vector.shape_cast %47 : vector<1x16x16x32xbf16> to vector<256x32xbf16>
      %c0_21 = arith.constant 0 : index
      %c96 = arith.constant 96 : index
      %49 = vector.load %arg7[%c0_21, %c96] : memref<256x288xbf16, #tpu.memory_space<vmem>>, vector<256x32xbf16>
      tpu.vector_store %arg7[%c0_21, %c96], %48 {strides = array<i32>} : memref<256x288xbf16, #tpu.memory_space<vmem>>, vector<256x32xbf16>,
      %50 = vector.extract_strided_slice %37 {offsets = [0, 1, 1, 0], sizes = [1, 16, 16, 32], strides = [1, 1, 1, 1]} : vector<1x18x18x32xbf16> to vector<1x16x16x32xbf16>
      %51 = vector.shape_cast %50 : vector<1x16x16x32xbf16> to vector<256x32xbf16>
      %c0_22 = arith.constant 0 : index
      %c128 = arith.constant 128 : index
      %52 = vector.load %arg7[%c0_22, %c128] : memref<256x288xbf16, #tpu.memory_space<vmem>>, vector<256x32xbf16>
      tpu.vector_store %arg7[%c0_22, %c128], %51 {strides = array<i32>} : memref<256x288xbf16, #tpu.memory_space<vmem>>, vector<256x32xbf16>,
      %53 = vector.extract_strided_slice %37 {offsets = [0, 1, 2, 0], sizes = [1, 16, 16, 32], strides = [1, 1, 1, 1]} : vector<1x18x18x32xbf16> to vector<1x16x16x32xbf16>
      %54 = vector.shape_cast %53 : vector<1x16x16x32xbf16> to vector<256x32xbf16>
      %c0_23 = arith.constant 0 : index
      %c160 = arith.constant 160 : index
      %55 = vector.load %arg7[%c0_23, %c160] : memref<256x288xbf16, #tpu.memory_space<vmem>>, vector<256x32xbf16>
      tpu.vector_store %arg7[%c0_23, %c160], %54 {strides = array<i32>} : memref<256x288xbf16, #tpu.memory_space<vmem>>, vector<256x32xbf16>,
      %56 = vector.extract_strided_slice %37 {offsets = [0, 2, 0, 0], sizes = [1, 16, 16, 32], strides = [1, 1, 1, 1]} : vector<1x18x18x32xbf16> to vector<1x16x16x32xbf16>
      %57 = vector.shape_cast %56 : vector<1x16x16x32xbf16> to vector<256x32xbf16>
      %c0_24 = arith.constant 0 : index
      %c192 = arith.constant 192 : index
      %58 = vector.load %arg7[%c0_24, %c192] : memref<256x288xbf16, #tpu.memory_space<vmem>>, vector<256x32xbf16>
      tpu.vector_store %arg7[%c0_24, %c192], %57 {strides = array<i32>} : memref<256x288xbf16, #tpu.memory_space<vmem>>, vector<256x32xbf16>,
      %59 = vector.extract_strided_slice %37 {offsets = [0, 2, 1, 0], sizes = [1, 16, 16, 32], strides = [1, 1, 1, 1]} : vector<1x18x18x32xbf16> to vector<1x16x16x32xbf16>
      %60 = vector.shape_cast %59 : vector<1x16x16x32xbf16> to vector<256x32xbf16>
      %c0_25 = arith.constant 0 : index
      %c224 = arith.constant 224 : index
      %61 = vector.load %arg7[%c0_25, %c224] : memref<256x288xbf16, #tpu.memory_space<vmem>>, vector<256x32xbf16>
      tpu.vector_store %arg7[%c0_25, %c224], %60 {strides = array<i32>} : memref<256x288xbf16, #tpu.memory_space<vmem>>, vector<256x32xbf16>,
      %62 = vector.extract_strided_slice %37 {offsets = [0, 2, 2, 0], sizes = [1, 16, 16, 32], strides = [1, 1, 1, 1]} : vector<1x18x18x32xbf16> to vector<1x16x16x32xbf16>
      %63 = vector.shape_cast %62 : vector<1x16x16x32xbf16> to vector<256x32xbf16>
      %c0_26 = arith.constant 0 : index
      %c256 = arith.constant 256 : index
      %64 = vector.load %arg7[%c0_26, %c256] : memref<256x288xbf16, #tpu.memory_space<vmem>>, vector<256x32xbf16>
      tpu.vector_store %arg7[%c0_26, %c256], %63 {strides = array<i32>} : memref<256x288xbf16, #tpu.memory_space<vmem>>, vector<256x32xbf16>,
      %c0_27 = arith.constant 0 : index
      %c0_28 = arith.constant 0 : index
      %65 = vector.load %arg7[%c0_27, %c0_28] : memref<256x288xbf16, #tpu.memory_space<vmem>>, vector<256x288xbf16>
      %c0_29 = arith.constant 0 : index
      %c0_30 = arith.constant 0 : index
      %c0_31 = arith.constant 0 : index
      %66 = vector.load %arg4[%c0_29, %c0_30, %c0_31] : memref<1x288x32xbf16, #tpu.memory_space<vmem>>, vector<1x288x32xbf16>
      %67 = vector.shape_cast %66 : vector<1x288x32xbf16> to vector<288x32xbf16>
      %cst_32 = arith.constant dense<0.000000e+00> : vector<256x32xf32>
      %68 = tpu.matmul %65, %67, %cst_32 {dimension_numbers = #tpu.dot_dimension_numbers<[1], [0], [0], [1], [0, 0, 1, 1], [], []>} : vector<256x288xbf16>, vector<288x32xbf16>, vector<256x32xf32> -> vector<256x32xf32>
      %c0_33 = arith.constant 0 : index
      %c0_34 = arith.constant 0 : index
      %c0_35 = arith.constant 0 : index
      %c0_36 = arith.constant 0 : index
      %69 = vector.load %arg6[%c0_33, %c0_34, %c0_35, %c0_36] : memref<1x16x16x32xf32, #tpu.memory_space<vmem>>, vector<1x16x16x32xf32>
      %70 = vector.shape_cast %68 : vector<256x32xf32> to vector<1x16x16x32xf32>
      %71 = vector.broadcast %20 : f32 to vector<1x16x16x32xf32>
      %72 = arith.mulf %71, %70 : vector<1x16x16x32xf32>
      %73 = arith.addf %69, %72 : vector<1x16x16x32xf32>
      %c0_37 = arith.constant 0 : index
      %c0_38 = arith.constant 0 : index
      %c0_39 = arith.constant 0 : index
      %c0_40 = arith.constant 0 : index
      %74 = vector.load %arg6[%c0_37, %c0_38, %c0_39, %c0_40] : memref<1x16x16x32xf32, #tpu.memory_space<vmem>>, vector<1x16x16x32xf32>
      tpu.vector_store %arg6[%c0_37, %c0_38, %c0_39, %c0_40], %73 {strides = array<i32>} : memref<1x16x16x32xf32, #tpu.memory_space<vmem>>, vector<1x16x16x32xf32>,
    } else {
    }
    %c1_i32_14 = arith.constant 1 : i32
    %32 = arith.cmpi eq, %arg1, %c1_i32_14 : i32
    %33 = arith.extui %32 : i1 to i32
    %c0_i32_15 = arith.constant 0 : i32
    %34 = arith.cmpi ne, %33, %c0_i32_15 : i32
    scf.if %34 {
      %c0_16 = arith.constant 0 : index
      %c0_17 = arith.constant 0 : index
      %c0_18 = arith.constant 0 : index
      %c0_19 = arith.constant 0 : index
      %35 = vector.load %arg6[%c0_16, %c0_17, %c0_18, %c0_19] : memref<1x16x16x32xf32, #tpu.memory_space<vmem>>, vector<1x16x16x32xf32>
      %c0_20 = arith.constant 0 : index
      %c0_21 = arith.constant 0 : index
      %c0_22 = arith.constant 0 : index
      %c0_23 = arith.constant 0 : index
      %36 = vector.load %arg5[%c0_20, %c0_21, %c0_22, %c0_23] : memref<1x16x16x32xf32, #tpu.memory_space<vmem>>, vector<1x16x16x32xf32>
      tpu.vector_store %arg5[%c0_20, %c0_21, %c0_22, %c0_23], %35 {strides = array<i32>} : memref<1x16x16x32xf32, #tpu.memory_space<vmem>>, vector<1x16x16x32xf32>,
    } else {
    }
    return
  }
  func.func @transform_0(%arg0: i32, %arg1: i32, %arg2: memref<10xf32, #tpu.memory_space<smem>>) -> (i32, i32, i32, i32, i32) {
    %c0_i32 = arith.constant 0 : i32
    %c0_i32_0 = arith.constant 0 : i32
    %c0_i32_1 = arith.constant 0 : i32
    %c0_i32_2 = arith.constant 0 : i32
    return %arg1, %arg0, %c0_i32, %c0_i32_0, %c0_i32_1 : i32, i32, i32, i32, i32
  }
  func.func @transform_1(%arg0: i32, %arg1: i32, %arg2: memref<10xf32, #tpu.memory_space<smem>>) -> (i32, i32, i32) {
    %c0_i32 = arith.constant 0 : i32
    %c0_i32_0 = arith.constant 0 : i32
    %c0_i32_1 = arith.constant 0 : i32
    return %arg1, %c0_i32, %c0_i32_0 : i32, i32, i32
  }
  func.func @transform_2(%arg0: i32, %arg1: i32, %arg2: memref<10xf32, #tpu.memory_space<smem>>) -> (i32, i32, i32, i32) {
    %c0_i32 = arith.constant 0 : i32
    %c0_i32_0 = arith.constant 0 : i32
    %c0_i32_1 = arith.constant 0 : i32
    %c0_i32_2 = arith.constant 0 : i32
    return %arg0, %c0_i32, %c0_i32_0, %c0_i32_1 : i32, i32, i32, i32
  }
}

</mosaic_0001>

<bundles_post_ra>
// kernel: tpu_custom_call.1
= control target key start
LH: loop header
LB: loop body
LE: loop exit
PB: predicated region body
PF: predicated region fallthrough
CT: control target
= control target key end

     0   :  { %s8825_s0 = inlined_call_operand.vmem [shape: f32[10], index: 0, kind: input, shape index: {}]   ;;  %s8826_s1 = inlined_call_operand.vmem [shape: f32[2,2,18,18,32], index: 1, kind: input, shape index: {}]   ;;  %s8827_s2 = inlined_call_operand.vmem [shape: bf16[2,288,32], index: 2, kind: input, shape index: {}]   ;;  %s8828_s3 = inlined_call_operand.hbm [shape: f32[2,16,16,32], index: 3, kind: output, shape index: {}]  }
   0x1   :  { %s8_s14 = sshll.u32 %s8825_s0, 4  ;;  %s9_s14 = int_to_ptr.vmem [resolvable:$true] %s8_s14 }
   0x2   :  { %s5060_s15 = scalar_lea.vmem %s9_s14, 16  ;;  %p5065_p1 = scmp.lt.s32.totalorder %s9_s14, %s9_s14 }
   0x3   :  { %p5061_p0 = scmp.ne.s32.totalorder %s9_s14, %s5060_s15  ;;  %p5066_p2 = scmp.lt.s32.totalorder %s5060_s15, %s5060_s15 }
   0x5   :  { %p5067_p3 = por %p5066_p2, %p5065_p1 }
   0x7   :  { %p5068_p4 = pnand %p5067_p3, %p5061_p0 }
   0x9   :  { %5071 = shalt.err (!%p5068_p4)  }
   0xa   :  { %s5170_s16 = smov [#allocation5]  }
   0xb   :  { %11 = dma.vmem_to_smem %s9_s14, 16, %s5170_s16, [#allocation4] }
   0xc   :  { %5132 = dma.done.wait [#allocation4], 16 }
   0xd   :  { %5133 = vsyncadd [#allocation4], 4294967280 }
   0xe   :  { %13 = sfence }
   0xf   :  { %14 = vsyncpa [#allocation7], 0 }
  0x10   :  { %16 = vsyncpa [#allocation7 + $0x1], 0  ;;  %s5202_s17 = smov 0   ;;  %s5204_s18 = smov 0  }
  0x11   :  { %s5206_s0 = smov 0   ;;  %s5208_s19 = smov 0  }
  0x12   :  { %s5210_s20 = smov 0   ;;  %s5212_s21 = smov 0  }
  0x13   :  { %s5214_s22 = smov 0   ;;  %s5216_s23 = smov 0  }
  0x14 LB: > { %s4610_s24 = sadd.s32 4294967295, %s5168_s23   ;;  %s4611_s25 = sadd.s32 4294967294, %s5168_s23   ;;  %s5168_s23 = sphi %s5216_s23, %s22_s23   ;;  %s5164_s22 = sphi %s5214_s22, %s9143_s22   ;;  %s5160_s21 = sphi %s5212_s21, %s9142_s21   ;;  %s5156_s20 = sphi %s5210_s20, %s9141_s20   ;;  %s5152_s19 = sphi %s5208_s19, %s9140_s19   ;;  %s5148_s0 = sphi %s5206_s0, %s9139_s0   ;;  %s5144_s18 = sphi %s5204_s18, %s9138_s18   ;;  %s5140_s17 = sphi %s5202_s17, %s9137_s17  }
  0x15   : > { %s31_s26 = sadd.s32 1, %s5160_s21  ;;  %s34_s27 = sadd.s32 1, %s5164_s22 }
  0x16   : > { %p32_p5 = scmp.ge.s32.totalorder %s31_s26, 2  ;;  %p105_p6 = scmp.ne.s32.totalorder %s5148_s0, %s5144_s18 }
  0x17   : > { %p106_p7 = scmp.eq.s32.totalorder %s4610_s24, 3  ;;  %p111_p9 = scmp.ne.s32.totalorder %s5144_s18, %s5140_s17 }
  0x18   : > { %s9145_s26 = smov (%p32_p5, %s31_s26), 0  ;;  %s9147_s27 = smov (!%p32_p5, %s34_s27), %s5164_s22 }
  0x19   : > { %p5251_p8 = por %p106_p7, %p105_p6  ;;  %p36_p10 = scmp.ge.s32.totalorder %s9147_s27, 2 }
  0x1a   : > { %p112_p11 = scmp.eq.s32.totalorder %s4611_s25, 3  ;;  %p4614_p12 = scmp.ge.s32.totalorder %s5168_s23, 1 }
  0x1b   : > { %p150_p13 = scmp.lt.s32.totalorder %s5168_s23, 5  ;;  %s9149_s27 = smov (%p36_p10, %s9147_s27), 0 }
  0x1c   : > { %8936 = sst [smem:[#allocation10_spill]] %s9149_s27  ;;  %p5261_p0 = por %p112_p11, %p111_p9 }
  0x1d   : > { %p151_p1 = pnand %p4614_p12, %p150_p13  ;;  %s92_s30 = ssub.s32 %s5164_s22, %s9149_s27 }
  0x1e   : > { %s95_s4 = sadd.s32 1, %s5148_s0  ;;  %p93_p2 = scmp.eq.s32.totalorder %s92_s30, 0 }
  0x1f   : > { %154 = sbr.rel (%p151_p1) target bundleno = 1174 (0x496), region = 28 }
  0x20   : > { %s5269_s5 = scalar_select %p93_p2, %s5148_s0, %s95_s4  }
  0x26   : > { %s178_s6 = sand.u32 1, %s5144_s18   ;;  %p181_p3 = scmp.lt.s32.totalorder %s5152_s19, 1 }
  0x27   : > { %s4615_s7 = sshll.u32 %s178_s6, 8  ;;  %p183_p4 = scmp.lt.s32.totalorder %s5156_s20, 1 }
  0x28   : > { %s182_s8 = scalar_select %p181_p3, %s5152_s19, 1 }
  0x29   : > { %s184_s9 = scalar_select %p183_p4, %s5156_s20, 1 }
  0x2a   : > { %s4897_s10 = smul.u32 108, %s182_s8  ;;  %s5288_s27 = scalar_lea.vmem [#allocation6], %s4615_s7 }
  0x2b   : > { %s4896_s11 = smul.u32 54, %s184_s9  ;;  %p4618_p5 = scmp.ne.s32.totalorder %s5152_s19, 0 }
  0x2c   : > { %s4898_s12 = smul.u32 144, %s182_s8  ;;  %vm200_vm0 = vcmask (!%p4618_p5), 261120   ;;  %v5171_v0 = vmov (!%p4618_p5), 0.0  }
  0x2d   : > { %s187_s13 = sadd.s32 %s4897_s10, %s4896_s11  ;;  %199 = sbr.rel (%p4618_p5) target bundleno = 61 (0x3d), region = 32  ;;  %201 = vst.msk [vmem:[#allocation2] sm:$0xff] (!%p4618_p5), %vm200_vm0, %v5171_v0  ;;  %202 = vst.msk [vmem:[#allocation2 + $0x8] sm:$0xff] (!%p4618_p5), %vm200_vm0, %v5171_v0 }
  0x2e   : > { %s4616_s14 = sshll.u32 %s187_s13, 3  ;;  %s5281_s24 = scalar_lea.vmem %s8827_s2, %s4898_s12  ;;  %203 = vst.msk [vmem:[#allocation2 + $0x10] sm:$0xff] (!%p4618_p5), %vm200_vm0, %v5171_v0  ;;  %204 = vst.msk [vmem:[#allocation2 + $0x18] sm:$0xff] (!%p4618_p5), %vm200_vm0, %v5171_v0 }
  0x2f   : > { %s5286_s4 = scalar_lea.vmem %s8826_s1, %s4616_s14  ;;  %205 = vst.msk [vmem:[#allocation2 + $0x20] sm:$0xff] (!%p4618_p5), %vm200_vm0, %v5171_v0  ;;  %206 = vst.msk [vmem:[#allocation2 + $0x28] sm:$0xff] (!%p4618_p5), %vm200_vm0, %v5171_v0 }
  0x30   : > { %207 = vst.msk [vmem:[#allocation2 + $0x30] sm:$0xff] (!%p4618_p5), %vm200_vm0, %v5171_v0  ;;  %208 = vst.msk [vmem:[#allocation2 + $0x38] sm:$0xff] (!%p4618_p5), %vm200_vm0, %v5171_v0 }
  0x31   : > { %209 = vst.msk [vmem:[#allocation2 + $0x40] sm:$0xff] (!%p4618_p5), %vm200_vm0, %v5171_v0  ;;  %210 = vst.msk [vmem:[#allocation2 + $0x48] sm:$0xff] (!%p4618_p5), %vm200_vm0, %v5171_v0 }
  0x32   : > { %211 = vst.msk [vmem:[#allocation2 + $0x50] sm:$0xff] (!%p4618_p5), %vm200_vm0, %v5171_v0  ;;  %212 = vst.msk [vmem:[#allocation2 + $0x58] sm:$0xff] (!%p4618_p5), %vm200_vm0, %v5171_v0 }
  0x33   : > { %213 = vst.msk [vmem:[#allocation2 + $0x60] sm:$0xff] (!%p4618_p5), %vm200_vm0, %v5171_v0  ;;  %214 = vst.msk [vmem:[#allocation2 + $0x68] sm:$0xff] (!%p4618_p5), %vm200_vm0, %v5171_v0 }
  0x34   : > { %215 = vst.msk [vmem:[#allocation2 + $0x70] sm:$0xff] %vm200_vm0, %v5171_v0  ;;  %216 = vst.msk [vmem:[#allocation2 + $0x78] sm:$0xff] %vm200_vm0, %v5171_v0 }
  0x35   : > { %217 = vst.msk [vmem:[#allocation2 + $0x80] sm:$0xff] %vm200_vm0, %v5171_v0  ;;  %218 = vst.msk [vmem:[#allocation2 + $0x88] sm:$0xff] %vm200_vm0, %v5171_v0 }
  0x36   : > { %219 = vst.msk [vmem:[#allocation2 + $0x90] sm:$0xff] %vm200_vm0, %v5171_v0  ;;  %220 = vst.msk [vmem:[#allocation2 + $0x98] sm:$0xff] %vm200_vm0, %v5171_v0 }
  0x37   : > { %221 = vst.msk [vmem:[#allocation2 + $0xa0] sm:$0xff] %vm200_vm0, %v5171_v0  ;;  %222 = vst.msk [vmem:[#allocation2 + $0xa8] sm:$0xff] %vm200_vm0, %v5171_v0 }
  0x38   : > { %223 = vst.msk [vmem:[#allocation2 + $0xb0] sm:$0xff] %vm200_vm0, %v5171_v0  ;;  %224 = vst.msk [vmem:[#allocation2 + $0xb8] sm:$0xff] %vm200_vm0, %v5171_v0 }
  0x39   : > { %225 = vst.msk [vmem:[#allocation2 + $0xc0] sm:$0xff] %vm200_vm0, %v5171_v0  ;;  %226 = vst.msk [vmem:[#allocation2 + $0xc8] sm:$0xff] %vm200_vm0, %v5171_v0 }
  0x3a   : > { %227 = vst.msk [vmem:[#allocation2 + $0xd0] sm:$0xff] %vm200_vm0, %v5171_v0  ;;  %228 = vst.msk [vmem:[#allocation2 + $0xd8] sm:$0xff] %vm200_vm0, %v5171_v0 }
  0x3b   : > { %229 = vst.msk [vmem:[#allocation2 + $0xe0] sm:$0xff] %vm200_vm0, %v5171_v0  ;;  %230 = vst.msk [vmem:[#allocation2 + $0xe8] sm:$0xff] %vm200_vm0, %v5171_v0 }
  0x3c   : > { %231 = vst.msk [vmem:[#allocation2 + $0xf0] sm:$0xff] %vm200_vm0, %v5171_v0  ;;  %232 = vst.msk [vmem:[#allocation2 + $0xf8] sm:$0xff] %vm200_vm0, %v5171_v0 }
  0x3d PF: > { %v5324_v1 = vld [vmem:[%s5286_s4] sm:$0xff]  ;;  %v5327_v2 = vld [vmem:[%s5286_s4 + $0x8] sm:$0xff]  ;;  %v5330_v3 = vld [vmem:[%s5286_s4 + $0x10] sm:$0x3]  ;;  %s287_s7 = smul.u32 5, %s5152_s19 }
  0x3e   : > { %8938 = vst [vmem:[#allocation11_spill] sm:$0xff] %v5324_v1  ;;  %8939 = vst [vmem:[#allocation12_spill] sm:$0xff] %v5327_v2  ;;  %v5334_v4 = vld [vmem:[%s5286_s4 + $0x18] sm:$0xff]  ;;  %v5337_v5 = vld [vmem:[%s5286_s4 + $0x20] sm:$0xff] }
  0x3f   : > { %8940 = vst [vmem:[#allocation13_spill] sm:$0xff] %v5330_v3  ;;  %8941 = vst [vmem:[#allocation14_spill] sm:$0xff] %v5334_v4  ;;  %v5340_v6 = vld [vmem:[%s5286_s4 + $0x28] sm:$0x3]  ;;  %v5343_v7 = vld [vmem:[%s5286_s4 + $0x30] sm:$0xff]  ;;  %s288_s8 = sadd.s32 1, %s287_s7 }
  0x40   : > { %8942 = vst [vmem:[#allocation15_spill] sm:$0xff] %v5337_v5  ;;  %8943 = vst [vmem:[#allocation16_spill] sm:$0xff] %v5340_v6  ;;  %v5346_v8 = vld [vmem:[%s5286_s4 + $0x38] sm:$0xff]  ;;  %v5349_v9 = vld [vmem:[%s5286_s4 + $0x40] sm:$0x3]  ;;  %s290_s9 = sadd.s32 2, %s287_s7 }
  0x41   : > { %8944 = vst [vmem:[#allocation17_spill] sm:$0xff] %v5343_v7  ;;  %8945 = vst [vmem:[#allocation18_spill] sm:$0xff] %v5346_v8  ;;  %v5352_v10 = vld [vmem:[%s5286_s4 + $0x48] sm:$0xff]  ;;  %v5355_v11 = vld [vmem:[%s5286_s4 + $0x50] sm:$0xff]  ;;  %s5360_s10 = sld [smem:[#allocation5 + %s288_s8]]  ;;  %s292_s12 = sadd.s32 3, %s287_s7 }
  0x42   : > { %8946 = vst [vmem:[#allocation19_spill] sm:$0xff] %v5349_v9  ;;  %8947 = vst [vmem:[#allocation20_spill] sm:$0xff] %v5352_v10  ;;  %v5358_v12 = vld [vmem:[%s5286_s4 + $0x58] sm:$0x3]  ;;  %s5362_s11 = sld [smem:[#allocation5 + %s290_s9]]  ;;  %v5365_v13 = vld [vmem:[%s5286_s4 + $0x60] sm:$0xff] }
  0x43   : > { %8948 = vst [vmem:[#allocation21_spill] sm:$0xff] %v5355_v11  ;;  %v5368_v14 = vld [vmem:[%s5286_s4 + $0x68] sm:$0xff]  ;;  %v5371_v15 = vld [vmem:[%s5286_s4 + $0x70] sm:$0x3]  ;;  %s294_s13 = sadd.s32 4, %s287_s7  ;;  %v5374_v16 = vld [vmem:[%s5286_s4 + $0x78] sm:$0xff] }
  0x44   : > { %8949 = vst [vmem:[#allocation22_spill] sm:$0xff] %v5368_v14  ;;  %8950 = vst [vmem:[#allocation23_spill] sm:$0xff] %v5371_v15  ;;  %v5377_v17 = vld [vmem:[%s5286_s4 + $0x80] sm:$0xff]  ;;  %v5380_v18 = vld [vmem:[%s5286_s4 + $0x88] sm:$0x3]  ;;  %s5382_s14 = sld [smem:[#allocation5 + %s292_s12]] }
  0x45   : > { %8951 = vst [vmem:[#allocation24_spill] sm:$0xff] %v5374_v16  ;;  %8952 = vst [vmem:[#allocation25_spill] sm:$0xff] %v5377_v17  ;;  %s5384_s15 = sld [smem:[#allocation5 + %s294_s13]]  ;;  %v5387_v19 = vld [vmem:[%s5286_s4 + $0x90] sm:$0xff]  ;;  %v5390_v20 = vld [vmem:[%s5286_s4 + $0x98] sm:$0xff] }
  0x46   : > { %8953 = vst [vmem:[#allocation26_spill] sm:$0xff] %v5380_v18  ;;  %8954 = vst [vmem:[#allocation27_spill] sm:$0xff] %v5387_v19  ;;  %v5393_v21 = vld [vmem:[%s5286_s4 + $0xa0] sm:$0x3]  ;;  %v5396_v22 = vld [vmem:[%s5286_s4 + $0xa8] sm:$0xff] }
  0x47   : > { %8955 = vst [vmem:[#allocation28_spill] sm:$0xff] %v5390_v20  ;;  %8956 = vst [vmem:[#allocation29_spill] sm:$0xff] %v5393_v21  ;;  %v5399_v23 = vld [vmem:[%s5286_s4 + $0xb0] sm:$0xff]  ;;  %v5402_v24 = vld [vmem:[%s5286_s4 + $0xb8] sm:$0x3]  ;;  %p296_p6 = scmp.ne.f32.partialorder %s5360_s10, 0.0 }
  0x48   : > { %8957 = vst [vmem:[#allocation30_spill] sm:$0xff] %v5396_v22  ;;  %8958 = vst [vmem:[#allocation31_spill] sm:$0xff] %v5399_v23  ;;  %v5405_v25 = vld [vmem:[%s5286_s4 + $0xc0] sm:$0xff]  ;;  %v5408_v26 = vld [vmem:[%s5286_s4 + $0xc8] sm:$0xff]  ;;  %v5498_v55 = vstv (%p296_p6), %s5360_s10  ;;  %vm429_vm1 = vcmask (%p296_p6), 1046528   ;;  %vm574_vm2 = vcmask (%p296_p6), 261120  }
  0x49   : > { %8959 = vst [vmem:[#allocation32_spill] sm:$0xff] %v5402_v24  ;;  %8960 = vst [vmem:[#allocation33_spill] sm:$0xff] %v5405_v25  ;;  %v5411_v27 = vld [vmem:[%s5286_s4 + $0xd0] sm:$0x3]  ;;  %v5414_v28 = vld [vmem:[%s5286_s4 + $0xd8] sm:$0xff]  ;;  %v333_v56 = vmul.f32 (%p296_p6), %v5498_v55, %v5334_v4  ;;  %v334_v57 = vmul.f32 (%p296_p6), %v5498_v55, %v5337_v5  ;;  %v335_v58 = vmul.f32 (%p296_p6), %v5498_v55, %v5340_v6 }
  0x4a   : > { %8961 = vst [vmem:[#allocation34_spill] sm:$0xff] %v5408_v26  ;;  %8962 = vst [vmem:[#allocation35_spill] sm:$0xff] %v5411_v27  ;;  %v5417_v29 = vld [vmem:[%s5286_s4 + $0xe0] sm:$0xff]  ;;  %v5420_v30 = vld [vmem:[%s5286_s4 + $0xe8] sm:$0x3]  ;;  %v336_v59 = vmul.f32 (%p296_p6), %v5498_v55, %v5343_v7  ;;  %v337_v60 = vmul.f32 (%p296_p6), %v5498_v55, %v5346_v8  ;;  %v338_v61 = vmul.f32 (%p296_p6), %v5498_v55, %v5349_v9 }
  0x4b   : > { %8963 = vst [vmem:[#allocation36_spill] sm:$0xff] %v5414_v28  ;;  %8964 = vst [vmem:[#allocation37_spill] sm:$0xff] %v5417_v29  ;;  %v5424_v31 = vld [vmem:[%s5286_s4 + $0xf0] sm:$0xff]  ;;  %v5427_v32 = vld [vmem:[%s5286_s4 + $0xf8] sm:$0xff]  ;;  %v339_v62 = vmul.f32 (%p296_p6), %v5498_v55, %v5352_v10  ;;  %v340_v63 = vmul.f32 (%p296_p6), %v5498_v55, %v5355_v11  ;;  %v433_v6 = vrot.slane (%p296_p6), %v335_v58, 1  ;;  %v341_v11 = vmul.f32 (%p296_p6), %v5498_v55, %v5358_v12 }
  0x4c   : > { %8965 = vst [vmem:[#allocation38_spill] sm:$0xff] %v5420_v30  ;;  %8966 = vst [vmem:[#allocation39_spill] sm:$0xff] %v5424_v31  ;;  %v5430_v33 = vld [vmem:[%s5286_s4 + $0x100] sm:$0x3]  ;;  %v5433_v34 = vld [vmem:[%s5286_s4 + $0x108] sm:$0xff]  ;;  %v435_v3 = vrot.slane (%p296_p6), %v336_v59, 1 }
  0x4d   : > { %8967 = vst [vmem:[#allocation40_spill] sm:$0xff] %v5427_v32  ;;  %8968 = vst [vmem:[#allocation41_spill] sm:$0xff] %v5430_v33  ;;  %v5436_v35 = vld [vmem:[%s5286_s4 + $0x110] sm:$0xff]  ;;  %v5439_v36 = vld [vmem:[%s5286_s4 + $0x118] sm:$0x3]  ;;  %v436_v7 = vrot.slane (%p296_p6), %v337_v60, 1 }
  0x4e   : > { %8969 = vst [vmem:[#allocation42_spill] sm:$0xff] %v5433_v34  ;;  %8970 = vst [vmem:[#allocation43_spill] sm:$0xff] %v5436_v35  ;;  %v5442_v37 = vld [vmem:[%s5286_s4 + $0x120] sm:$0xff]  ;;  %v5445_v38 = vld [vmem:[%s5286_s4 + $0x128] sm:$0xff]  ;;  %v438_v2 = vrot.slane (%p296_p6), %v338_v61, 1  ;;  %v440_v8 = vrot.slane (%p296_p6), %v339_v62, 1 }
  0x4f   : > { %8971 = vst [vmem:[#allocation44_spill] sm:$0xff] %v5439_v36  ;;  %8972 = vst [vmem:[#allocation45_spill] sm:$0xff] %v5442_v37  ;;  %v5448_v39 = vld [vmem:[%s5286_s4 + $0x130] sm:$0x3]  ;;  %v5451_v40 = vld [vmem:[%s5286_s4 + $0x138] sm:$0xff]  ;;  %v441_v1 = vrot.slane (%p296_p6), %v340_v63, 1  ;;  %v437_v59 = vsel (%p296_p6), %vm429_vm1, %v435_v3, %v436_v7  ;;  %v344_v3 = vmul.f32 (%p296_p6), %v5498_v55, %v5371_v15 }
  0x50   : > { %8973 = vst [vmem:[#allocation46_spill] sm:$0xff] %v5445_v38  ;;  %8974 = vst [vmem:[#allocation47_spill] sm:$0xff] %v5448_v39  ;;  %v5454_v41 = vld [vmem:[%s5286_s4 + $0x140] sm:$0xff]  ;;  %v5457_v42 = vld [vmem:[%s5286_s4 + $0x148] sm:$0x3]  ;;  %v439_v60 = vsel (%p296_p6), %vm429_vm1, %v436_v7, %v438_v2  ;;  %v347_v7 = vmul.f32 (%p296_p6), %v5498_v55, %v5380_v18 }
  0x51   : > { %8975 = vst [vmem:[#allocation48_spill] sm:$0xff] %v5451_v40  ;;  %8976 = vst [vmem:[#allocation49_spill] sm:$0xff] %v5454_v41  ;;  %v5460_v43 = vld [vmem:[%s5286_s4 + $0x150] sm:$0xff]  ;;  %v5463_v44 = vld [vmem:[%s5286_s4 + $0x158] sm:$0xff]  ;;  %v442_v63 = vsel (%p296_p6), %vm429_vm1, %v440_v8, %v441_v1 }
  0x52   : > { %8977 = vst [vmem:[#allocation50_spill] sm:$0xff] %v5457_v42  ;;  %8978 = vst [vmem:[#allocation51_spill] sm:$0xff] %v5460_v43  ;;  %v5466_v45 = vld [vmem:[%s5286_s4 + $0x160] sm:$0x3]  ;;  %v5469_v46 = vld [vmem:[%s5286_s4 + $0x168] sm:$0xff]  ;;  %299 = sbr.rel (!%p296_p6) target bundleno = 128 (0x80), region = 36 }
  0x53   : > { %8979 = vst [vmem:[#allocation52_spill] sm:$0xff] %v5463_v44  ;;  %8980 = vst [vmem:[#allocation53_spill] sm:$0xff] %v5466_v45  ;;  %v5472_v47 = vld [vmem:[%s5286_s4 + $0x170] sm:$0xff]  ;;  %v5475_v48 = vld [vmem:[%s5286_s4 + $0x178] sm:$0x3] }
  0x54   : > { %8981 = vst [vmem:[#allocation54_spill] sm:$0xff] %v5469_v46  ;;  %8982 = vst [vmem:[#allocation55_spill] sm:$0xff] %v5472_v47  ;;  %v5478_v49 = vld [vmem:[%s5286_s4 + $0x180] sm:$0xff]  ;;  %v5481_v50 = vld [vmem:[%s5286_s4 + $0x188] sm:$0xff] }
  0x55   : > { %8983 = vst [vmem:[#allocation56_spill] sm:$0xff] %v5475_v48  ;;  %8984 = vst [vmem:[#allocation57_spill] sm:$0xff] %v5478_v49  ;;  %v5484_v51 = vld [vmem:[%s5286_s4 + $0x190] sm:$0x3]  ;;  %v5487_v52 = vld [vmem:[%s5286_s4 + $0x198] sm:$0xff] }
  0x56   : > { %8985 = vst [vmem:[#allocation58_spill] sm:$0xff] %v5481_v50  ;;  %8986 = vst [vmem:[#allocation59_spill] sm:$0xff] %v5484_v51  ;;  %v5490_v53 = vld [vmem:[%s5286_s4 + $0x1a0] sm:$0xff]  ;;  %v5493_v54 = vld [vmem:[%s5286_s4 + $0x1a8] sm:$0x3]  ;;  %v443_v50 = vrot.slane (%p296_p6), %v341_v11, 1 }
  0x57   : > { %8987 = vst [vmem:[#allocation60_spill] sm:$0xff] %v5487_v52  ;;  %8988 = vst [vmem:[#allocation61_spill] sm:$0xff] %v5490_v53  ;;  %v300_v0 = vld [vmem:[#allocation2] sm:$0xff] (%p296_p6)  ;;  %v431_v53 = vrot.slane (%p296_p6), %v334_v57, 1  ;;  %v301_v52 = vld [vmem:[#allocation2 + $0x8] sm:$0xff] (%p296_p6) }
  0x58   : > { %8989 = vst [vmem:[#allocation62_spill] sm:$0xff] %v5493_v54  ;;  %v430_v54 = vrot.slane (%p296_p6), %v333_v56, 1  ;;  %v302_v5 = vld [vmem:[#allocation2 + $0x10] sm:$0xff] (%p296_p6)  ;;  %v303_v4 = vld [vmem:[#allocation2 + $0x18] sm:$0xff] (%p296_p6)  ;;  %v304_v10 = vld [vmem:[#allocation2 + $0x20] sm:$0xff] (%p296_p6)  ;;  %v342_v56 = vmul.f32 (%p296_p6), %v5498_v55, %v5365_v13  ;;  %v444_v2 = vsel (%p296_p6), %vm429_vm1, %v441_v1, %v443_v50 }
  0x59   : > { %v434_v51 = vsel %vm429_vm1, %v431_v53, %v433_v6  ;;  %v544_v61 = vadd.f32 %v437_v59, %v302_v5  ;;  %v545_v62 = vadd.f32 %v439_v60, %v303_v4  ;;  %v546_v6 = vadd.f32 %v442_v63, %v304_v10  ;;  %v306_v10 = vld [vmem:[#allocation2 + $0x30] sm:$0xff]  ;;  %v308_v1 = vld [vmem:[#allocation2 + $0x40] sm:$0xff] }
  0x5a   : > { %v432_v9 = vsel %vm429_vm1, %v430_v54, %v431_v53  ;;  %v543_v58 = vadd.f32 %v434_v51, %v301_v52  ;;  %v305_v54 = vld [vmem:[#allocation2 + $0x28] sm:$0xff]  ;;  %v343_v53 = vmul.f32 %v5498_v55, %v5368_v14  ;;  %v345_v4 = vmul.f32 %v5498_v55, %v5374_v16  ;;  %v307_v51 = vld [vmem:[#allocation2 + $0x38] sm:$0xff] }
  0x5b   : > { %v542_v57 = vadd.f32 %v432_v9, %v300_v0  ;;  %v445_v9 = vrot.slane %v342_v56, 1  ;;  %577 = vst.msk [vmem:[#allocation2 + $0x10] sm:$0xff] %vm574_vm2, %v544_v61  ;;  %578 = vst.msk [vmem:[#allocation2 + $0x18] sm:$0xff] %vm574_vm2, %v545_v62  ;;  %v346_v5 = vmul.f32 %v5498_v55, %v5377_v17  ;;  %v547_v8 = vadd.f32 %v444_v2, %v305_v54 }
  0x5c   : > { %576 = vst.msk [vmem:[#allocation2 + $0x8] sm:$0xff] %vm574_vm2, %v543_v58  ;;  %579 = vst.msk [vmem:[#allocation2 + $0x20] sm:$0xff] %vm574_vm2, %v546_v6  ;;  %v446_v11 = vrot.slane %v343_v53, 1  ;;  %v448_v52 = vrot.slane %v344_v3, 1  ;;  %v348_v0 = vmul.f32 %v5498_v55, %v5387_v19  ;;  %v450_v50 = vrot.slane %v345_v4, 1 }
  0x5d   : > { %575 = vst.msk [vmem:[#allocation2] sm:$0xff] %vm574_vm2, %v542_v57  ;;  %v451_v56 = vrot.slane %v346_v5, 1  ;;  %v309_v57 = vld [vmem:[#allocation2 + $0x48] sm:$0xff]  ;;  %v453_v58 = vrot.slane %v347_v7, 1  ;;  %v349_v59 = vmul.f32 %v5498_v55, %v5390_v20  ;;  %580 = vst.msk [vmem:[#allocation2 + $0x28] sm:$0xff] %vm574_vm2, %v547_v8  ;;  %v350_v63 = vmul.f32 %v5498_v55, %v5393_v21  ;;  %v310_v5 = vld [vmem:[#allocation2 + $0x50] sm:$0xff] }
  0x5e   : > { %v447_v60 = vsel %vm429_vm1, %v445_v9, %v446_v11  ;;  %v449_v61 = vsel %vm429_vm1, %v446_v11, %v448_v52  ;;  %v455_v62 = vrot.slane %v348_v0, 1  ;;  %v311_v20 = vld [vmem:[#allocation2 + $0x58] sm:$0xff]  ;;  %v351_v9 = vmul.f32 %v5498_v55, %v5396_v22 }
  0x5f   : > { %v548_v54 = vadd.f32 %v447_v60, %v306_v10  ;;  %v549_v6 = vadd.f32 %v449_v61, %v307_v51  ;;  %v452_v53 = vsel %vm429_vm1, %v450_v50, %v451_v56  ;;  %v454_v3 = vsel %vm429_vm1, %v451_v56, %v453_v58  ;;  %v312_v58 = vld [vmem:[#allocation2 + $0x60] sm:$0xff]  ;;  %v313_v61 = vld [vmem:[#allocation2 + $0x68] sm:$0xff] }
  0x60   : > { %v550_v2 = vadd.f32 %v452_v53, %v308_v1  ;;  %v551_v4 = vadd.f32 %v454_v3, %v309_v57  ;;  %v456_v7 = vrot.slane %v349_v59, 1  ;;  %v458_v8 = vrot.slane %v350_v63, 1  ;;  %v315_v3 = vld [vmem:[#allocation2 + $0x78] sm:$0xff] }
  0x61   : > { %581 = vst.msk [vmem:[#allocation2 + $0x30] sm:$0xff] %vm574_vm2, %v548_v54  ;;  %582 = vst.msk [vmem:[#allocation2 + $0x38] sm:$0xff] %vm574_vm2, %v549_v6  ;;  %v352_v10 = vmul.f32 %v5498_v55, %v5399_v23  ;;  %v353_v11 = vmul.f32 %v5498_v55, %v5402_v24  ;;  %v354_v51 = vmul.f32 %v5498_v55, %v5405_v25  ;;  %v460_v59 = vrot.slane %v351_v9, 1  ;;  %v314_v54 = vld [vmem:[#allocation2 + $0x70] sm:$0xff] }
  0x62   : > { %583 = vst.msk [vmem:[#allocation2 + $0x40] sm:$0xff] %vm574_vm2, %v550_v2  ;;  %584 = vst.msk [vmem:[#allocation2 + $0x48] sm:$0xff] %vm574_vm2, %v551_v4  ;;  %v457_v52 = vsel %vm429_vm1, %v455_v62, %v456_v7  ;;  %v459_v0 = vsel %vm429_vm1, %v456_v7, %v458_v8  ;;  %v355_v1 = vmul.f32 %v5498_v55, %v5408_v26 }
  0x63   : > { %v356_v50 = vmul.f32 %v5498_v55, %v5411_v27  ;;  %v552_v56 = vadd.f32 %v457_v52, %v310_v5  ;;  %v553_v57 = vadd.f32 %v459_v0, %v311_v20  ;;  %v461_v60 = vrot.slane %v352_v10, 1 }
  0x64   : > { %v463_v63 = vrot.slane %v353_v11, 1  ;;  %v465_v6 = vrot.slane %v354_v51, 1  ;;  %v466_v53 = vrot.slane %v355_v1, 1  ;;  %v357_v4 = vmul.f32 %v5498_v55, %v5414_v28  ;;  %v316_v1 = vld [vmem:[#allocation2 + $0x80] sm:$0xff] }
  0x65   : > { %v468_v62 = vrot.slane %v356_v50, 1  ;;  %585 = vst.msk [vmem:[#allocation2 + $0x50] sm:$0xff] %vm574_vm2, %v552_v56  ;;  %586 = vst.msk [vmem:[#allocation2 + $0x58] sm:$0xff] %vm574_vm2, %v553_v57  ;;  %v462_v2 = vsel %vm429_vm1, %v460_v59, %v461_v60  ;;  %v358_v20 = vmul.f32 %v5498_v55, %v5417_v29  ;;  %v359_v5 = vmul.f32 %v5498_v55, %v5420_v30  ;;  %v317_v56 = vld [vmem:[#allocation2 + $0x88] sm:$0xff] }
  0x66   : > { %v554_v7 = vadd.f32 %v462_v2, %v312_v58  ;;  %v464_v8 = vsel %vm429_vm1, %v461_v60, %v463_v63  ;;  %v467_v9 = vsel %vm429_vm1, %v465_v6, %v466_v53  ;;  %v470_v0 = vrot.slane %v357_v4, 1 }
  0x67   : > { %v469_v10 = vsel %vm429_vm1, %v466_v53, %v468_v62  ;;  %v555_v11 = vadd.f32 %v464_v8, %v313_v61  ;;  %v556_v51 = vadd.f32 %v467_v9, %v314_v54  ;;  %v471_v50 = vrot.slane %v358_v20, 1 }
  0x68   : > { %v557_v52 = vadd.f32 %v469_v10, %v315_v3  ;;  %587 = vst.msk [vmem:[#allocation2 + $0x60] sm:$0xff] %vm574_vm2, %v554_v7  ;;  %v473_v57 = vrot.slane %v359_v5, 1  ;;  %v360_v59 = vmul.f32 %v5498_v55, %v5424_v31  ;;  %v361_v58 = vmul.f32 %v5498_v55, %v5427_v32  ;;  %v318_v3 = vld [vmem:[#allocation2 + $0x90] sm:$0xff]  ;;  %v319_v5 = vld [vmem:[#allocation2 + $0x98] sm:$0xff]  ;;  %v320_v10 = vld [vmem:[#allocation2 + $0xa0] sm:$0xff] }
  0x69   : > { %588 = vst.msk [vmem:[#allocation2 + $0x68] sm:$0xff] %vm574_vm2, %v555_v11  ;;  %589 = vst.msk [vmem:[#allocation2 + $0x70] sm:$0xff] %vm574_vm2, %v556_v51  ;;  %v362_v60 = vmul.f32 %v5498_v55, %v5430_v33  ;;  %v363_v61 = vmul.f32 %v5498_v55, %v5433_v34  ;;  %v364_v63 = vmul.f32 %v5498_v55, %v5436_v35  ;;  %v321_v51 = vld [vmem:[#allocation2 + $0xa8] sm:$0xff] }
  0x6a   : > { %590 = vst.msk [vmem:[#allocation2 + $0x78] sm:$0xff] %vm574_vm2, %v557_v52  ;;  %v365_v54 = vmul.f32 %v5498_v55, %v5439_v36  ;;  %v472_v6 = vsel %vm429_vm1, %v470_v0, %v471_v50  ;;  %v474_v53 = vsel %vm429_vm1, %v471_v50, %v473_v57  ;;  %v475_v62 = vrot.slane %v360_v59, 1 }
  0x6b   : > { %v476_v2 = vrot.slane %v361_v58, 1  ;;  %v558_v4 = vadd.f32 %v472_v6, %v316_v1  ;;  %v559_v20 = vadd.f32 %v474_v53, %v317_v56  ;;  %v478_v7 = vrot.slane %v362_v60, 1  ;;  %v323_v53 = vld [vmem:[#allocation2 + $0xb8] sm:$0xff] }
  0x6c   : > { %v480_v8 = vrot.slane %v363_v61, 1  ;;  %v481_v11 = vrot.slane %v364_v63, 1  ;;  %v483_v52 = vrot.slane %v365_v54, 1  ;;  %v366_v36 = vmul.f32 %v5498_v55, %v5442_v37  ;;  %v322_v54 = vld [vmem:[#allocation2 + $0xb0] sm:$0xff] }
  0x6d   : > { %v477_v9 = vsel %vm429_vm1, %v475_v62, %v476_v2  ;;  %591 = vst.msk [vmem:[#allocation2 + $0x80] sm:$0xff] %vm574_vm2, %v558_v4  ;;  %592 = vst.msk [vmem:[#allocation2 + $0x88] sm:$0xff] %vm574_vm2, %v559_v20  ;;  %v479_v1 = vsel %vm429_vm1, %v476_v2, %v478_v7  ;;  %v367_v50 = vmul.f32 %v5498_v55, %v5445_v38 }
  0x6e   : > { %v560_v0 = vadd.f32 %v477_v9, %v318_v3  ;;  %v368_v56 = vmul.f32 %v5498_v55, %v5448_v39  ;;  %v561_v57 = vadd.f32 %v479_v1, %v319_v5  ;;  %v482_v59 = vsel %vm429_vm1, %v480_v8, %v481_v11 }
  0x6f   : > { %v484_v58 = vsel %vm429_vm1, %v481_v11, %v483_v52  ;;  %v485_v60 = vrot.slane %v366_v36, 1  ;;  %v562_v61 = vadd.f32 %v482_v59, %v320_v10  ;;  %v486_v6 = vrot.slane %v367_v50, 1  ;;  %v324_v11 = vld [vmem:[#allocation2 + $0xc0] sm:$0xff]  ;;  %v326_v50 = vld [vmem:[#allocation2 + $0xd0] sm:$0xff]  ;;  %v327_v59 = vld [vmem:[#allocation2 + $0xd8] sm:$0xff] }
  0x70   : > { %593 = vst.msk [vmem:[#allocation2 + $0x90] sm:$0xff] %vm574_vm2, %v560_v0  ;;  %v563_v63 = vadd.f32 %v484_v58, %v321_v51  ;;  %v488_v3 = vrot.slane %v368_v56, 1  ;;  %594 = vst.msk [vmem:[#allocation2 + $0x98] sm:$0xff] %vm574_vm2, %v561_v57  ;;  %v369_v62 = vmul.f32 %v5498_v55, %v5451_v40  ;;  %v370_v2 = vmul.f32 %v5498_v55, %v5454_v41  ;;  %v325_v0 = vld [vmem:[#allocation2 + $0xc8] sm:$0xff] }
  0x71   : > { %v371_v4 = vmul.f32 %v5498_v55, %v5457_v42  ;;  %v372_v36 = vmul.f32 %v5498_v55, %v5460_v43  ;;  %595 = vst.msk [vmem:[#allocation2 + $0xa0] sm:$0xff] %vm574_vm2, %v562_v61  ;;  %v487_v20 = vsel %vm429_vm1, %v485_v60, %v486_v6  ;;  %v373_v7 = vmul.f32 %v5498_v55, %v5463_v44 }
  0x72   : > { %596 = vst.msk [vmem:[#allocation2 + $0xa8] sm:$0xff] %vm574_vm2, %v563_v63  ;;  %v489_v5 = vsel %vm429_vm1, %v486_v6, %v488_v3  ;;  %v374_v8 = vmul.f32 %v5498_v55, %v5466_v45  ;;  %v564_v9 = vadd.f32 %v487_v20, %v322_v54  ;;  %v490_v51 = vrot.slane %v369_v62, 1 }
  0x73   : > { %v565_v10 = vadd.f32 %v489_v5, %v323_v53  ;;  %v491_v52 = vrot.slane %v370_v2, 1  ;;  %v493_v1 = vrot.slane %v371_v4, 1  ;;  %v495_v56 = vrot.slane %v372_v36, 1  ;;  %v328_v5 = vld [vmem:[#allocation2 + $0xe0] sm:$0xff] }
  0x74   : > { %v496_v57 = vrot.slane %v373_v7, 1  ;;  %v498_v58 = vrot.slane %v374_v8, 1  ;;  %597 = vst.msk [vmem:[#allocation2 + $0xb0] sm:$0xff] %vm574_vm2, %v564_v9  ;;  %v375_v61 = vmul.f32 %v5498_v55, %v5469_v46  ;;  %v376_v63 = vmul.f32 %v5498_v55, %v5472_v47  ;;  %v329_v8 = vld [vmem:[#allocation2 + $0xe8] sm:$0xff] }
  0x75   : > { %598 = vst.msk [vmem:[#allocation2 + $0xb8] sm:$0xff] %vm574_vm2, %v565_v10  ;;  %v492_v60 = vsel %vm429_vm1, %v490_v51, %v491_v52  ;;  %v377_v54 = vmul.f32 %v5498_v55, %v5475_v48  ;;  %v494_v53 = vsel %vm429_vm1, %v491_v52, %v493_v1  ;;  %v378_v10 = vmul.f32 %v5498_v55, %v5478_v49  ;;  %v8991_v52 = vld [vmem:[#allocation59_spill] sm:$0xff] }
  0x76   : > { %v566_v6 = vadd.f32 %v492_v60, %v324_v11  ;;  %v497_v3 = vsel %vm429_vm1, %v495_v56, %v496_v57  ;;  %v499_v62 = vsel %vm429_vm1, %v496_v57, %v498_v58  ;;  %v567_v2 = vadd.f32 %v494_v53, %v325_v0  ;;  %v8990_v11 = vld [vmem:[#allocation58_spill] sm:$0xff]  ;;  %v330_v56 = vld [vmem:[#allocation2 + $0xf0] sm:$0xff] }
  0x77   : > { %v568_v4 = vadd.f32 %v497_v3, %v326_v50  ;;  %v569_v36 = vadd.f32 %v499_v62, %v327_v59  ;;  %v500_v20 = vrot.slane %v375_v61, 1  ;;  %v501_v7 = vrot.slane %v376_v63, 1  ;;  %v331_v61 = vld [vmem:[#allocation2 + $0xf8] sm:$0xff] }
  0x78   : > { %599 = vst.msk [vmem:[#allocation2 + $0xc0] sm:$0xff] %vm574_vm2, %v566_v6  ;;  %v503_v9 = vrot.slane %v377_v54, 1  ;;  %v379_v51 = vmul.f32 %v5498_v55, %v8990_v11  ;;  %600 = vst.msk [vmem:[#allocation2 + $0xc8] sm:$0xff] %vm574_vm2, %v567_v2  ;;  %v380_v0 = vmul.f32 %v5498_v55, %v8991_v52  ;;  %v505_v57 = vrot.slane %v378_v10, 1 }
  0x79   : > { %601 = vst.msk [vmem:[#allocation2 + $0xd0] sm:$0xff] %vm574_vm2, %v568_v4  ;;  %602 = vst.msk [vmem:[#allocation2 + $0xd8] sm:$0xff] %vm574_vm2, %v569_v36  ;;  %v502_v1 = vsel %vm429_vm1, %v500_v20, %v501_v7 }
  0x7a   : > { %v504_v50 = vsel %vm429_vm1, %v501_v7, %v503_v9  ;;  %v506_v59 = vrot.slane %v379_v51, 1  ;;  %v570_v58 = vadd.f32 %v502_v1, %v328_v5  ;;  %v508_v63 = vrot.slane %v380_v0, 1 }
  0x7b   : > { %v571_v60 = vadd.f32 %v504_v50, %v329_v8 }
  0x7c   : > { %v507_v54 = vsel %vm429_vm1, %v505_v57, %v506_v59  ;;  %603 = vst.msk [vmem:[#allocation2 + $0xe0] sm:$0xff] %vm574_vm2, %v570_v58  ;;  %v509_v55 = vsel %vm429_vm1, %v506_v59, %v508_v63 }
  0x7d   : > { %604 = vst.msk [vmem:[#allocation2 + $0xe8] sm:$0xff] %vm574_vm2, %v571_v60  ;;  %v572_v6 = vadd.f32 %v507_v54, %v330_v56  ;;  %v573_v53 = vadd.f32 %v509_v55, %v331_v61 }
  0x7f   : > { %605 = vst.msk [vmem:[#allocation2 + $0xf0] sm:$0xff] %vm574_vm2, %v572_v6  ;;  %606 = vst.msk [vmem:[#allocation2 + $0xf8] sm:$0xff] %vm574_vm2, %v573_v53 }
  0x80 PF: > { %p607_p7 = scmp.ne.f32.partialorder %s5362_s11, 0.0  ;;  %p608_p9 = scmp.ne.f32.partialorder %s5382_s14, 0.0 }
  0x82   : > { %p609_p10 = por %p608_p9, %p607_p7 }
  0x84   : > { %612 = sbr.rel (!%p609_p10) target bundleno = 584 (0x248), region = 40 }
  0x8b   : > { %v8992_v3 = vld [vmem:[#allocation11_spill] sm:$0xff]  ;;  %v8993_v62 = vld [vmem:[#allocation12_spill] sm:$0xff]  ;;  %v8994_v2 = vld [vmem:[#allocation14_spill] sm:$0xff]  ;;  %v8866_v8 = vmov 0.0   ;;  %vm917_vm9 = vcmask 1046528   ;;  %v5707_v63 = vstv %s5362_s11  ;;  %v5723_v48 = vstv %s5382_s14 }
  0x8c   : > { %vm613_vm3 = vcmp.gt.f32.partialorder %v8992_v3, -1e+29  ;;  %vm614_vm4 = vcmp.gt.f32.partialorder %v8993_v62, -1e+29  ;;  %vm615_vm5 = vcmp.gt.f32.partialorder %v8994_v2, -1e+29 }
  0x8d   : > { %v8995_v4 = vld [vmem:[#allocation15_spill] sm:$0xff]  ;;  %v645_v36 = vsel %vm613_vm3, %v8992_v3, 0.0  ;;  %v5668_v20 = vsel %vm614_vm4, %v8993_v62, 0.0  ;;  %v5673_v5 = vsel %vm615_vm5, %v8994_v2, 0.0  ;;  %v4619_v9 = vsel %vm613_vm3, 1.0, %v8866_v8  ;;  %v8996_v11 = vld [vmem:[#allocation17_spill] sm:$0xff] }
  0x8e   : > { %vm616_vm6 = vcmp.gt.f32.partialorder %v8995_v4, -1e+29  ;;  %v5682_v10 = vsel %vm614_vm4, 1.0, %v8866_v8  ;;  %vm617_vm7 = vcmp.gt.f32.partialorder %v8996_v11, -1e+29  ;;  %v8997_v51 = vld [vmem:[#allocation18_spill] sm:$0xff] }
  0x8f   : > { %v5678_v7 = vsel %vm616_vm6, %v8995_v4, 0.0  ;;  %vm618_vm8 = vcmp.gt.f32.partialorder %v8997_v51, -1e+29  ;;  %v5687_v52 = vsel %vm617_vm7, %v8996_v11, 0.0  ;;  %v918_v1 = vrot.slane %v645_v36, 1  ;;  %8998 = vst [vmem:[#allocation63_spill] sm:$0xff] %v5723_v48 }
  0x90   : > { %v5690_v0 = vsel %vm618_vm8, %v8997_v51, 0.0  ;;  %v8872_v50 = vrot.slane %v5668_v20, 1  ;;  %v923_v56 = vrot.slane %v5673_v5, 1  ;;  %v1142_v59 = vrot.slane %v4619_v9, 1  ;;  %v9026_v14 = vld [vmem:[#allocation21_spill] sm:$0xff] }
  0x91   : > { %v5699_v60 = vsel %vm615_vm5, 1.0, %v8866_v8  ;;  %v5704_v61 = vsel %vm616_vm6, 1.0, %v8866_v8  ;;  %v5710_v54 = vsel %vm617_vm7, 1.0, %v8866_v8  ;;  %v5713_v6 = vsel %vm618_vm8, 1.0, %v8866_v8 }
  0x92   : > { %v928_v55 = vrot.slane %v5687_v52, 1  ;;  %v920_v58 = vsel %vm917_vm9, %v918_v1, %v8872_v50  ;;  %v1334_v57 = vrot.slane %v8992_v3, 1  ;;  %v8999_v47 = vrot.slane %v5678_v7, 1 }
  0x93   : > { %v9000_v8 = vrot.slane %v5682_v10, 1  ;;  %v1147_v53 = vrot.slane %v5699_v60, 1  ;;  %v1152_v1 = vrot.slane %v5710_v54, 1  ;;  %v1479_v42 = vrot.slane %v645_v36, 2 }
  0x94   : > { %v925_v45 = vsel %vm917_vm9, %v923_v56, %v8999_v47  ;;  %v8887_v49 = vrot.slane %v5668_v20, 2  ;;  %v805_v43 = vmax.f32 %v8992_v3, -1e+30  ;;  %v9001_v41 = vrot.slane %v5690_v0, 1 }
  0x95   : > { %v1144_v46 = vsel %vm917_vm9, %v1142_v59, %v9000_v8  ;;  %v1030_v56 = vadd.f32 %v920_v58, %v645_v36  ;;  %vm1478_vm10 = vcmask 1045504   ;;  %v807_v8 = vmax.f32 %v8994_v2, -1e+30  ;;  %v9003_v36 = vld [vmem:[#allocation20_spill] sm:$0xff] }
  0x96   : > { %v5740_v47 = vsel %vm917_vm9, %v928_v55, %v9001_v41  ;;  %v1254_v59 = vadd.f32 %v4619_v9, %v1144_v46  ;;  %v9002_v44 = vrot.slane %v8993_v62, 1  ;;  %v1481_v50 = vsel %vm1478_vm10, %v1479_v42, %v8887_v49 }
  0x97   : > { %v809_v40 = vmax.f32 %v8996_v11, -1e+30  ;;  %v1032_v38 = vadd.f32 %v925_v45, %v5673_v5  ;;  %v1623_v37 = vrot.slane %v4619_v9, 2  ;;  %vm619_vm11 = vcmp.gt.f32.partialorder %v9003_v36, -1e+29 }
  0x98   : > { %v1336_v39 = vsel %vm917_vm9, %v1334_v57, %v9002_v44  ;;  %v1034_v46 = vadd.f32 %v5740_v47, %v5687_v52  ;;  %v9004_v58 = vrot.slane %v5704_v61, 1  ;;  %v9005_v57 = vrot.slane %v5713_v6, 1 }
  0x99   : > { %v1339_v55 = vrot.slane %v8994_v2, 1  ;;  %v1446_v49 = vmax.f32 %v805_v43, %v1336_v39  ;;  %v1484_v9 = vrot.slane %v5673_v5, 2  ;;  %v1591_v41 = vadd.f32 %v1481_v50, %v1030_v56 }
  0x9a   : > { %v1149_v44 = vsel %vm917_vm9, %v1147_v53, %v9004_v58  ;;  %v5761_v42 = vsel %vm917_vm9, %v1152_v1, %v9005_v57  ;;  %v9006_v35 = vrot.slane %v5682_v10, 2  ;;  %v8901_v34 = vrot.slane %v5678_v7, 2 }
  0x9b   : > { %v1767_v53 = vrot.slane %v8992_v3, 2  ;;  %v8900_v58 = vrot.slane %v8993_v62, 2  ;;  %v1344_v57 = vrot.slane %v8996_v11, 1  ;;  %v1489_v43 = vrot.slane %v5687_v52, 2 }
  0x9c   : > { %v1625_v33 = vsel %vm1478_vm10, %v1623_v37, %v9006_v35  ;;  %v1628_v56 = vrot.slane %v5699_v60, 2  ;;  %v1633_v37 = vrot.slane %v5710_v54, 2  ;;  %v1915_v1 = vadd.f32 %v1591_v41, %v5673_v5 }
  0x9d   : > { %v1735_v32 = vadd.f32 %v1625_v33, %v1254_v59  ;;  %v1769_v33 = vsel %vm1478_vm10, %v1767_v53, %v8900_v58  ;;  %v1486_v39 = vsel %vm1478_vm10, %v1484_v9, %v8901_v34  ;;  %v1772_v50 = vrot.slane %v8994_v2, 2 }
  0x9e   : > { %v1879_v59 = vmax.f32 %v1446_v49, %v1769_v33  ;;  %v1256_v31 = vadd.f32 %v5699_v60, %v1149_v44  ;;  %v1258_v53 = vadd.f32 %v5710_v54, %v5761_v42  ;;  %v9007_v58 = vrot.slane %v8995_v4, 1 }
  0x9f   : > { %v1951_v35 = vadd.f32 %v5699_v60, %v1735_v32  ;;  %v9008_v41 = vrot.slane %v8997_v51, 1  ;;  %v9009_v33 = vrot.slane %v5690_v0, 2  ;;  %v2027_v60 = vadd.f32 %v1915_v1, %v925_v45 }
  0xa0   : > { %v1341_v49 = vsel %vm917_vm9, %v1339_v55, %v9007_v58  ;;  %v1983_v5 = vmax.f32 %v1879_v59, %v8994_v2  ;;  %v1593_v30 = vadd.f32 %v1486_v39, %v1032_v38  ;;  %v9010_v3 = vrot.slane %v5704_v61, 2 }
  0xa1   : > { %v5800_v9 = vsel %vm917_vm9, %v1344_v57, %v9008_v41  ;;  %v5805_v32 = vsel %vm1478_vm10, %v1489_v43, %v9009_v33  ;;  %v2071_v34 = vadd.f32 %v1951_v35, %v1149_v44  ;;  %v9011_v55 = vrot.slane %v5713_v6, 2 }
  0xa2   : > { %v1630_v29 = vsel %vm1478_vm10, %v1628_v56, %v9010_v3  ;;  %v2113_v58 = vmax.f32 %v1983_v5, %v1341_v49  ;;  %v9012_v57 = vrot.slane %v8995_v4, 2  ;;  %v1777_v43 = vrot.slane %v8996_v11, 2 }
  0xa3   : > { %v5813_v2 = vsel %vm1478_vm10, %v1633_v37, %v9011_v55  ;;  %v8904_v45 = vrot.slane %v8997_v51, 2  ;;  %v2191_v38 = vadd.f32 %v2071_v34, %v1630_v29  ;;  %v5825_v44 = vsel %vm619_vm11, %v9003_v36, 0.0 }
  0xa4   : > { %v5818_v59 = vsel %vm1478_vm10, %v1772_v50, %v9012_v57  ;;  %v9013_v1 = vmov 0.0   ;;  %v2152_v35 = vadd.f32 %v2027_v60, %v1486_v39  ;;  %v5833_v50 = vmax.f32 %v807_v8, %v1341_v49  ;;  %v9014_v57 = vld [vmem:[#allocation13_spill] sm:$0xff] }
  0xa5   : > { %v5830_v56 = vsel %vm619_vm11, 1.0, %v9013_v1  ;;  %v2230_v37 = vmax.f32 %v2113_v58, %v5818_v59  ;;  %v5836_v3 = vmax.f32 %v809_v40, %v5800_v9  ;;  %v1737_v5 = vadd.f32 %v1630_v29, %v1256_v31 }
  0xa6   : > { %v2302_v34 = vadd.f32 %v5710_v54, %v2191_v38  ;;  %v1595_v41 = vadd.f32 %v5805_v32, %v1034_v46  ;;  %v1739_v33 = vadd.f32 %v5813_v2, %v1258_v53  ;;  %vm837_vm12 = vcmp.gt.f32.partialorder %v9014_v57, -1e+29  ;;  %v9015_v46 = vld [vmem:[#allocation16_spill] sm:$0xff]  ;;  %v9016_v53 = vld [vmem:[#allocation19_spill] sm:$0xff] }
  0xa7   : > { %v2334_v55 = vmax.f32 %v2230_v37, %v8996_v11  ;;  %v5846_v39 = vsel %vm1478_vm10, %v1777_v43, %v8904_v45  ;;  %v1917_v8 = vadd.f32 %v1593_v30, %v5687_v52  ;;  %v853_v29 = vsel %vm837_vm12, %v9014_v57, 0.0 }
  0xa8   : > { %v2422_v40 = vadd.f32 %v2302_v34, %v5761_v42  ;;  %v2266_v31 = vadd.f32 %v2152_v35, %v5687_v52  ;;  %vm838_vm13 = vcmp.gt.f32.partialorder %v9015_v46, -1e+29  ;;  %vm839_vm14 = vcmp.gt.f32.partialorder %v9016_v53, -1e+29 }
  0xa9   : > { %v921_v49 = vrot.slane %v853_v29, 1  ;;  %v1953_v60 = vadd.f32 %v5710_v54, %v1737_v5  ;;  %v854_v43 = vsel %vm838_vm13, %v9015_v46, 0.0  ;;  %v5862_v30 = vsel %vm839_vm14, %v9016_v53, 0.0 }
  0xaa   : > { %v2542_v58 = vadd.f32 %v2422_v40, %v5813_v2  ;;  %v5867_v52 = vadd.f32 %v1595_v41, %v5825_v44  ;;  %v2464_v35 = vmax.f32 %v2334_v55, %v5800_v9  ;;  %v4651_v54 = vsel %vm837_vm12, 1.0, %v9013_v1 }
  0xab   : > { %v5876_v5 = vadd.f32 %v5830_v56, %v1739_v33  ;;  %v4652_v34 = vsel %vm838_vm13, 1.0, %v9013_v1  ;;  %v2378_v40 = vadd.f32 %v2266_v31, %v5740_v47  ;;  %v9019_v41 = vrot.slane %v5668_v20, 1 }
  0xac   : > { %9017 = vst [vmem:[#allocation64_spill] sm:$0xff] %v5867_v52  ;;  %4978 = vrcp.f32 %v2542_v58  ;;  %v926_v55 = vrot.slane %v854_v43, 1  ;;  %v931_v45 = vrot.slane %v5862_v30, 1  ;;  %v5885_v27 = vadd.f32 %v1917_v8, %v5740_v47 }
  0xad   : > { %9018 = vst [vmem:[#allocation65_spill] sm:$0xff] %v5876_v5  ;;  %v922_v38 = vsel %vm917_vm9, %v9019_v41, %v921_v49  ;;  %v5888_v37 = vadd.f32 %v1953_v60, %v5761_v42  ;;  %v1145_v33 = vrot.slane %v4651_v54, 1  ;;  %v1337_v58 = vrot.slane %v9014_v57, 1 }
  0xae   : > { %v2581_v28 = vmax.f32 %v2464_v35, %v5846_v39  ;;  %v4653_v31 = vsel %vm839_vm14, 1.0, %v9013_v1  ;;  %v1150_v26 = vrot.slane %v4652_v34, 1  ;;  %v1482_v49 = vrot.slane %v853_v29, 2 }
  0xaf   : > { %v806_v41 = vmax.f32 %v8993_v62, -1e+30  ;;  %v808_v24 = vmax.f32 %v8995_v4, -1e+30  ;;  %v1031_v47 = vadd.f32 %v922_v38, %v5668_v20  ;;  %v9020_v42 = vrot.slane %v5682_v10, 1 }
  0xb0   : > { %v2503_v60 = vadd.f32 %v2378_v40, %v5805_v32  ;;  %v810_v35 = vmax.f32 %v8997_v51, -1e+30  ;;  %v9021_v25 = vrot.slane %v5678_v7, 1  ;;  %v9022_v29 = vrot.slane %v5690_v0, 1 }
  0xb1   : > { %v1146_v8 = vsel %vm917_vm9, %v9020_v42, %v1145_v33  ;;  %v1155_v22 = vrot.slane %v4653_v31, 1  ;;  %v9023_v38 = vrot.slane %v8993_v62, 1  ;;  %v1342_v33 = vrot.slane %v9015_v46, 1 }
  0xb2   : > { %v927_v23 = vsel %vm917_vm9, %v9021_v25, %v926_v55  ;;  %v5909_v21 = vsel %vm917_vm9, %v9022_v29, %v931_v45  ;;  %v9024_v40 = vrot.slane %v5668_v20, 2  ;;  %v2775_v19 = vmul.f32 %v5723_v48, %v2581_v28 }
  0xb3   : > { %v1338_v18 = vsel %vm917_vm9, %v9023_v38, %v1337_v58  ;;  %v9025_v25 = vrot.slane %v5704_v61, 1  ;;  %v1255_v45 = vadd.f32 %v5682_v10, %v1146_v8  ;;  %v1487_v29 = vrot.slane %v854_v43, 2 }
  0xb4   : > { %v1483_v42 = vsel %vm1478_vm10, %v9024_v40, %v1482_v49  ;;  %vm2839_vm15 = vcmask 261120   ;;  %v1347_v17 = vrot.slane %v9016_v53, 1  ;;  %v1626_v58 = vrot.slane %v4651_v54, 2 }
  0xb5   : > { %v1151_v55 = vsel %vm917_vm9, %v9025_v25, %v1150_v26  ;;  %v1592_v15 = vadd.f32 %v1483_v42, %v1031_v47  ;;  %v1631_v38 = vrot.slane %v4652_v34, 2  ;;  %v1033_v16 = vadd.f32 %v927_v23, %v5678_v7 }
  0xb6   : > { %v1035_v20 = vadd.f32 %v5909_v21, %v5690_v0  ;;  %v1447_v49 = vmax.f32 %v806_v41, %v1338_v18  ;;  %v1770_v28 = vrot.slane %v9014_v57, 2  ;;  %v4979_v40 = vpop.eup %4978  ;;  %vm620_vm0 = vcmp.gt.f32.partialorder %v9026_v14, -1e+29 }
  0xb7   : > { %v9027_v26 = vrot.slane %v5713_v6, 1  ;;  %v1257_v8 = vadd.f32 %v5704_v61, %v1151_v55  ;;  %v9028_v54 = vrot.slane %v8995_v4, 1  ;;  %v9029_v47 = vrot.slane %v5682_v10, 2 }
  0xb8   : > { %v2646_v18 = vmul.f32 %v4979_v40, %v2503_v60  ;;  %v9030_v57 = vrot.slane %v5678_v7, 2  ;;  %v9031_v25 = vrot.slane %v5704_v61, 2  ;;  %v9032_v52 = vrot.slane %v8997_v51, 1 }
  0xb9   : > { %v1156_v43 = vsel %vm917_vm9, %v9027_v26, %v1155_v22  ;;  %v1343_v34 = vsel %vm917_vm9, %v9028_v54, %v1342_v33  ;;  %v1627_v42 = vsel %vm1478_vm10, %v9029_v47, %v1626_v58  ;;  %v2613_v26 = vld [vmem:[#allocation2] sm:$0xff]  ;;  %v1492_v10 = vrot.slane %v5862_v30, 2 }
  0xba   : > { %v1488_v41 = vsel %vm1478_vm10, %v9030_v57, %v1487_v29  ;;  %v1632_v5 = vsel %vm1478_vm10, %v9031_v25, %v1631_v38  ;;  %v1736_v22 = vadd.f32 %v1627_v42, %v1255_v45  ;;  %v5948_v48 = vsel %vm917_vm9, %v9032_v52, %v1347_v17 }
  0xbb   : > { %v9033_v33 = vrot.slane %v8993_v62, 2  ;;  %v1916_v58 = vadd.f32 %v1592_v15, %v5678_v7  ;;  %v2710_v29 = vmul.f32 %v5707_v63, %v2646_v18  ;;  %v1636_v40 = vrot.slane %v4653_v31, 2 }
  0xbc   : > { %v1775_v38 = vrot.slane %v9015_v46, 2  ;;  %v1594_v54 = vadd.f32 %v1488_v41, %v1033_v16  ;;  %v1738_v47 = vadd.f32 %v1632_v5, %v1257_v8  ;;  %v1780_v42 = vrot.slane %v9016_v53, 2 }
  0xbd   : > { %v1771_v60 = vsel %vm1478_vm10, %v9033_v33, %v1770_v28  ;;  %v1952_v17 = vadd.f32 %v5704_v61, %v1736_v22  ;;  %v2742_v52 = vadd.f32 %v2710_v29, %v2613_v26  ;;  %v1259_v30 = vadd.f32 %v5713_v6, %v1156_v43 }
  0xbe   : > { %v1880_v45 = vmax.f32 %v1447_v49, %v1771_v60  ;;  %v1449_v62 = vmax.f32 %v808_v24, %v1343_v34  ;;  %v1451_v15 = vmax.f32 %v810_v35, %v5948_v48  ;;  %v9034_v7 = vrot.slane %v5690_v0, 2 }
  0xbf   : > { %v2028_v46 = vadd.f32 %v1916_v58, %v927_v23  ;;  %v2072_v16 = vadd.f32 %v1952_v17, %v1151_v55  ;;  %v2807_v49 = vadd.f32 %v2775_v19, %v2742_v52  ;;  %v9035_v53 = vrot.slane %v5713_v6, 2 }
  0xc0   : > { %v1984_v28 = vmax.f32 %v1880_v45, %v8995_v4  ;;  %v5965_v31 = vsel %vm1478_vm10, %v9034_v7, %v1492_v10  ;;  %v9036_v8 = vrot.slane %v8995_v4, 2  ;;  %v9037_v57 = vrot.slane %v8997_v51, 2 }
  0xc1   : > { %v1637_v61 = vsel %vm1478_vm10, %v9035_v53, %v1636_v40  ;;  %v1918_v25 = vadd.f32 %v1594_v54, %v5690_v0  ;;  %v1954_v23 = vadd.f32 %v5713_v6, %v1738_v47  ;;  %v2192_v55 = vadd.f32 %v2072_v16, %v1632_v5  ;;  %2840 = vst.msk [vmem:[#allocation2] sm:$0xff] %vm2839_vm15, %v2807_v49 }
  0xc2   : > { %v1776_v24 = vsel %vm1478_vm10, %v9036_v8, %v1775_v38  ;;  %v2114_v18 = vmax.f32 %v1984_v28, %v1343_v34  ;;  %v5976_v35 = vsel %vm1478_vm10, %v9037_v57, %v1780_v42  ;;  %v9038_v19 = vmax.f32 %v5833_v50, %v5818_v59 }
  0xc3   : > { %v5988_v4 = vsel %vm620_vm0, %v9026_v14, 0.0  ;;  %v1596_v34 = vadd.f32 %v5965_v31, %v1035_v20  ;;  %v1740_v10 = vadd.f32 %v1637_v61, %v1259_v30  ;;  %v1882_v33 = vmax.f32 %v1449_v62, %v1776_v24 }
  0xc4   : > { %v1985_v22 = vmax.f32 %v9038_v19, %v8996_v11  ;;  %v2231_v26 = vmax.f32 %v2114_v18, %v1776_v24  ;;  %v2153_v60 = vadd.f32 %v2028_v46, %v1488_v41  ;;  %v2303_v5 = vadd.f32 %v5713_v6, %v2192_v55 }
  0xc5   : > { %v9039_v59 = vmax.f32 %v5836_v3, %v5846_v39  ;;  %v2154_v50 = vadd.f32 %v5885_v27, %v5805_v32  ;;  %v2193_v58 = vadd.f32 %v5888_v37, %v5813_v2  ;;  %v1884_v20 = vmax.f32 %v1451_v15, %v5976_v35 }
  0xc6   : > { %v6006_v41 = vsel %vm620_vm0, 1.0, %v9013_v1  ;;  %v2030_v6 = vadd.f32 %v1918_v25, %v5909_v21  ;;  %v2074_v29 = vadd.f32 %v1954_v23, %v1156_v43  ;;  %v2423_v40 = vadd.f32 %v2303_v5, %v1156_v43 }
  0xc7   : > { %v5996_v11 = vmax.f32 %v9039_v59, %v9003_v36  ;;  %v6010_v3 = vadd.f32 %v1596_v34, %v5988_v4  ;;  %v2335_v38 = vmax.f32 %v2231_v26, %v8997_v51  ;;  %v933_v27 = vrot.slane %v5825_v44, 1  ;;  %v9040_v59 = vld [vmem:[#allocation63_spill] sm:$0xff] }
  0xc8   : > { %v934_v32 = vrot.slane %v5988_v4, 1  ;;  %v6016_v2 = vadd.f32 %v6006_v41, %v1740_v10  ;;  %v6019_v37 = vmax.f32 %v1882_v33, %v8997_v51  ;;  %v2267_v45 = vadd.f32 %v2153_v60, %v5690_v0 }
  0xc9   : > { %v2543_v54 = vadd.f32 %v2423_v40, %v1637_v61  ;;  %v6023_v43 = vmax.f32 %v1884_v20, %v9026_v14  ;;  %vm621_vm1 = vcmp.gt.f32.partialorder %v5365_v13, -1e+29  ;;  %v1157_v47 = vrot.slane %v5830_v56, 1 }
  0xca   : > { %v1158_v42 = vrot.slane %v6006_v41, 1  ;;  %v6029_v17 = vadd.f32 %v2030_v6, %v5965_v31  ;;  %v6031_v52 = vadd.f32 %v2074_v29, %v1637_v61  ;;  %v6034_v51 = vsel %vm621_vm1, %v5365_v13, 0.0  ;;  %v9041_v6 = vld [vmem:[#allocation64_spill] sm:$0xff] }
  0xcb   : > { %4980 = vrcp.f32 %v2543_v54  ;;  %v2465_v0 = vmax.f32 %v2335_v38, %v5948_v48  ;;  %v935_v30 = vsel %vm917_vm9, %v933_v27, %v934_v32  ;;  %v1349_v62 = vrot.slane %v9003_v36, 1 }
  0xcc   : > { %v1350_v28 = vrot.slane %v9026_v14, 1  ;;  %v2379_v15 = vadd.f32 %v2267_v45, %v5909_v21  ;;  %v1494_v7 = vrot.slane %v5825_v44, 2  ;;  %v1495_v46 = vrot.slane %v5988_v4, 2 }
  0xcd   : > { %v2115_v16 = vmax.f32 %v1985_v22, %v5800_v9  ;;  %v6047_v49 = vsel %vm621_vm1, 1.0, %v9013_v1  ;;  %v1159_v53 = vsel %vm917_vm9, %v1157_v47, %v1158_v42  ;;  %v1638_v61 = vrot.slane %v5830_v56, 2 }
  0xce   : > { %v1639_v8 = vrot.slane %v6006_v41, 2  ;;  %v811_v24 = vmax.f32 %v9003_v36, -1e+30  ;;  %v1036_v21 = vadd.f32 %v935_v30, %v5825_v44  ;;  %v2304_v57 = vadd.f32 %v5830_v56, %v2193_v58 }
  0xcf   : > { %v2232_v18 = vmax.f32 %v2115_v16, %v5846_v39  ;;  %v2582_v9 = vmax.f32 %v2465_v0, %v5976_v35  ;;  %v6060_v25 = vsel %vm917_vm9, %v1349_v62, %v1350_v28  ;;  %v1782_v23 = vrot.slane %v9003_v36, 2  ;;  %v2614_v62 = vld [vmem:[#allocation2 + $0x8] sm:$0xff] }
  0xd0   : > { %v1783_v55 = vrot.slane %v9026_v14, 2  ;;  %v2504_v19 = vadd.f32 %v2379_v15, %v5965_v31  ;;  %v1260_v22 = vadd.f32 %v5830_v56, %v1159_v53  ;;  %v1496_v34 = vsel %vm1478_vm10, %v1494_v7, %v1495_v46 }
  0xd1   : > { %v2424_v26 = vadd.f32 %v2304_v57, %v1159_v53  ;;  %v1640_v39 = vsel %vm1478_vm10, %v1638_v61, %v1639_v8  ;;  %v2268_v10 = vadd.f32 %v2154_v50, %v5825_v44  ;;  %v2336_v33 = vmax.f32 %v2232_v18, %v9003_v36  ;;  %v9042_v36 = vld [vmem:[#allocation65_spill] sm:$0xff] }
  0xd2   : > { %vm840_vm2 = vcmp.gt.f32.partialorder %v5358_v12, -1e+29  ;;  %v1452_v60 = vmax.f32 %v811_v24, %v6060_v25  ;;  %v1352_v56 = vrot.slane %v5358_v12, 1  ;;  %v2776_v58 = vmul.f32 %v9040_v59, %v2582_v9  ;;  %v9043_v9 = vld [vmem:[#allocation22_spill] sm:$0xff] }
  0xd3   : > { %v2544_v5 = vadd.f32 %v2424_v26, %v1640_v39  ;;  %v856_v31 = vsel %vm840_vm2, %v5358_v12, 0.0  ;;  %v6078_v20 = vsel %vm1478_vm10, %v1782_v23, %v1783_v55  ;;  %v2031_v29 = vadd.f32 %v9041_v6, %v935_v30 }
  0xd4   : > { %v936_v40 = vrot.slane %v856_v31, 1  ;;  %v1597_v50 = vadd.f32 %v1496_v34, %v1036_v21  ;;  %v2075_v38 = vadd.f32 %v9042_v36, %v1159_v53  ;;  %v4654_v27 = vsel %vm840_vm2, 1.0, %v9013_v1 }
  0xd5   : > { %v4981_v44 = vpop.eup %4980  ;;  %4982 = vrcp.f32 %v2544_v5  ;;  %v2380_v54 = vadd.f32 %v2268_v10, %v935_v30  ;;  %v2466_v47 = vmax.f32 %v2336_v33, %v6060_v25  ;;  %v812_v0 = vmax.f32 %v9026_v14, -1e+30 }
  0xd6   : > { %v2648_v45 = vmul.f32 %v4981_v44, %v2504_v19  ;;  %v1741_v15 = vadd.f32 %v1640_v39, %v1260_v22  ;;  %v1885_v7 = vmax.f32 %v1452_v60, %v6078_v20  ;;  %v6087_v16 = vsel %vm917_vm9, %v1350_v28, %v1352_v56 }
  0xd7   : > { %v1497_v61 = vrot.slane %v856_v31, 2  ;;  %v937_v53 = vsel %vm917_vm9, %v934_v32, %v936_v40  ;;  %v1160_v21 = vrot.slane %v4654_v27, 1  ;;  %v1785_v30 = vrot.slane %v5358_v12, 2 }
  0xd8   : > { %v2711_v24 = vmul.f32 %v5707_v63, %v2648_v45  ;;  %v6094_v18 = vadd.f32 %v2031_v29, %v1496_v34  ;;  %v6096_v57 = vadd.f32 %v2075_v38, %v1640_v39  ;;  %vm622_vm3 = vcmp.gt.f32.partialorder %v9043_v9, -1e+29 }
  0xd9   : > { %v2116_v28 = vmax.f32 %v6019_v37, %v5948_v48  ;;  %v2505_v19 = vadd.f32 %v2380_v54, %v1496_v34  ;;  %v2583_v22 = vmax.f32 %v2466_v47, %v6078_v20  ;;  %v1453_v26 = vmax.f32 %v812_v0, %v6087_v16 }
  0xda   : > { %v2743_v23 = vadd.f32 %v2711_v24, %v2614_v62  ;;  %v1037_v32 = vadd.f32 %v937_v53, %v5988_v4  ;;  %v1498_v10 = vsel %vm1478_vm10, %v1495_v46, %v1497_v61  ;;  %v1641_v33 = vrot.slane %v4654_v27, 2  ;;  %v2615_v27 = vld [vmem:[#allocation2 + $0x10] sm:$0xff] }
  0xdb   : > { %v2233_v60 = vmax.f32 %v2116_v28, %v5976_v35  ;;  %v1161_v5 = vsel %vm917_vm9, %v1158_v42, %v1160_v21  ;;  %v6110_v48 = vsel %vm1478_vm10, %v1783_v55, %v1785_v30  ;;  %v2305_v37 = vadd.f32 %v6006_v41, %v6031_v52  ;;  %v9044_v30 = vld [vmem:[#allocation24_spill] sm:$0xff] }
  0xdc   : > { %v2808_v39 = vadd.f32 %v2776_v58, %v2743_v23  ;;  %v6115_v34 = vadd.f32 %v1597_v50, %v6034_v51  ;;  %v6118_v31 = vadd.f32 %v6047_v49, %v1741_v15  ;;  %v6121_v46 = vmax.f32 %v1885_v7, %v5365_v13 }
  0xdd   : > { %v2337_v35 = vmax.f32 %v2233_v60, %v9026_v14  ;;  %v2777_v42 = vmul.f32 %v9040_v59, %v2583_v22  ;;  %v6129_v55 = vsel %vm622_vm3, %v9043_v9, 0.0  ;;  %v6134_v52 = vsel %vm622_vm3, 1.0, %v9013_v1 }
  0xde   : > { %2841 = vst.msk [vmem:[#allocation2 + $0x8] sm:$0xff] %vm2839_vm15, %v2808_v39  ;;  %v2425_v56 = vadd.f32 %v2305_v37, %v1161_v5  ;;  %v1261_v6 = vadd.f32 %v6006_v41, %v1161_v5  ;;  %v1598_v29 = vadd.f32 %v1498_v10, %v1037_v32  ;;  %v1642_v14 = vsel %vm1478_vm10, %v1639_v8, %v1641_v33 }
  0xdf   : > { %v4983_v58 = vpop.eup %4982  ;;  %v1886_v40 = vmax.f32 %v1453_v26, %v6110_v48  ;;  %v2032_v50 = vadd.f32 %v6010_v3, %v937_v53  ;;  %v2269_v36 = vadd.f32 %v6029_v17, %v5988_v4  ;;  %v2076_v45 = vadd.f32 %v6016_v2, %v1161_v5 }
  0xe0   : > { %v2650_v44 = vmul.f32 %v4983_v58, %v2505_v19  ;;  %v2545_v38 = vadd.f32 %v2425_v56, %v1642_v14  ;;  %v2467_v54 = vmax.f32 %v2337_v35, %v6087_v16  ;;  %v938_v47 = vrot.slane %v6034_v51, 1 }
  0xe1   : > { %v939_v41 = vrot.slane %v6129_v55, 1  ;;  %v1162_v0 = vrot.slane %v6047_v49, 1  ;;  %v1163_v3 = vrot.slane %v6134_v52, 1  ;;  %v1742_v62 = vadd.f32 %v1642_v14, %v1261_v6 }
  0xe2   : > { %v2712_v8 = vmul.f32 %v5707_v63, %v2650_v44  ;;  %4984 = vrcp.f32 %v2545_v38  ;;  %v6152_v4 = vmax.f32 %v1886_v40, %v9043_v9  ;;  %v1354_v17 = vrot.slane %v5365_v13, 1 }
  0xe3   : > { %v1355_v2 = vrot.slane %v9043_v9, 1  ;;  %v6157_v7 = vadd.f32 %v1598_v29, %v6129_v55  ;;  %v6159_v61 = vadd.f32 %v2032_v50, %v1498_v10  ;;  %v2381_v24 = vadd.f32 %v2269_v36, %v937_v53  ;;  %v9045_v36 = vld [vmem:[#allocation23_spill] sm:$0xff] }
  0xe4   : > { %v2744_v15 = vadd.f32 %v2712_v8, %v2615_v27  ;;  %v2584_v21 = vmax.f32 %v2467_v54, %v6110_v48  ;;  %vm623_vm4 = vcmp.gt.f32.partialorder %v9044_v30, -1e+29  ;;  %v813_v28 = vmax.f32 %v5365_v13, -1e+30 }
  0xe5   : > { %v940_v23 = vsel %vm917_vm9, %v938_v47, %v939_v41  ;;  %v1164_v22 = vsel %vm917_vm9, %v1162_v0, %v1163_v3  ;;  %v1499_v26 = vrot.slane %v6034_v51, 2  ;;  %v1500_v32 = vrot.slane %v6129_v55, 2 }
  0xe6   : > { %v2809_v19 = vadd.f32 %v2777_v42, %v2744_v15  ;;  %v6172_v53 = vadd.f32 %v2076_v45, %v1642_v14  ;;  %v6175_v33 = vsel %vm917_vm9, %v1354_v17, %v1355_v2  ;;  %v1643_v60 = vrot.slane %v6047_v49, 2 }
  0xe7   : > { %v1644_v39 = vrot.slane %v6134_v52, 2  ;;  %v6181_v5 = vadd.f32 %v6134_v52, %v1742_v62  ;;  %v2506_v37 = vadd.f32 %v2381_v24, %v1498_v10  ;;  %v6186_v35 = vsel %vm623_vm4, %v9044_v30, 0.0  ;;  %v2616_v62 = vld [vmem:[#allocation2 + $0x18] sm:$0xff] }
  0xe8   : > { %2842 = vst.msk [vmem:[#allocation2 + $0x10] sm:$0xff] %vm2839_vm15, %v2809_v19  ;;  %v2117_v42 = vmax.f32 %v5996_v11, %v6060_v25  ;;  %v6193_v56 = vsel %vm623_vm4, 1.0, %v9013_v1  ;;  %v1038_v58 = vadd.f32 %v940_v23, %v6034_v51  ;;  %v1262_v6 = vadd.f32 %v6047_v49, %v1164_v22 }
  0xe9   : > { %v2306_v10 = vadd.f32 %v6047_v49, %v6096_v57  ;;  %v2778_v29 = vmul.f32 %v9040_v59, %v2584_v21  ;;  %v6201_v14 = vmax.f32 %v813_v28, %v6175_v33  ;;  %v1501_v40 = vsel %vm1478_vm10, %v1499_v26, %v1500_v32 }
  0xea   : > { %v1787_v11 = vrot.slane %v5365_v13, 2  ;;  %v1645_v25 = vsel %vm1478_vm10, %v1643_v60, %v1644_v39  ;;  %v1788_v44 = vrot.slane %v9043_v9, 2  ;;  %vm841_vm5 = vcmp.gt.f32.partialorder %v9045_v36, -1e+29 }
  0xeb   : > { %v2426_v50 = vadd.f32 %v2306_v10, %v1164_v22  ;;  %v2234_v27 = vmax.f32 %v2117_v42, %v6078_v20  ;;  %v857_v49 = vsel %vm841_vm5, %v9045_v36, 0.0  ;;  %v4655_v57 = vsel %vm841_vm5, 1.0, %v9013_v1 }
  0xec   : > { %v4985_v38 = vpop.eup %4984  ;;  %v1357_v45 = vrot.slane %v9045_v36, 1  ;;  %v941_v8 = vrot.slane %v857_v49, 1  ;;  %v1165_v0 = vrot.slane %v4655_v57, 1  ;;  %v1599_v17 = vadd.f32 %v1501_v40, %v1038_v58 }
  0xed   : > { %v2652_v54 = vmul.f32 %v4985_v38, %v2506_v37  ;;  %v2546_v47 = vadd.f32 %v2426_v50, %v1645_v25  ;;  %v2033_v15 = vadd.f32 %v6115_v34, %v940_v23  ;;  %v2077_v24 = vadd.f32 %v6118_v31, %v1164_v22  ;;  %v9046_v50 = vld [vmem:[#allocation25_spill] sm:$0xff] }
  0xee   : > { %v2270_v21 = vadd.f32 %v6094_v18, %v6034_v51  ;;  %v1743_v28 = vadd.f32 %v1645_v25, %v1262_v6  ;;  %v6218_v19 = vsel %vm1478_vm10, %v1787_v11, %v1788_v44  ;;  %v2338_v26 = vmax.f32 %v2234_v27, %v5365_v13 }
  0xef   : > { %v2713_v20 = vmul.f32 %v5707_v63, %v2652_v54  ;;  %4986 = vrcp.f32 %v2546_v47  ;;  %v814_v60 = vmax.f32 %v9043_v9, -1e+30  ;;  %v6223_v37 = vsel %vm917_vm9, %v1355_v2, %v1357_v45 }
  0xf0   : > { %v1502_v34 = vrot.slane %v857_v49, 2  ;;  %v942_v51 = vsel %vm917_vm9, %v939_v41, %v941_v8  ;;  %v1166_v18 = vsel %vm917_vm9, %v1163_v3, %v1165_v0  ;;  %v1646_v31 = vrot.slane %v4655_v57, 2 }
  0xf1   : > { %v2745_v42 = vadd.f32 %v2713_v20, %v2616_v62  ;;  %v6231_v22 = vadd.f32 %v2033_v15, %v1501_v40  ;;  %v6233_v58 = vadd.f32 %v2077_v24, %v1645_v25  ;;  %v2382_v6 = vadd.f32 %v2270_v21, %v940_v23  ;;  %v2617_v21 = vld [vmem:[#allocation2 + $0x20] sm:$0xff] }
  0xf2   : > { %v1790_v10 = vrot.slane %v9045_v36, 2  ;;  %v1887_v11 = vmax.f32 %v6201_v14, %v6218_v19  ;;  %vm624_vm6 = vcmp.gt.f32.partialorder %v9046_v50, -1e+29  ;;  %v2118_v41 = vmax.f32 %v6023_v43, %v6087_v16 }
  0xf3   : > { %v2810_v2 = vadd.f32 %v2778_v29, %v2745_v42  ;;  %v2468_v38 = vmax.f32 %v2338_v26, %v6175_v33  ;;  %v1039_v3 = vadd.f32 %v942_v51, %v6129_v55  ;;  %v1263_v27 = vadd.f32 %v6134_v52, %v1166_v18 }
  0xf4   : > { %v1455_v25 = vmax.f32 %v814_v60, %v6223_v37  ;;  %v1503_v23 = vsel %vm1478_vm10, %v1500_v32, %v1502_v34  ;;  %v1647_v29 = vsel %vm1478_vm10, %v1644_v39, %v1646_v31  ;;  %v2235_v14 = vmax.f32 %v2118_v41, %v6110_v48 }
  0xf5   : > { %2843 = vst.msk [vmem:[#allocation2 + $0x18] sm:$0xff] %vm2839_vm15, %v2810_v2  ;;  %v2307_v36 = vadd.f32 %v6134_v52, %v6172_v53  ;;  %v6252_v43 = vadd.f32 %v1599_v17, %v6186_v35  ;;  %v6255_v16 = vadd.f32 %v6193_v56, %v1743_v28  ;;  %v2507_v49 = vadd.f32 %v2382_v6, %v1501_v40  ;;  %v9047_v6 = vld [vmem:[#allocation27_spill] sm:$0xff] }
  0xf6   : > { %v6258_v57 = vsel %vm1478_vm10, %v1788_v44, %v1790_v10  ;;  %v6263_v32 = vsel %vm624_vm6, %v9046_v50, 0.0  ;;  %v6268_v48 = vsel %vm624_vm6, 1.0, %v9013_v1  ;;  %v2339_v52 = vmax.f32 %v2235_v14, %v9043_v9 }
  0xf7   : > { %v2427_v53 = vadd.f32 %v2307_v36, %v1166_v18  ;;  %v2585_v39 = vmax.f32 %v2468_v38, %v6218_v19  ;;  %v1600_v45 = vadd.f32 %v1503_v23, %v1039_v3  ;;  %v1744_v40 = vadd.f32 %v1647_v29, %v1263_v27 }
  0xf8   : > { %v2034_v44 = vadd.f32 %v6157_v7, %v942_v51  ;;  %v1888_v47 = vmax.f32 %v1455_v25, %v6258_v57  ;;  %v2078_v8 = vadd.f32 %v6181_v5, %v1166_v18  ;;  %v2271_v0 = vadd.f32 %v6159_v61, %v6129_v55 }
  0xf9   : > { %v4987_v54 = vpop.eup %4986  ;;  %v2547_v62 = vadd.f32 %v2427_v53, %v1647_v29  ;;  %v6278_v17 = vmax.f32 %v1887_v11, %v9044_v30  ;;  %v943_v15 = vrot.slane %v6186_v35, 1  ;;  %v944_v24 = vrot.slane %v6263_v32, 1 }
  0xfa   : > { %v2654_v9 = vmul.f32 %v4987_v54, %v2507_v49  ;;  %v2469_v7 = vmax.f32 %v2339_v52, %v6223_v37  ;;  %v1167_v20 = vrot.slane %v6193_v56, 1  ;;  %v1168_v5 = vrot.slane %v6268_v48, 1 }
  0xfb   : > { %4988 = vrcp.f32 %v2547_v62  ;;  %v2779_v55 = vmul.f32 %v9040_v59, %v2585_v39  ;;  %v6288_v61 = vadd.f32 %v1600_v45, %v6263_v32  ;;  %v6291_v26 = vadd.f32 %v6268_v48, %v1744_v40 }
  0xfc   : > { %v2714_v28 = vmul.f32 %v5707_v63, %v2654_v9  ;;  %v6294_v60 = vmax.f32 %v1888_v47, %v9046_v50  ;;  %v6296_v34 = vadd.f32 %v2034_v44, %v1503_v23  ;;  %v6298_v42 = vadd.f32 %v2078_v8, %v1647_v29 }
  0xfd   : > { %v2383_v18 = vadd.f32 %v2271_v0, %v942_v51  ;;  %vm625_vm7 = vcmp.gt.f32.partialorder %v9047_v6, -1e+29  ;;  %v1359_v10 = vrot.slane %v9044_v30, 1  ;;  %v1360_v2 = vrot.slane %v9046_v50, 1  ;;  %v9048_v0 = vld [vmem:[#allocation26_spill] sm:$0xff] }
  0xfe   : > { %v2746_v31 = vadd.f32 %v2714_v28, %v2617_v21  ;;  %v2586_v11 = vmax.f32 %v2469_v7, %v6258_v57  ;;  %v945_v41 = vsel %vm917_vm9, %v943_v15, %v944_v24  ;;  %v1169_v38 = vsel %vm917_vm9, %v1167_v20, %v1168_v5  ;;  %v2618_v28 = vld [vmem:[#allocation2 + $0x28] sm:$0xff] }
  0xff   : > { %v2119_v51 = vmax.f32 %v6121_v46, %v6175_v33  ;;  %v815_v27 = vmax.f32 %v9044_v30, -1e+30  ;;  %v1504_v25 = vrot.slane %v6186_v35, 2  ;;  %v1505_v29 = vrot.slane %v6263_v32, 2 }
 0x100   : > { %v2811_v3 = vadd.f32 %v2779_v55, %v2746_v31  ;;  %v2508_v14 = vadd.f32 %v2383_v18, %v1503_v23  ;;  %v6318_v36 = vsel %vm625_vm7, %v9047_v6, 0.0  ;;  %v1648_v49 = vrot.slane %v6193_v56, 2 }
 0x101   : > { %v1649_v52 = vrot.slane %v6268_v48, 2  ;;  %v6326_v46 = vsel %vm625_vm7, 1.0, %v9013_v1  ;;  %v1040_v33 = vadd.f32 %v945_v41, %v6186_v35  ;;  %v1264_v23 = vadd.f32 %v6193_v56, %v1169_v38 }
 0x102   : > { %2844 = vst.msk [vmem:[#allocation2 + $0x20] sm:$0xff] %vm2839_vm15, %v2811_v3  ;;  %v2308_v53 = vadd.f32 %v6193_v56, %v6233_v58  ;;  %v2780_v39 = vmul.f32 %v9040_v59, %v2586_v11  ;;  %v6334_v45 = vsel %vm917_vm9, %v1359_v10, %v1360_v2  ;;  %v1792_v40 = vrot.slane %v9044_v30, 2 }
 0x103   : > { %v2236_v44 = vmax.f32 %v2119_v51, %v6218_v19  ;;  %v1506_v54 = vsel %vm1478_vm10, %v1504_v25, %v1505_v29  ;;  %v1793_v47 = vrot.slane %v9046_v50, 2  ;;  %vm842_vm8 = vcmp.gt.f32.partialorder %v9048_v0, -1e+29 }
 0x104   : > { %v2428_v8 = vadd.f32 %v2308_v53, %v1169_v38  ;;  %v1650_v9 = vsel %vm1478_vm10, %v1648_v49, %v1649_v52  ;;  %v2035_v56 = vadd.f32 %v6252_v43, %v945_v41  ;;  %v858_v58 = vsel %vm842_vm8, %v9048_v0, 0.0 }
 0x105   : > { %v4989_v62 = vpop.eup %4988  ;;  %v4656_v15 = vsel %vm842_vm8, 1.0, %v9013_v1  ;;  %v2272_v19 = vadd.f32 %v6231_v22, %v6186_v35  ;;  %v946_v20 = vrot.slane %v858_v58, 1  ;;  %v1456_v55 = vmax.f32 %v815_v27, %v6334_v45 }
 0x106   : > { %v2656_v21 = vmul.f32 %v4989_v62, %v2508_v14  ;;  %v2548_v7 = vadd.f32 %v2428_v8, %v1650_v9  ;;  %v1601_v18 = vadd.f32 %v1506_v54, %v1040_v33  ;;  %v2340_v31 = vmax.f32 %v2236_v44, %v9044_v30 }
 0x107   : > { %v1170_v10 = vrot.slane %v4656_v15, 1  ;;  %v2079_v43 = vadd.f32 %v6255_v16, %v1169_v38  ;;  %v1362_v51 = vrot.slane %v9048_v0, 1  ;;  %v1745_v3 = vadd.f32 %v1650_v9, %v1264_v23 }
 0x108   : > { %v2715_v11 = vmul.f32 %v5707_v63, %v2656_v21  ;;  %4990 = vrcp.f32 %v2548_v7  ;;  %v6353_v25 = vsel %vm1478_vm10, %v1792_v40, %v1793_v47  ;;  %v947_v35 = vsel %vm917_vm9, %v944_v24, %v946_v20 }
 0x109   : > { %v1507_v22 = vrot.slane %v858_v58, 2  ;;  %v6358_v14 = vadd.f32 %v2035_v56, %v1506_v54  ;;  %v2384_v30 = vadd.f32 %v2272_v19, %v945_v41  ;;  %v816_v49 = vmax.f32 %v9046_v50, -1e+30 }
 0x10a   : > { %v2747_v27 = vadd.f32 %v2715_v11, %v2618_v28  ;;  %v2470_v16 = vmax.f32 %v2340_v31, %v6334_v45  ;;  %v1171_v38 = vsel %vm917_vm9, %v1168_v5, %v1170_v10  ;;  %v1651_v33 = vrot.slane %v4656_v15, 2 }
 0x10b   : > { %v2120_v23 = vmax.f32 %v6152_v4, %v6223_v37  ;;  %v1041_v24 = vadd.f32 %v947_v35, %v6263_v32  ;;  %v6369_v40 = vsel %vm917_vm9, %v1360_v2, %v1362_v51  ;;  %v1795_v41 = vrot.slane %v9048_v0, 2 }
 0x10c   : > { %v2812_v53 = vadd.f32 %v2780_v39, %v2747_v27  ;;  %v1889_v44 = vmax.f32 %v1456_v55, %v6353_v25  ;;  %v6374_v8 = vadd.f32 %v1601_v18, %v6318_v36  ;;  %v2199_v62 = vadd.f32 %v2079_v43, %v1650_v9 }
 0x10d   : > { %v1508_v5 = vsel %vm1478_vm10, %v1505_v29, %v1507_v22  ;;  %v6379_v4 = vadd.f32 %v6326_v46, %v1745_v3  ;;  %v1265_v37 = vadd.f32 %v6268_v48, %v1171_v38  ;;  %v2237_v2 = vmax.f32 %v2120_v23, %v6258_v57  ;;  %v9049_v29 = vld [vmem:[#allocation28_spill] sm:$0xff] }
 0x10e   : > { %2845 = vst.msk [vmem:[#allocation2 + $0x28] sm:$0xff] %vm2839_vm15, %v2812_v53  ;;  %v2309_v39 = vadd.f32 %v6268_v48, %v6298_v42  ;;  %v2509_v0 = vadd.f32 %v2384_v30, %v1506_v54  ;;  %v2587_v56 = vmax.f32 %v2470_v16, %v6353_v25  ;;  %v1457_v58 = vmax.f32 %v816_v49, %v6369_v40 }
 0x10f   : > { %v1652_v9 = vsel %vm1478_vm10, %v1649_v52, %v1651_v33  ;;  %vm626_vm11 = vcmp.gt.f32.partialorder %v9049_v29, -1e+29  ;;  %v1602_v15 = vadd.f32 %v1508_v5, %v1041_v24  ;;  %v6390_v21 = vsel %vm1478_vm10, %v1793_v47, %v1795_v41 }
 0x110   : > { %v2429_v19 = vadd.f32 %v2309_v39, %v1171_v38  ;;  %v6393_v7 = vsel %vm626_vm11, %v9049_v29, 0.0  ;;  %v2036_v57 = vadd.f32 %v6288_v61, %v947_v35  ;;  %v2080_v48 = vadd.f32 %v6291_v26, %v1171_v38  ;;  %v2619_v26 = vld [vmem:[#allocation2 + $0x30] sm:$0xff]  ;;  %v9050_v38 = vld [vmem:[#allocation30_spill] sm:$0xff] }
 0x111   : > { %v2341_v42 = vmax.f32 %v2237_v2, %v9046_v50  ;;  %v6399_v20 = vmax.f32 %v1889_v44, %v9047_v6  ;;  %v1746_v52 = vadd.f32 %v1652_v9, %v1265_v37  ;;  %v2273_v28 = vadd.f32 %v6296_v34, %v6263_v32 }
 0x112   : > { %v4991_v54 = vpop.eup %4990  ;;  %v2549_v47 = vadd.f32 %v2429_v19, %v1652_v9  ;;  %v2781_v18 = vmul.f32 %v9040_v59, %v2587_v56  ;;  %v6405_v31 = vsel %vm626_vm11, 1.0, %v9013_v1  ;;  %v1890_v61 = vmax.f32 %v1457_v58, %v6390_v21 }
 0x113   : > { %v2658_v55 = vmul.f32 %v4991_v54, %v2509_v0  ;;  %v6409_v50 = vadd.f32 %v1602_v15, %v6393_v7  ;;  %v948_v10 = vrot.slane %v6318_v36, 1  ;;  %v949_v11 = vrot.slane %v6393_v7, 1 }
 0x114   : > { %4992 = vrcp.f32 %v2549_v47  ;;  %v6414_v34 = vadd.f32 %v2036_v57, %v1508_v5  ;;  %v6416_v43 = vadd.f32 %v2080_v48, %v1652_v9  ;;  %v2471_v51 = vmax.f32 %v2341_v42, %v6369_v40  ;;  %v9051_v48 = vld [vmem:[#allocation29_spill] sm:$0xff] }
 0x115   : > { %v2716_v32 = vmul.f32 %v5707_v63, %v2658_v55  ;;  %v6420_v3 = vadd.f32 %v6405_v31, %v1746_v52  ;;  %v2385_v22 = vadd.f32 %v2273_v28, %v947_v35  ;;  %v1172_v27 = vrot.slane %v6326_v46, 1 }
 0x116   : > { %v1173_v30 = vrot.slane %v6405_v31, 1  ;;  %v6425_v16 = vmax.f32 %v1890_v61, %v9049_v29  ;;  %vm627_vm12 = vcmp.gt.f32.partialorder %v9050_v38, -1e+29  ;;  %v817_v33 = vmax.f32 %v9047_v6, -1e+30 }
 0x117   : > { %v2748_v49 = vadd.f32 %v2716_v32, %v2619_v26  ;;  %v950_v23 = vsel %vm917_vm9, %v948_v10, %v949_v11  ;;  %v1364_v53 = vrot.slane %v9047_v6, 1  ;;  %v1365_v35 = vrot.slane %v9049_v29, 1 }
 0x118   : > { %v1509_v24 = vrot.slane %v6318_v36, 2  ;;  %v2588_v44 = vmax.f32 %v2471_v51, %v6390_v21  ;;  %v1510_v37 = vrot.slane %v6393_v7, 2  ;;  %v2121_v2 = vmax.f32 %v6278_v17, %v6334_v45 }
 0x119   : > { %v2813_v41 = vadd.f32 %v2781_v18, %v2748_v49  ;;  %v2510_v39 = vadd.f32 %v2385_v22, %v1508_v5  ;;  %v1174_v0 = vsel %vm917_vm9, %v1172_v27, %v1173_v30  ;;  %v1653_v56 = vrot.slane %v6326_v46, 2 }
 0x11a   : > { %v1654_v58 = vrot.slane %v6405_v31, 2  ;;  %v6446_v9 = vsel %vm627_vm12, %v9050_v38, 0.0  ;;  %v1042_v15 = vadd.f32 %v950_v23, %v6318_v36  ;;  %v2238_v19 = vmax.f32 %v2121_v2, %v6353_v25 }
 0x11b   : > { %2846 = vst.msk [vmem:[#allocation2 + $0x30] sm:$0xff] %vm2839_vm15, %v2813_v41  ;;  %v2310_v17 = vadd.f32 %v6326_v46, %v2199_v62  ;;  %v6452_v45 = vsel %vm917_vm9, %v1364_v53, %v1365_v35  ;;  %v1797_v5 = vrot.slane %v9047_v6, 2  ;;  %v1798_v57 = vrot.slane %v9049_v29, 2 }
 0x11c   : > { %vm843_vm13 = vcmp.gt.f32.partialorder %v9051_v48, -1e+29  ;;  %v2782_v42 = vmul.f32 %v9040_v59, %v2588_v44  ;;  %v1266_v54 = vadd.f32 %v6326_v46, %v1174_v0  ;;  %v1511_v52 = vsel %vm1478_vm10, %v1509_v24, %v1510_v37  ;;  %v2620_v46 = vld [vmem:[#allocation2 + $0x38] sm:$0xff] }
 0x11d   : > { %v2430_v28 = vadd.f32 %v2310_v17, %v1174_v0  ;;  %v1655_v25 = vsel %vm1478_vm10, %v1653_v56, %v1654_v58  ;;  %v2274_v62 = vadd.f32 %v6358_v14, %v6318_v36  ;;  %v859_v55 = vsel %vm843_vm13, %v9051_v48, 0.0 }
 0x11e   : > { %v4993_v47 = vpop.eup %4992  ;;  %v4657_v18 = vsel %vm843_vm13, 1.0, %v9013_v1  ;;  %v1458_v26 = vmax.f32 %v817_v33, %v6452_v45  ;;  %v2342_v10 = vmax.f32 %v2238_v19, %v9047_v6  ;;  %v1603_v51 = vadd.f32 %v1511_v52, %v1042_v15 }
 0x11f   : > { %v2660_v61 = vmul.f32 %v4993_v47, %v2510_v39  ;;  %v2550_v32 = vadd.f32 %v2430_v28, %v1655_v25  ;;  %v6470_v22 = vsel %vm1478_vm10, %v1797_v5, %v1798_v57  ;;  %v951_v27 = vrot.slane %v859_v55, 1  ;;  %v9052_v28 = vld [vmem:[#allocation31_spill] sm:$0xff] }
 0x120   : > { %v1175_v49 = vrot.slane %v4657_v18, 1  ;;  %v2037_v14 = vadd.f32 %v6374_v8, %v950_v23  ;;  %v2081_v53 = vadd.f32 %v6379_v4, %v1174_v0  ;;  %v6478_v6 = vsel %vm627_vm12, 1.0, %v9013_v1 }
 0x121   : > { %v2717_v36 = vmul.f32 %v5707_v63, %v2660_v61  ;;  %4994 = vrcp.f32 %v2550_v32  ;;  %v1747_v33 = vadd.f32 %v1655_v25, %v1266_v54  ;;  %v2386_v24 = vadd.f32 %v2274_v62, %v950_v23 }
 0x122   : > { %v1367_v41 = vrot.slane %v9051_v48, 1  ;;  %v1891_v2 = vmax.f32 %v1458_v26, %v6470_v22  ;;  %v2472_v39 = vmax.f32 %v2342_v10, %v6452_v45  ;;  %v1512_v56 = vrot.slane %v859_v55, 2 }
 0x123   : > { %v2749_v44 = vadd.f32 %v2717_v36, %v2620_v46  ;;  %v6484_v8 = vadd.f32 %v1603_v51, %v6446_v9  ;;  %v952_v4 = vsel %vm917_vm9, %v949_v11, %v951_v27  ;;  %v1176_v0 = vsel %vm917_vm9, %v1173_v30, %v1175_v49  ;;  %v2621_v49 = vld [vmem:[#allocation2 + $0x40] sm:$0xff] }
 0x124   : > { %v1656_v15 = vrot.slane %v4657_v18, 2  ;;  %v6490_v23 = vadd.f32 %v2037_v14, %v1511_v52  ;;  %v6492_v17 = vadd.f32 %v2081_v53, %v1655_v25  ;;  %v2122_v5 = vmax.f32 %v6294_v60, %v6369_v40 }
 0x125   : > { %v2814_v19 = vadd.f32 %v2782_v42, %v2749_v44  ;;  %v2511_v54 = vadd.f32 %v2386_v24, %v1511_v52  ;;  %vm628_vm14 = vcmp.gt.f32.partialorder %v9052_v28, -1e+29  ;;  %v818_v47 = vmax.f32 %v9049_v29, -1e+30 }
 0x126   : > { %v6499_v62 = vsel %vm917_vm9, %v1365_v35, %v1367_v41  ;;  %v2589_v11 = vmax.f32 %v2472_v39, %v6470_v22  ;;  %v1043_v30 = vadd.f32 %v952_v4, %v6393_v7  ;;  %v1267_v42 = vadd.f32 %v6405_v31, %v1176_v0 }
 0x127   : > { %2847 = vst.msk [vmem:[#allocation2 + $0x38] sm:$0xff] %vm2839_vm15, %v2814_v19  ;;  %v1513_v25 = vsel %vm1478_vm10, %v1510_v37, %v1512_v56  ;;  %v1657_v60 = vsel %vm1478_vm10, %v1654_v58, %v1656_v15  ;;  %v1800_v40 = vrot.slane %v9051_v48, 2  ;;  %v2239_v52 = vmax.f32 %v2122_v5, %v6390_v21  ;;  %v9053_v56 = vld [vmem:[#allocation33_spill] sm:$0xff] }
 0x128   : > { %v2311_v35 = vadd.f32 %v6405_v31, %v6416_v43  ;;  %v6512_v55 = vadd.f32 %v6478_v6, %v1747_v33  ;;  %v6515_v18 = vmax.f32 %v1891_v2, %v9050_v38  ;;  %v2038_v61 = vadd.f32 %v6409_v50, %v952_v4 }
 0x129   : > { %v2082_v26 = vadd.f32 %v6420_v3, %v1176_v0  ;;  %v6522_v37 = vsel %vm628_vm14, %v9052_v28, 0.0  ;;  %v6527_v21 = vsel %vm628_vm14, 1.0, %v9013_v1  ;;  %v1459_v31 = vmax.f32 %v818_v47, %v6499_v62 }
 0x12a   : > { %v2431_v43 = vadd.f32 %v2311_v35, %v1176_v0  ;;  %v2783_v48 = vmul.f32 %v9040_v59, %v2589_v11  ;;  %v1604_v10 = vadd.f32 %v1513_v25, %v1043_v30  ;;  %v1748_v50 = vadd.f32 %v1657_v60, %v1267_v42 }
 0x12b   : > { %v4995_v58 = vpop.eup %4994  ;;  %v2275_v3 = vadd.f32 %v6414_v34, %v6393_v7  ;;  %v6536_v46 = vsel %vm1478_vm10, %v1798_v57, %v1800_v40  ;;  %v2343_v51 = vmax.f32 %v2239_v52, %v9049_v29  ;;  %v6539_v36 = vadd.f32 %v2038_v61, %v1513_v25 }
 0x12c   : > { %v2662_v32 = vmul.f32 %v4995_v58, %v2511_v54  ;;  %v2551_v27 = vadd.f32 %v2431_v43, %v1657_v60  ;;  %v6541_v14 = vadd.f32 %v2082_v26, %v1657_v60  ;;  %v953_v53 = vrot.slane %v6446_v9, 1 }
 0x12d   : > { %v954_v33 = vrot.slane %v6522_v37, 1  ;;  %v1177_v34 = vrot.slane %v6478_v6, 1  ;;  %v1178_v57 = vrot.slane %v6527_v21, 1  ;;  %v1892_v24 = vmax.f32 %v1459_v31, %v6536_v46 }
 0x12e   : > { %v2718_v7 = vmul.f32 %v5707_v63, %v2662_v32  ;;  %4996 = vrcp.f32 %v2551_v27  ;;  %v6550_v29 = vadd.f32 %v1604_v10, %v6522_v37  ;;  %v6553_v41 = vadd.f32 %v6527_v21, %v1748_v50 }
 0x12f   : > { %v2387_v44 = vadd.f32 %v2275_v3, %v952_v4  ;;  %v2473_v39 = vmax.f32 %v2343_v51, %v6499_v62  ;;  %vm629_vm0 = vcmp.gt.f32.partialorder %v9053_v56, -1e+29  ;;  %v819_v0 = vmax.f32 %v9050_v38, -1e+30 }
 0x130   : > { %v2750_v2 = vadd.f32 %v2718_v7, %v2621_v49  ;;  %v955_v15 = vsel %vm917_vm9, %v953_v53, %v954_v33  ;;  %v1369_v19 = vrot.slane %v9050_v38, 1  ;;  %v1370_v5 = vrot.slane %v9052_v28, 1 }
 0x131   : > { %v2123_v54 = vmax.f32 %v6399_v20, %v6452_v45  ;;  %v1179_v4 = vsel %vm917_vm9, %v1177_v34, %v1178_v57  ;;  %v1514_v11 = vrot.slane %v6446_v9, 2  ;;  %v1515_v30 = vrot.slane %v6522_v37, 2 }
 0x132   : > { %v2815_v47 = vadd.f32 %v2783_v48, %v2750_v2  ;;  %v6571_v42 = vmax.f32 %v1892_v24, %v9052_v28  ;;  %v6576_v60 = vsel %vm629_vm0, %v9053_v56, 0.0  ;;  %v1658_v40 = vrot.slane %v6478_v6, 2 }
 0x133   : > { %v1659_v20 = vrot.slane %v6527_v21, 2  ;;  %v2590_v45 = vmax.f32 %v2473_v39, %v6536_v46  ;;  %v6585_v52 = vsel %vm629_vm0, 1.0, %v9013_v1  ;;  %v2240_v35 = vmax.f32 %v2123_v54, %v6470_v22 }
 0x134   : > { %2848 = vst.msk [vmem:[#allocation2 + $0x40] sm:$0xff] %vm2839_vm15, %v2815_v47  ;;  %v2312_v61 = vadd.f32 %v6478_v6, %v6492_v17  ;;  %v2512_v26 = vadd.f32 %v2387_v44, %v1513_v25  ;;  %v1044_v31 = vadd.f32 %v955_v15, %v6446_v9  ;;  %v1268_v43 = vadd.f32 %v6478_v6, %v1179_v4  ;;  %v9054_v6 = vld [vmem:[#allocation32_spill] sm:$0xff] }
 0x135   : > { %v6593_v58 = vsel %vm917_vm9, %v1369_v19, %v1370_v5  ;;  %v1516_v48 = vsel %vm1478_vm10, %v1514_v11, %v1515_v30  ;;  %v1802_v10 = vrot.slane %v9050_v38, 2  ;;  %v1803_v50 = vrot.slane %v9052_v28, 2 }
 0x136   : > { %v2432_v3 = vadd.f32 %v2312_v61, %v1179_v4  ;;  %v1660_v22 = vsel %vm1478_vm10, %v1658_v40, %v1659_v20  ;;  %v2276_v17 = vadd.f32 %v6490_v23, %v6446_v9  ;;  %v2344_v25 = vmax.f32 %v2240_v35, %v9050_v38  ;;  %v2622_v9 = vld [vmem:[#allocation2 + $0x48] sm:$0xff] }
 0x137   : > { %vm844_vm1 = vcmp.gt.f32.partialorder %v9054_v6, -1e+29  ;;  %v2784_v51 = vmul.f32 %v9040_v59, %v2590_v45  ;;  %v6607_v27 = vmax.f32 %v819_v0, %v6593_v58  ;;  %v1372_v44 = vrot.slane %v9054_v6, 1 }
 0x138   : > { %v4997_v32 = vpop.eup %4996  ;;  %v2552_v49 = vadd.f32 %v2432_v3, %v1660_v22  ;;  %v860_v53 = vsel %vm844_vm1, %v9054_v6, 0.0  ;;  %v4658_v24 = vsel %vm844_vm1, 1.0, %v9013_v1  ;;  %v1605_v23 = vadd.f32 %v1516_v48, %v1044_v31  ;;  %v9055_v31 = vld [vmem:[#allocation34_spill] sm:$0xff] }
 0x139   : > { %v2664_v7 = vmul.f32 %v4997_v32, %v2512_v26  ;;  %v956_v34 = vrot.slane %v860_v53, 1  ;;  %v2039_v38 = vadd.f32 %v6484_v8, %v955_v15  ;;  %v2083_v2 = vadd.f32 %v6512_v55, %v1179_v4 }
 0x13a   : > { %4998 = vrcp.f32 %v2552_v49  ;;  %v6616_v0 = vsel %vm1478_vm10, %v1802_v10, %v1803_v50  ;;  %v2388_v19 = vadd.f32 %v2276_v17, %v955_v15  ;;  %v2474_v54 = vmax.f32 %v2344_v25, %v6593_v58 }
 0x13b   : > { %v2719_v39 = vmul.f32 %v5707_v63, %v2664_v7  ;;  %v1749_v47 = vadd.f32 %v1660_v22, %v1268_v43  ;;  %v820_v11 = vmax.f32 %v9052_v28, -1e+30  ;;  %v1180_v40 = vrot.slane %v4658_v24, 1 }
 0x13c   : > { %v1805_v45 = vrot.slane %v9054_v6, 2  ;;  %v957_v8 = vsel %vm917_vm9, %v954_v33, %v956_v34  ;;  %v6625_v55 = vsel %vm917_vm9, %v1370_v5, %v1372_v44  ;;  %v1517_v4 = vrot.slane %v860_v53, 2 }
 0x13d   : > { %v2751_v35 = vadd.f32 %v2719_v39, %v2622_v9  ;;  %v1893_v15 = vmax.f32 %v6607_v27, %v6616_v0  ;;  %v6629_v61 = vadd.f32 %v2039_v38, %v1516_v48  ;;  %v6631_v26 = vadd.f32 %v2083_v2, %v1660_v22  ;;  %v2623_v2 = vld [vmem:[#allocation2 + $0x50] sm:$0xff] }
 0x13e   : > { %vm630_vm2 = vcmp.gt.f32.partialorder %v9055_v31, -1e+29  ;;  %v2513_v10 = vadd.f32 %v2388_v19, %v1516_v48  ;;  %v2591_v3 = vmax.f32 %v2474_v54, %v6616_v0  ;;  %v2124_v33 = vmax.f32 %v6425_v16, %v6499_v62 }
 0x13f   : > { %v2816_v43 = vadd.f32 %v2784_v51, %v2751_v35  ;;  %v1045_v5 = vadd.f32 %v957_v8, %v6522_v37  ;;  %v1181_v17 = vsel %vm917_vm9, %v1178_v57, %v1180_v40  ;;  %v1461_v25 = vmax.f32 %v820_v11, %v6625_v55 }
 0x140   : > { %v1661_v6 = vrot.slane %v4658_v24, 2  ;;  %v1518_v22 = vsel %vm1478_vm10, %v1515_v30, %v1517_v4  ;;  %v6645_v48 = vsel %vm1478_vm10, %v1803_v50, %v1805_v45  ;;  %v2241_v32 = vmax.f32 %v2124_v33, %v6536_v46 }
 0x141   : > { %2849 = vst.msk [vmem:[#allocation2 + $0x48] sm:$0xff] %vm2839_vm15, %v2816_v43  ;;  %v2313_v16 = vadd.f32 %v6527_v21, %v6541_v14  ;;  %v6651_v62 = vadd.f32 %v1605_v23, %v6576_v60  ;;  %v6654_v57 = vadd.f32 %v6585_v52, %v1749_v47  ;;  %v6659_v51 = vsel %vm630_vm2, %v9055_v31, 0.0  ;;  %v9056_v43 = vld [vmem:[#allocation36_spill] sm:$0xff] }
 0x142   : > { %v6664_v30 = vsel %vm630_vm2, 1.0, %v9013_v1  ;;  %v2785_v46 = vmul.f32 %v9040_v59, %v2591_v3  ;;  %v1269_v14 = vadd.f32 %v6527_v21, %v1181_v17  ;;  %v2345_v50 = vmax.f32 %v2241_v32, %v9052_v28 }
 0x143   : > { %v2433_v27 = vadd.f32 %v2313_v16, %v1181_v17  ;;  %v1606_v53 = vadd.f32 %v1518_v22, %v1045_v5  ;;  %v1662_v7 = vsel %vm1478_vm10, %v1659_v20, %v1661_v6  ;;  %v1894_v34 = vmax.f32 %v1461_v25, %v6645_v48 }
 0x144   : > { %v4999_v49 = vpop.eup %4998  ;;  %v2040_v24 = vadd.f32 %v6550_v29, %v957_v8  ;;  %v2277_v9 = vadd.f32 %v6539_v36, %v6522_v37  ;;  %v958_v38 = vrot.slane %v6576_v60, 1  ;;  %v2475_v28 = vmax.f32 %v2345_v50, %v6625_v55 }
 0x145   : > { %v2666_v44 = vmul.f32 %v4999_v49, %v2513_v10  ;;  %v2553_v23 = vadd.f32 %v2433_v27, %v1662_v7  ;;  %v959_v39 = vrot.slane %v6659_v51, 1  ;;  %v1182_v21 = vrot.slane %v6585_v52, 1 }
 0x146   : > { %v1183_v20 = vrot.slane %v6664_v30, 1  ;;  %v1374_v29 = vrot.slane %v9053_v56, 1  ;;  %v1375_v54 = vrot.slane %v9055_v31, 1  ;;  %v6685_v37 = vmax.f32 %v1893_v15, %v9053_v56 }
 0x147   : > { %v2720_v19 = vmul.f32 %v5707_v63, %v2666_v44  ;;  %5000 = vrcp.f32 %v2553_v23  ;;  %v1750_v36 = vadd.f32 %v1662_v7, %v1269_v14  ;;  %v6688_v47 = vadd.f32 %v1606_v53, %v6659_v51  ;;  %v9057_v23 = vld [vmem:[#allocation35_spill] sm:$0xff] }
 0x148   : > { %v2084_v11 = vadd.f32 %v6553_v41, %v1181_v17  ;;  %v6692_v45 = vmax.f32 %v1894_v34, %v9055_v31  ;;  %v6694_v35 = vadd.f32 %v2040_v24, %v1518_v22  ;;  %v2389_v4 = vadd.f32 %v2277_v9, %v957_v8 }
 0x149   : > { %v2752_v40 = vadd.f32 %v2720_v19, %v2623_v2  ;;  %vm631_vm3 = vcmp.gt.f32.partialorder %v9056_v43, -1e+29  ;;  %v821_v10 = vmax.f32 %v9053_v56, -1e+30  ;;  %v960_v15 = vsel %vm917_vm9, %v958_v38, %v959_v39 }
 0x14a   : > { %v1184_v3 = vsel %vm917_vm9, %v1182_v21, %v1183_v20  ;;  %v2592_v41 = vmax.f32 %v2475_v28, %v6645_v48  ;;  %v6706_v5 = vsel %vm917_vm9, %v1374_v29, %v1375_v54  ;;  %v1519_v8 = vrot.slane %v6576_v60, 2 }
 0x14b   : > { %v2817_v33 = vadd.f32 %v2785_v46, %v2752_v40  ;;  %v1520_v17 = vrot.slane %v6659_v51, 2  ;;  %v1663_v25 = vrot.slane %v6585_v52, 2  ;;  %v1664_v6 = vrot.slane %v6664_v30, 2 }
 0x14c   : > { %v2125_v32 = vmax.f32 %v6515_v18, %v6593_v58  ;;  %v6716_v16 = vadd.f32 %v6664_v30, %v1750_v36  ;;  %v2204_v46 = vadd.f32 %v2084_v11, %v1662_v7  ;;  %v2514_v14 = vadd.f32 %v2389_v4, %v1518_v22  ;;  %v2624_v36 = vld [vmem:[#allocation2 + $0x58] sm:$0xff] }
 0x14d   : > { %2850 = vst.msk [vmem:[#allocation2 + $0x50] sm:$0xff] %vm2839_vm15, %v2817_v33  ;;  %v6721_v50 = vsel %vm631_vm3, %v9056_v43, 0.0  ;;  %v6726_v27 = vsel %vm631_vm3, 1.0, %v9013_v1  ;;  %v1046_v49 = vadd.f32 %v960_v15, %v6576_v60  ;;  %v2314_v58 = vadd.f32 %v6585_v52, %v6631_v26 }
 0x14e   : > { %v2242_v18 = vmax.f32 %v2125_v32, %v6616_v0  ;;  %v2786_v53 = vmul.f32 %v9040_v59, %v2592_v41  ;;  %v1270_v22 = vadd.f32 %v6585_v52, %v1184_v3  ;;  %v1462_v7 = vmax.f32 %v821_v10, %v6706_v5 }
 0x14f   : > { %v1807_v34 = vrot.slane %v9053_v56, 2  ;;  %v1521_v24 = vsel %vm1478_vm10, %v1519_v8, %v1520_v17  ;;  %v1665_v44 = vsel %vm1478_vm10, %v1663_v25, %v1664_v6  ;;  %v2434_v9 = vadd.f32 %v2314_v58, %v1184_v3 }
 0x150   : > { %vm845_vm4 = vcmp.gt.f32.partialorder %v9057_v23, -1e+29  ;;  %v1808_v26 = vrot.slane %v9055_v31, 2  ;;  %v2278_v38 = vadd.f32 %v6629_v61, %v6576_v60  ;;  %v2346_v21 = vmax.f32 %v2242_v18, %v9053_v56 }
 0x151   : > { %v5001_v0 = vpop.eup %5000  ;;  %v861_v52 = vsel %vm845_vm4, %v9057_v23, 0.0  ;;  %v4659_v2 = vsel %vm845_vm4, 1.0, %v9013_v1  ;;  %v2554_v19 = vadd.f32 %v2434_v9, %v1665_v44  ;;  %v1607_v11 = vadd.f32 %v1521_v24, %v1046_v49 }
 0x152   : > { %v2668_v28 = vmul.f32 %v5001_v0, %v2514_v14  ;;  %v961_v29 = vrot.slane %v861_v52, 1  ;;  %v2041_v40 = vadd.f32 %v6651_v62, %v960_v15  ;;  %v1185_v4 = vrot.slane %v4659_v2, 1  ;;  %v9058_v0 = vld [vmem:[#allocation37_spill] sm:$0xff] }
 0x153   : > { %v1377_v10 = vrot.slane %v9057_v23, 1  ;;  %5002 = vrcp.f32 %v2554_v19  ;;  %v1522_v61 = vrot.slane %v861_v52, 2  ;;  %v1751_v41 = vadd.f32 %v1665_v44, %v1270_v22 }
 0x154   : > { %v2721_v33 = vmul.f32 %v5707_v63, %v2668_v28  ;;  %v962_v60 = vsel %vm917_vm9, %v959_v39, %v961_v29  ;;  %v6752_v8 = vsel %vm1478_vm10, %v1807_v34, %v1808_v26  ;;  %v2085_v56 = vadd.f32 %v6654_v57, %v1184_v3 }
 0x155   : > { %v2390_v25 = vadd.f32 %v2278_v38, %v960_v15  ;;  %v2476_v14 = vmax.f32 %v2346_v21, %v6706_v5  ;;  %v822_v62 = vmax.f32 %v9055_v31, -1e+30  ;;  %v1810_v49 = vrot.slane %v9057_v23, 2 }
 0x156   : > { %v2753_v32 = vadd.f32 %v2721_v33, %v2624_v36  ;;  %v1047_v18 = vadd.f32 %v962_v60, %v6659_v51  ;;  %v1186_v39 = vsel %vm917_vm9, %v1183_v20, %v1185_v4  ;;  %v6765_v58 = vsel %vm917_vm9, %v1375_v54, %v1377_v10  ;;  %v2625_v10 = vld [vmem:[#allocation2 + $0x60] sm:$0xff] }
 0x157   : > { %v1666_v57 = vrot.slane %v4659_v2, 2  ;;  %v6767_v3 = vadd.f32 %v2041_v40, %v1521_v24  ;;  %v1523_v22 = vsel %vm1478_vm10, %v1520_v17, %v1522_v61  ;;  %v2126_v34 = vmax.f32 %v6571_v42, %v6625_v55 }
 0x158   : > { %v2818_v15 = vadd.f32 %v2786_v53, %v2753_v32  ;;  %v1895_v9 = vmax.f32 %v1462_v7, %v6752_v8  ;;  %v6774_v23 = vadd.f32 %v1607_v11, %v6721_v50  ;;  %v2515_v20 = vadd.f32 %v2390_v25, %v1521_v24 }
 0x159   : > { %vm632_vm5 = vcmp.gt.f32.partialorder %v9058_v0, -1e+29  ;;  %v2593_v54 = vmax.f32 %v2476_v14, %v6752_v8  ;;  %v1271_v53 = vadd.f32 %v6664_v30, %v1186_v39  ;;  %v1463_v38 = vmax.f32 %v822_v62, %v6765_v58  ;;  %v9059_v14 = vld [vmem:[#allocation39_spill] sm:$0xff] }
 0x15a   : > { %2851 = vst.msk [vmem:[#allocation2 + $0x58] sm:$0xff] %vm2839_vm15, %v2818_v15  ;;  %v2315_v17 = vadd.f32 %v6664_v30, %v2204_v46  ;;  %v1608_v52 = vadd.f32 %v1523_v22, %v1047_v18  ;;  %v1667_v42 = vsel %vm1478_vm10, %v1664_v6, %v1666_v57  ;;  %v6786_v55 = vsel %vm1478_vm10, %v1808_v26, %v1810_v49 }
 0x15b   : > { %v2243_v7 = vmax.f32 %v2126_v34, %v6645_v48  ;;  %v6790_v24 = vadd.f32 %v6726_v27, %v1751_v41  ;;  %v2205_v2 = vadd.f32 %v2085_v56, %v1665_v44  ;;  %v2042_v28 = vadd.f32 %v6688_v47, %v962_v60 }
 0x15c   : > { %v2435_v21 = vadd.f32 %v2315_v17, %v1186_v39  ;;  %v6794_v19 = vmax.f32 %v1895_v9, %v9056_v43  ;;  %v6799_v30 = vsel %vm632_vm5, %v9058_v0, 0.0  ;;  %v6804_v6 = vsel %vm632_vm5, 1.0, %v9013_v1 }
 0x15d   : > { %v2086_v48 = vadd.f32 %v6716_v16, %v1186_v39  ;;  %v5003_v46 = vpop.eup %5002  ;;  %v1752_v44 = vadd.f32 %v1667_v42, %v1271_v53  ;;  %v1896_v47 = vmax.f32 %v1463_v38, %v6786_v55  ;;  %v2279_v26 = vadd.f32 %v6694_v35, %v6659_v51 }
 0x15e   : > { %v2555_v29 = vadd.f32 %v2435_v21, %v1667_v42  ;;  %v2670_v36 = vmul.f32 %v5003_v46, %v2515_v20  ;;  %v2787_v11 = vmul.f32 %v9040_v59, %v2593_v54  ;;  %v6812_v40 = vadd.f32 %v1608_v52, %v6799_v30 }
 0x15f   : > { %v2347_v4 = vmax.f32 %v2243_v7, %v9055_v31  ;;  %v6815_v33 = vadd.f32 %v2042_v28, %v1523_v22  ;;  %v963_v16 = vrot.slane %v6721_v50, 1  ;;  %v964_v61 = vrot.slane %v6799_v30, 1 }
 0x160   : > { %5004 = vrcp.f32 %v2555_v29  ;;  %v2722_v41 = vmul.f32 %v5707_v63, %v2670_v36  ;;  %v6820_v51 = vadd.f32 %v2086_v48, %v1667_v42  ;;  %v1187_v35 = vrot.slane %v6726_v27, 1  ;;  %v9060_v29 = vld [vmem:[#allocation38_spill] sm:$0xff] }
 0x161   : > { %v1188_v56 = vrot.slane %v6804_v6, 1  ;;  %v6825_v25 = vadd.f32 %v6804_v6, %v1752_v44  ;;  %v6828_v31 = vmax.f32 %v1896_v47, %v9058_v0  ;;  %v2391_v32 = vadd.f32 %v2279_v26, %v962_v60 }
 0x162   : > { %vm633_vm6 = vcmp.gt.f32.partialorder %v9059_v14, -1e+29  ;;  %v2754_v62 = vadd.f32 %v2722_v41, %v2625_v10  ;;  %v2477_v49 = vmax.f32 %v2347_v4, %v6765_v58  ;;  %v1379_v18 = vrot.slane %v9056_v43, 1  ;;  %v2626_v41 = vld [vmem:[#allocation2 + $0x68] sm:$0xff] }
 0x163   : > { %v1380_v39 = vrot.slane %v9058_v0, 1  ;;  %v965_v57 = vsel %vm917_vm9, %v963_v16, %v964_v61  ;;  %v1524_v15 = vrot.slane %v6721_v50, 2  ;;  %v1525_v34 = vrot.slane %v6799_v30, 2 }
 0x164   : > { %v2127_v9 = vmax.f32 %v6685_v37, %v6706_v5  ;;  %v2819_v20 = vadd.f32 %v2787_v11, %v2754_v62  ;;  %v6840_v60 = vsel %vm633_vm6, %v9059_v14, 0.0  ;;  %v823_v54 = vmax.f32 %v9056_v43, -1e+30 }
 0x165   : > { %v1189_v53 = vsel %vm917_vm9, %v1187_v35, %v1188_v56  ;;  %v2516_v38 = vadd.f32 %v2391_v32, %v1523_v22  ;;  %v6847_v17 = vsel %vm633_vm6, 1.0, %v9013_v1  ;;  %v1668_v52 = vrot.slane %v6726_v27, 2 }
 0x166   : > { %v1669_v42 = vrot.slane %v6804_v6, 2  ;;  %2852 = vst.msk [vmem:[#allocation2 + $0x60] sm:$0xff] %vm2839_vm15, %v2819_v20  ;;  %v2594_v37 = vmax.f32 %v2477_v49, %v6786_v55  ;;  %v1048_v5 = vadd.f32 %v965_v57, %v6721_v50  ;;  %v2244_v7 = vmax.f32 %v2127_v9, %v6752_v8 }
 0x167   : > { %v2316_v28 = vadd.f32 %v6726_v27, %v2205_v2  ;;  %v1272_v21 = vadd.f32 %v6726_v27, %v1189_v53  ;;  %v6858_v22 = vsel %vm917_vm9, %v1379_v18, %v1380_v39  ;;  %v1526_v48 = vsel %vm1478_vm10, %v1524_v15, %v1525_v34 }
 0x168   : > { %v1812_v46 = vrot.slane %v9056_v43, 2  ;;  %v1813_v44 = vrot.slane %v9058_v0, 2  ;;  %v2043_v47 = vadd.f32 %v6774_v23, %v965_v57  ;;  %vm846_vm7 = vcmp.gt.f32.partialorder %v9060_v29, -1e+29 }
 0x169   : > { %v2436_v26 = vadd.f32 %v2316_v28, %v1189_v53  ;;  %v1670_v8 = vsel %vm1478_vm10, %v1668_v52, %v1669_v42  ;;  %v2280_v27 = vadd.f32 %v6767_v3, %v6721_v50  ;;  %v862_v2 = vsel %vm846_vm7, %v9060_v29, 0.0 }
 0x16a   : > { %v5005_v36 = vpop.eup %5004  ;;  %v4660_v11 = vsel %vm846_vm7, 1.0, %v9013_v1  ;;  %v2348_v10 = vmax.f32 %v2244_v7, %v9056_v43  ;;  %v966_v23 = vrot.slane %v862_v2, 1  ;;  %v2788_v35 = vmul.f32 %v9040_v59, %v2594_v37 }
 0x16b   : > { %v2672_v4 = vmul.f32 %v5005_v36, %v2516_v38  ;;  %v2556_v16 = vadd.f32 %v2436_v26, %v1670_v8  ;;  %v1464_v32 = vmax.f32 %v823_v54, %v6858_v22  ;;  %v1609_v62 = vadd.f32 %v1526_v48, %v1048_v5  ;;  %v9061_v36 = vld [vmem:[#allocation40_spill] sm:$0xff] }
 0x16c   : > { %v1382_v49 = vrot.slane %v9060_v29, 1  ;;  %v967_v50 = vsel %vm917_vm9, %v964_v61, %v966_v23  ;;  %v1190_v3 = vrot.slane %v4660_v11, 1  ;;  %v1753_v15 = vadd.f32 %v1670_v8, %v1272_v21 }
 0x16d   : > { %v2723_v18 = vmul.f32 %v5707_v63, %v2672_v4  ;;  %5006 = vrcp.f32 %v2556_v16  ;;  %v6879_v9 = vsel %vm1478_vm10, %v1812_v46, %v1813_v44  ;;  %v2087_v43 = vadd.f32 %v6790_v24, %v1189_v53 }
 0x16e   : > { %v1527_v20 = vrot.slane %v862_v2, 2  ;;  %v6882_v52 = vadd.f32 %v2043_v47, %v1526_v48  ;;  %v2392_v54 = vadd.f32 %v2280_v27, %v965_v57  ;;  %v2478_v37 = vmax.f32 %v2348_v10, %v6858_v22 }
 0x16f   : > { %v2755_v38 = vadd.f32 %v2723_v18, %v2626_v41  ;;  %v824_v5 = vmax.f32 %v9058_v0, -1e+30  ;;  %v1049_v7 = vadd.f32 %v967_v50, %v6799_v30  ;;  %v6888_v61 = vsel %vm917_vm9, %v1380_v39, %v1382_v49 }
 0x170   : > { %v2128_v28 = vmax.f32 %v6692_v45, %v6765_v58  ;;  %v1191_v24 = vsel %vm917_vm9, %v1188_v56, %v1190_v3  ;;  %v1671_v53 = vrot.slane %v4660_v11, 2  ;;  %v1815_v57 = vrot.slane %v9060_v29, 2 }
 0x171   : > { %v2820_v21 = vadd.f32 %v2788_v35, %v2755_v38  ;;  %v1897_v46 = vmax.f32 %v1464_v32, %v6879_v9  ;;  %v6898_v47 = vadd.f32 %v1609_v62, %v6840_v60  ;;  %v2207_v26 = vadd.f32 %v2087_v43, %v1670_v8  ;;  %v2627_v62 = vld [vmem:[#allocation2 + $0x70] sm:$0xff] }
 0x172   : > { %v1528_v39 = vsel %vm1478_vm10, %v1525_v34, %v1527_v20  ;;  %v6903_v45 = vadd.f32 %v6847_v17, %v1753_v15  ;;  %v2595_v58 = vmax.f32 %v2478_v37, %v6879_v9  ;;  %vm634_vm8 = vcmp.gt.f32.partialorder %v9061_v36, -1e+29 }
 0x173   : > { %2853 = vst.msk [vmem:[#allocation2 + $0x68] sm:$0xff] %vm2839_vm15, %v2820_v21  ;;  %v2317_v56 = vadd.f32 %v6804_v6, %v6820_v51  ;;  %v2517_v29 = vadd.f32 %v2392_v54, %v1526_v48  ;;  %v1273_v27 = vadd.f32 %v6804_v6, %v1191_v24  ;;  %v1465_v2 = vmax.f32 %v824_v5, %v6888_v61  ;;  %v9062_v21 = vld [vmem:[#allocation42_spill] sm:$0xff] }
 0x174   : > { %v2245_v8 = vmax.f32 %v2128_v28, %v6786_v55  ;;  %v1610_v34 = vadd.f32 %v1528_v39, %v1049_v7  ;;  %v1672_v11 = vsel %vm1478_vm10, %v1669_v42, %v1671_v53  ;;  %v6916_v4 = vsel %vm1478_vm10, %v1813_v44, %v1815_v57 }
 0x175   : > { %v2437_v10 = vadd.f32 %v2317_v56, %v1191_v24  ;;  %v6921_v51 = vsel %vm634_vm8, %v9061_v36, 0.0  ;;  %v2044_v48 = vadd.f32 %v6812_v40, %v967_v50  ;;  %v2088_v16 = vadd.f32 %v6825_v25, %v1191_v24 }
 0x176   : > { %v2281_v55 = vadd.f32 %v6815_v33, %v6799_v30  ;;  %v6928_v6 = vmax.f32 %v1897_v46, %v9059_v14  ;;  %v2789_v42 = vmul.f32 %v9040_v59, %v2595_v58  ;;  %v6934_v44 = vsel %vm634_vm8, 1.0, %v9013_v1 }
 0x177   : > { %v5007_v23 = vpop.eup %5006  ;;  %v2557_v41 = vadd.f32 %v2437_v10, %v1672_v11  ;;  %v1754_v32 = vadd.f32 %v1672_v11, %v1273_v27  ;;  %v1898_v40 = vmax.f32 %v1465_v2, %v6916_v4  ;;  %v2349_v25 = vmax.f32 %v2245_v8, %v9058_v0 }
 0x178   : > { %v2674_v35 = vmul.f32 %v5007_v23, %v2517_v29  ;;  %v6939_v30 = vadd.f32 %v1610_v34, %v6921_v51  ;;  %v968_v33 = vrot.slane %v6840_v60, 1  ;;  %v969_v49 = vrot.slane %v6921_v51, 1 }
 0x179   : > { %5008 = vrcp.f32 %v2557_v41  ;;  %v6944_v3 = vadd.f32 %v2044_v48, %v1528_v39  ;;  %v6946_v15 = vadd.f32 %v2088_v16, %v1672_v11  ;;  %v2393_v43 = vadd.f32 %v2281_v55, %v967_v50  ;;  %v9063_v16 = vld [vmem:[#allocation41_spill] sm:$0xff] }
 0x17a   : > { %v2724_v18 = vmul.f32 %v5707_v63, %v2674_v35  ;;  %v1192_v20 = vrot.slane %v6847_v17, 1  ;;  %v1193_v0 = vrot.slane %v6934_v44, 1  ;;  %v1384_v38 = vrot.slane %v9059_v14, 1 }
 0x17b   : > { %v1385_v54 = vrot.slane %v9061_v36, 1  ;;  %v6953_v5 = vadd.f32 %v6934_v44, %v1754_v32  ;;  %v6956_v7 = vmax.f32 %v1898_v40, %v9061_v36  ;;  %v2479_v28 = vmax.f32 %v2349_v25, %v6888_v61 }
 0x17c   : > { %v2756_v37 = vadd.f32 %v2724_v18, %v2627_v62  ;;  %vm635_vm11 = vcmp.gt.f32.partialorder %v9062_v21, -1e+29  ;;  %v970_v50 = vsel %vm917_vm9, %v968_v33, %v969_v49  ;;  %v1529_v24 = vrot.slane %v6840_v60, 2 }
 0x17d   : > { %v1530_v53 = vrot.slane %v6921_v51, 2  ;;  %v2518_v46 = vadd.f32 %v2393_v43, %v1528_v39  ;;  %v825_v58 = vmax.f32 %v9059_v14, -1e+30  ;;  %v2129_v56 = vmax.f32 %v6794_v19, %v6858_v22  ;;  %v2628_v43 = vld [vmem:[#allocation2 + $0x78] sm:$0xff] }
 0x17e   : > { %v2821_v57 = vadd.f32 %v2789_v42, %v2756_v37  ;;  %v1194_v29 = vsel %vm917_vm9, %v1192_v20, %v1193_v0  ;;  %v6972_v27 = vsel %vm917_vm9, %v1384_v38, %v1385_v54  ;;  %v1673_v2 = vrot.slane %v6847_v17, 2 }
 0x17f   : > { %v1674_v8 = vrot.slane %v6934_v44, 2  ;;  %v2596_v39 = vmax.f32 %v2479_v28, %v6916_v4  ;;  %v1050_v34 = vadd.f32 %v970_v50, %v6840_v60  ;;  %v2246_v11 = vmax.f32 %v2129_v56, %v6879_v9 }
 0x180   : > { %2854 = vst.msk [vmem:[#allocation2 + $0x70] sm:$0xff] %vm2839_vm15, %v2821_v57  ;;  %v2318_v19 = vadd.f32 %v6847_v17, %v2207_v26  ;;  %v1531_v22 = vsel %vm1478_vm10, %v1529_v24, %v1530_v53  ;;  %v1817_v10 = vrot.slane %v9059_v14, 2  ;;  %v1818_v48 = vrot.slane %v9061_v36, 2 }
 0x181   : > { %vm847_vm12 = vcmp.gt.f32.partialorder %v9063_v16, -1e+29  ;;  %v6990_v55 = vsel %vm635_vm11, %v9062_v21, 0.0  ;;  %v1274_v23 = vadd.f32 %v6847_v17, %v1194_v29  ;;  %v1466_v9 = vmax.f32 %v825_v58, %v6972_v27 }
 0x182   : > { %v2438_v26 = vadd.f32 %v2318_v19, %v1194_v29  ;;  %v1675_v41 = vsel %vm1478_vm10, %v1673_v2, %v1674_v8  ;;  %v2282_v35 = vadd.f32 %v6882_v52, %v6840_v60  ;;  %v863_v32 = vsel %vm847_vm12, %v9063_v16, 0.0 }
 0x183   : > { %v5009_v42 = vpop.eup %5008  ;;  %v4661_v40 = vsel %vm847_vm12, 1.0, %v9013_v1  ;;  %v1611_v62 = vadd.f32 %v1531_v22, %v1050_v34  ;;  %v2350_v33 = vmax.f32 %v2246_v11, %v9059_v14  ;;  %v2790_v17 = vmul.f32 %v9040_v59, %v2596_v39 }
 0x184   : > { %v2676_v25 = vmul.f32 %v5009_v42, %v2518_v46  ;;  %v2558_v18 = vadd.f32 %v2438_v26, %v1675_v41  ;;  %v7004_v20 = vsel %vm1478_vm10, %v1817_v10, %v1818_v48  ;;  %v971_v38 = vrot.slane %v863_v32, 1 }
 0x185   : > { %v1195_v37 = vrot.slane %v4661_v40, 1  ;;  %v2045_v52 = vadd.f32 %v6898_v47, %v970_v50  ;;  %v2089_v28 = vadd.f32 %v6903_v45, %v1194_v29  ;;  %v7012_v14 = vsel %vm635_vm11, 1.0, %v9013_v1 }
 0x186   : > { %v2725_v60 = vmul.f32 %v5707_v63, %v2676_v25  ;;  %5010 = vrcp.f32 %v2558_v18  ;;  %v1755_v24 = vadd.f32 %v1675_v41, %v1274_v23  ;;  %v2394_v57 = vadd.f32 %v2282_v35, %v970_v50 }
 0x187   : > { %v1387_v46 = vrot.slane %v9063_v16, 1  ;;  %v1899_v56 = vmax.f32 %v1466_v9, %v7004_v20  ;;  %v7017_v2 = vadd.f32 %v1611_v62, %v6990_v55  ;;  %v2480_v47 = vmax.f32 %v2350_v33, %v6972_v27  ;;  %v9064_v9 = vld [vmem:[#allocation43_spill] sm:$0xff] }
 0x188   : > { %v2757_v58 = vadd.f32 %v2725_v60, %v2628_v43  ;;  %v972_v45 = vsel %vm917_vm9, %v969_v49, %v971_v38  ;;  %v1196_v29 = vsel %vm917_vm9, %v1193_v0, %v1195_v37  ;;  %v1532_v39 = vrot.slane %v863_v32, 2  ;;  %v2629_v60 = vld [vmem:[#allocation2 + $0x80] sm:$0xff] }
 0x189   : > { %v1676_v34 = vrot.slane %v4661_v40, 2  ;;  %v7024_v50 = vadd.f32 %v2045_v52, %v1531_v22  ;;  %v7026_v19 = vadd.f32 %v2089_v28, %v1675_v41  ;;  %v2130_v10 = vmax.f32 %v6828_v31, %v6888_v61 }
 0x18a   : > { %v2822_v11 = vadd.f32 %v2790_v17, %v2757_v58  ;;  %v2519_v23 = vadd.f32 %v2394_v57, %v1531_v22  ;;  %vm636_vm13 = vcmp.gt.f32.partialorder %v9064_v9, -1e+29  ;;  %v826_v26 = vmax.f32 %v9061_v36, -1e+30 }
 0x18b   : > { %v7035_v49 = vsel %vm917_vm9, %v1385_v54, %v1387_v46  ;;  %v2597_v0 = vmax.f32 %v2480_v47, %v7004_v20  ;;  %v1051_v42 = vadd.f32 %v972_v45, %v6921_v51  ;;  %v1275_v41 = vadd.f32 %v6934_v44, %v1196_v29 }
 0x18c   : > { %2855 = vst.msk [vmem:[#allocation2 + $0x78] sm:$0xff] %vm2839_vm15, %v2822_v11  ;;  %v2247_v31 = vmax.f32 %v2130_v10, %v6916_v4  ;;  %v1533_v61 = vsel %vm1478_vm10, %v1530_v53, %v1532_v39  ;;  %v1677_v22 = vsel %vm1478_vm10, %v1674_v8, %v1676_v34  ;;  %v1820_v35 = vrot.slane %v9063_v16, 2  ;;  %v9065_v34 = vld [vmem:[#allocation45_spill] sm:$0xff] }
 0x18d   : > { %v2319_v54 = vadd.f32 %v6934_v44, %v6946_v15  ;;  %v7050_v32 = vadd.f32 %v7012_v14, %v1755_v24  ;;  %v7053_v40 = vmax.f32 %v1899_v56, %v9062_v21  ;;  %v2046_v25 = vadd.f32 %v6939_v30, %v972_v45 }
 0x18e   : > { %v2351_v4 = vmax.f32 %v2247_v31, %v9061_v36  ;;  %v7060_v53 = vsel %vm636_vm13, %v9064_v9, 0.0  ;;  %v7065_v8 = vsel %vm636_vm13, 1.0, %v9013_v1  ;;  %v1467_v44 = vmax.f32 %v826_v26, %v7035_v49 }
 0x18f   : > { %v2439_v15 = vadd.f32 %v2319_v54, %v1196_v29  ;;  %v2791_v62 = vmul.f32 %v9040_v59, %v2597_v0  ;;  %v1612_v33 = vadd.f32 %v1533_v61, %v1051_v42  ;;  %v1756_v30 = vadd.f32 %v1677_v22, %v1275_v41 }
 0x190   : > { %v5011_v16 = vpop.eup %5010  ;;  %v2090_v18 = vadd.f32 %v6953_v5, %v1196_v29  ;;  %v7073_v17 = vsel %vm1478_vm10, %v1818_v48, %v1820_v35  ;;  %v2283_v38 = vadd.f32 %v6944_v3, %v6921_v51  ;;  %v7077_v52 = vadd.f32 %v2046_v25, %v1533_v61 }
 0x191   : > { %v2678_v43 = vmul.f32 %v5011_v16, %v2519_v23  ;;  %v2559_v37 = vadd.f32 %v2439_v15, %v1677_v22  ;;  %v2481_v28 = vmax.f32 %v2351_v4, %v7035_v49  ;;  %v973_v24 = vrot.slane %v6990_v55, 1 }
 0x192   : > { %v974_v57 = vrot.slane %v7060_v53, 1  ;;  %v1197_v36 = vrot.slane %v7012_v14, 1  ;;  %v1198_v48 = vrot.slane %v7065_v8, 1  ;;  %v1900_v46 = vmax.f32 %v1467_v44, %v7073_v17 }
 0x193   : > { %v2726_v5 = vmul.f32 %v5707_v63, %v2678_v43  ;;  %5012 = vrcp.f32 %v2559_v37  ;;  %v7086_v51 = vadd.f32 %v2090_v18, %v1677_v22  ;;  %v1389_v3 = vrot.slane %v9062_v21, 1  ;;  %v9066_v43 = vld [vmem:[#allocation44_spill] sm:$0xff] }
 0x194   : > { %v1390_v58 = vrot.slane %v9064_v9, 1  ;;  %v7091_v47 = vadd.f32 %v1612_v33, %v7060_v53  ;;  %v7094_v29 = vadd.f32 %v7065_v8, %v1756_v30  ;;  %v2395_v39 = vadd.f32 %v2283_v38, %v972_v45 }
 0x195   : > { %v2758_v56 = vadd.f32 %v2726_v5, %v2629_v60  ;;  %vm637_vm14 = vcmp.gt.f32.partialorder %v9065_v34, -1e+29  ;;  %v827_v11 = vmax.f32 %v9062_v21, -1e+30  ;;  %v975_v10 = vsel %vm917_vm9, %v973_v24, %v974_v57 }
 0x196   : > { %v2131_v23 = vmax.f32 %v6928_v6, %v6972_v27  ;;  %v2598_v0 = vmax.f32 %v2481_v28, %v7073_v17  ;;  %v1199_v42 = vsel %vm917_vm9, %v1197_v36, %v1198_v48  ;;  %v1534_v45 = vrot.slane %v6990_v55, 2 }
 0x197   : > { %v2823_v26 = vadd.f32 %v2791_v62, %v2758_v56  ;;  %v7109_v41 = vsel %vm917_vm9, %v1389_v3, %v1390_v58  ;;  %v1535_v31 = vrot.slane %v7060_v53, 2  ;;  %v1678_v22 = vrot.slane %v7012_v14, 2  ;;  %v2630_v3 = vld [vmem:[#allocation2 + $0x88] sm:$0xff] }
 0x198   : > { %v1679_v35 = vrot.slane %v7065_v8, 2  ;;  %v7116_v6 = vmax.f32 %v1900_v46, %v9064_v9  ;;  %v7121_v27 = vsel %vm637_vm14, %v9065_v34, 0.0  ;;  %v2248_v54 = vmax.f32 %v2131_v23, %v7004_v20 }
 0x199   : > { %2856 = vst.msk [vmem:[#allocation2 + $0x80] sm:$0xff] %vm2839_vm15, %v2823_v26  ;;  %v2320_v25 = vadd.f32 %v7012_v14, %v7026_v19  ;;  %v2520_v4 = vadd.f32 %v2395_v39, %v1533_v61  ;;  %v7129_v44 = vsel %vm637_vm14, 1.0, %v9013_v1  ;;  %v1052_v15 = vadd.f32 %v975_v10, %v6990_v55 }
 0x19a   : > { %v1276_v16 = vadd.f32 %v7012_v14, %v1199_v42  ;;  %v2792_v62 = vmul.f32 %v9040_v59, %v2598_v0  ;;  %v1468_v33 = vmax.f32 %v827_v11, %v7109_v41  ;;  %v1822_v30 = vrot.slane %v9062_v21, 2 }
 0x19b   : > { %v2440_v20 = vadd.f32 %v2320_v25, %v1199_v42  ;;  %v1536_v18 = vsel %vm1478_vm10, %v1534_v45, %v1535_v31  ;;  %v1680_v19 = vsel %vm1478_vm10, %v1678_v22, %v1679_v35  ;;  %v1823_v61 = vrot.slane %v9064_v9, 2 }
 0x19c   : > { %vm848_vm0 = vcmp.gt.f32.partialorder %v9066_v43, -1e+29  ;;  %v2284_v14 = vadd.f32 %v7024_v50, %v6990_v55  ;;  %v2352_v37 = vmax.f32 %v2248_v54, %v9062_v21  ;;  %v1392_v46 = vrot.slane %v9066_v43, 1 }
 0x19d   : > { %v5013_v38 = vpop.eup %5012  ;;  %v2560_v60 = vadd.f32 %v2440_v20, %v1680_v19  ;;  %v864_v28 = vsel %vm848_vm0, %v9066_v43, 0.0  ;;  %v4662_v36 = vsel %vm848_vm0, 1.0, %v9013_v1  ;;  %v2047_v56 = vadd.f32 %v7017_v2, %v975_v10  ;;  %v9067_v20 = vld [vmem:[#allocation46_spill] sm:$0xff] }
 0x19e   : > { %v2680_v24 = vmul.f32 %v5013_v38, %v2520_v4  ;;  %v976_v5 = vrot.slane %v864_v28, 1  ;;  %v2091_v39 = vadd.f32 %v7050_v32, %v1199_v42  ;;  %v1200_v11 = vrot.slane %v4662_v36, 1 }
 0x19f   : > { %5014 = vrcp.f32 %v2560_v60  ;;  %v1613_v50 = vadd.f32 %v1536_v18, %v1052_v15  ;;  %v1757_v21 = vadd.f32 %v1680_v19, %v1276_v16  ;;  %v7152_v23 = vsel %vm1478_vm10, %v1822_v30, %v1823_v61 }
 0x1a0   : > { %v2727_v55 = vmul.f32 %v5707_v63, %v2680_v24  ;;  %v2396_v26 = vadd.f32 %v2284_v14, %v975_v10  ;;  %v2482_v0 = vmax.f32 %v2352_v37, %v7109_v41  ;;  %v828_v45 = vmax.f32 %v9064_v9, -1e+30 }
 0x1a1   : > { %v1825_v22 = vrot.slane %v9066_v43, 2  ;;  %v977_v2 = vsel %vm917_vm9, %v974_v57, %v976_v5  ;;  %v7161_v32 = vsel %vm917_vm9, %v1390_v58, %v1392_v46  ;;  %v1537_v42 = vrot.slane %v864_v28, 2 }
 0x1a2   : > { %v2759_v54 = vadd.f32 %v2727_v55, %v2630_v3  ;;  %v1901_v25 = vmax.f32 %v1468_v33, %v7152_v23  ;;  %v7164_v4 = vadd.f32 %v2047_v56, %v1536_v18  ;;  %v1201_v10 = vsel %vm917_vm9, %v1198_v48, %v1200_v11  ;;  %v2631_v56 = vld [vmem:[#allocation2 + $0x90] sm:$0xff] }
 0x1a3   : > { %v1681_v15 = vrot.slane %v4662_v36, 2  ;;  %v7169_v30 = vadd.f32 %v2091_v39, %v1680_v19  ;;  %vm638_vm1 = vcmp.gt.f32.partialorder %v9067_v20, -1e+29  ;;  %v2132_v57 = vmax.f32 %v6956_v7, %v7035_v49 }
 0x1a4   : > { %v2824_v16 = vadd.f32 %v2792_v62, %v2759_v54  ;;  %v2521_v58 = vadd.f32 %v2396_v26, %v1536_v18  ;;  %v2599_v43 = vmax.f32 %v2482_v0, %v7152_v23  ;;  %v1053_v33 = vadd.f32 %v977_v2, %v7060_v53 }
 0x1a5   : > { %v1469_v38 = vmax.f32 %v828_v45, %v7161_v32  ;;  %v1277_v48 = vadd.f32 %v7065_v8, %v1201_v10  ;;  %v1538_v62 = vsel %vm1478_vm10, %v1535_v31, %v1537_v42  ;;  %v7181_v19 = vsel %vm1478_vm10, %v1823_v61, %v1825_v22 }
 0x1a6   : > { %2857 = vst.msk [vmem:[#allocation2 + $0x88] sm:$0xff] %vm2839_vm15, %v2824_v16  ;;  %v2321_v14 = vadd.f32 %v7065_v8, %v7086_v51  ;;  %v7186_v7 = vadd.f32 %v1613_v50, %v7121_v27  ;;  %v7189_v49 = vadd.f32 %v7129_v44, %v1757_v21  ;;  %v1682_v18 = vsel %vm1478_vm10, %v1679_v35, %v1681_v15 }
 0x1a7   : > { %v2249_v37 = vmax.f32 %v2132_v57, %v7073_v17  ;;  %v7196_v31 = vmax.f32 %v1901_v25, %v9065_v34  ;;  %v7201_v61 = vsel %vm638_vm1, %v9067_v20, 0.0  ;;  %v7206_v51 = vsel %vm638_vm1, 1.0, %v9013_v1 }
 0x1a8   : > { %v2441_v60 = vadd.f32 %v2321_v14, %v1201_v10  ;;  %v2793_v8 = vmul.f32 %v9040_v59, %v2599_v43  ;;  %v1614_v35 = vadd.f32 %v1538_v62, %v1053_v33  ;;  %v1902_v17 = vmax.f32 %v1469_v38, %v7181_v19  ;;  %v9068_v14 = vld [vmem:[#allocation48_spill] sm:$0xff] }
 0x1a9   : > { %v5015_v28 = vpop.eup %5014  ;;  %v2048_v24 = vadd.f32 %v7091_v47, %v977_v2  ;;  %v1758_v36 = vadd.f32 %v1682_v18, %v1277_v48  ;;  %v2092_v46 = vadd.f32 %v7094_v29, %v1201_v10  ;;  %v2285_v39 = vadd.f32 %v7077_v52, %v7060_v53 }
 0x1aa   : > { %v2682_v5 = vmul.f32 %v5015_v28, %v2521_v58  ;;  %v2561_v3 = vadd.f32 %v2441_v60, %v1682_v18  ;;  %v2353_v11 = vmax.f32 %v2249_v37, %v9064_v9  ;;  %v978_v55 = vrot.slane %v7121_v27, 1 }
 0x1ab   : > { %v979_v50 = vrot.slane %v7201_v61, 1  ;;  %v1202_v47 = vrot.slane %v7129_v44, 1  ;;  %v1203_v26 = vrot.slane %v7206_v51, 1  ;;  %v7221_v29 = vadd.f32 %v1614_v35, %v7201_v61 }
 0x1ac   : > { %v2728_v21 = vmul.f32 %v5707_v63, %v2682_v5  ;;  %5016 = vrcp.f32 %v2561_v3  ;;  %v7224_v0 = vmax.f32 %v1902_v17, %v9067_v20  ;;  %v1394_v53 = vrot.slane %v9065_v34, 1 }
 0x1ad   : > { %v1395_v9 = vrot.slane %v9067_v20, 1  ;;  %v7229_v45 = vadd.f32 %v7206_v51, %v1758_v36  ;;  %v7231_v22 = vadd.f32 %v2048_v24, %v1538_v62  ;;  %v7233_v54 = vadd.f32 %v2092_v46, %v1682_v18  ;;  %v9069_v46 = vld [vmem:[#allocation47_spill] sm:$0xff] }
 0x1ae   : > { %v2760_v52 = vadd.f32 %v2728_v21, %v2631_v56  ;;  %v2397_v42 = vadd.f32 %v2285_v39, %v977_v2  ;;  %v980_v25 = vsel %vm917_vm9, %v978_v55, %v979_v50  ;;  %v1539_v10 = vrot.slane %v7121_v27, 2 }
 0x1af   : > { %v1540_v15 = vrot.slane %v7201_v61, 2  ;;  %v2483_v57 = vmax.f32 %v2353_v11, %v7161_v32  ;;  %v829_v58 = vmax.f32 %v9065_v34, -1e+30  ;;  %v1204_v43 = vsel %vm917_vm9, %v1202_v47, %v1203_v26 }
 0x1b0   : > { %v2825_v16 = vadd.f32 %v2793_v8, %v2760_v52  ;;  %v7248_v2 = vsel %vm917_vm9, %v1394_v53, %v1395_v9  ;;  %v1683_v33 = vrot.slane %v7129_v44, 2  ;;  %v1684_v38 = vrot.slane %v7206_v51, 2 }
 0x1b1   : > { %v2133_v48 = vmax.f32 %v7053_v40, %v7109_v41  ;;  %vm639_vm2 = vcmp.gt.f32.partialorder %v9068_v14, -1e+29  ;;  %v1054_v18 = vadd.f32 %v980_v25, %v7121_v27  ;;  %v1827_v37 = vrot.slane %v9065_v34, 2 }
 0x1b2   : > { %2858 = vst.msk [vmem:[#allocation2 + $0x90] sm:$0xff] %vm2839_vm15, %v2825_v16  ;;  %v1828_v60 = vrot.slane %v9067_v20, 2  ;;  %v2522_v28 = vadd.f32 %v2397_v42, %v1538_v62  ;;  %v1541_v8 = vsel %vm1478_vm10, %v1539_v10, %v1540_v15  ;;  %v2322_v40 = vadd.f32 %v7129_v44, %v7169_v30 }
 0x1b3   : > { %v2250_v35 = vmax.f32 %v2133_v48, %v7152_v23  ;;  %v2600_v41 = vmax.f32 %v2483_v57, %v7181_v19  ;;  %v7269_v17 = vsel %vm639_vm2, %v9068_v14, 0.0  ;;  %v1278_v24 = vadd.f32 %v7129_v44, %v1204_v43 }
 0x1b4   : > { %v1470_v62 = vmax.f32 %v829_v58, %v7248_v2  ;;  %v1685_v5 = vsel %vm1478_vm10, %v1683_v33, %v1684_v38  ;;  %v2442_v36 = vadd.f32 %v2322_v40, %v1204_v43  ;;  %vm849_vm3 = vcmp.gt.f32.partialorder %v9069_v46, -1e+29 }
 0x1b5   : > { %v2354_v23 = vmax.f32 %v2250_v35, %v9065_v34  ;;  %v1615_v3 = vadd.f32 %v1541_v8, %v1054_v18  ;;  %v7281_v56 = vsel %vm1478_vm10, %v1827_v37, %v1828_v60  ;;  %v2049_v44 = vadd.f32 %v7186_v7, %v980_v25  ;;  %v2632_v34 = vld [vmem:[#allocation2 + $0x98] sm:$0xff]  ;;  %v9070_v35 = vld [vmem:[#allocation49_spill] sm:$0xff] }
 0x1b6   : > { %v5017_v30 = vpop.eup %5016  ;;  %v865_v39 = vsel %vm849_vm3, %v9069_v46, 0.0  ;;  %v2562_v55 = vadd.f32 %v2442_v36, %v1685_v5  ;;  %v4663_v47 = vsel %vm849_vm3, 1.0, %v9013_v1  ;;  %v2794_v53 = vmul.f32 %v9040_v59, %v2600_v41 }
 0x1b7   : > { %v2684_v11 = vmul.f32 %v5017_v30, %v2522_v28  ;;  %v981_v21 = vrot.slane %v865_v39, 1  ;;  %v7290_v52 = vsel %vm639_vm2, 1.0, %v9013_v1  ;;  %v1759_v42 = vadd.f32 %v1685_v5, %v1278_v24 }
 0x1b8   : > { %v2286_v10 = vadd.f32 %v7164_v4, %v7121_v27  ;;  %v2093_v16 = vadd.f32 %v7189_v49, %v1204_v43  ;;  %v2484_v57 = vmax.f32 %v2354_v23, %v7248_v2  ;;  %5018 = vrcp.f32 %v2562_v55 }
 0x1b9   : > { %v2729_v7 = vmul.f32 %v5707_v63, %v2684_v11  ;;  %v1903_v58 = vmax.f32 %v1470_v62, %v7281_v56  ;;  %v7298_v33 = vadd.f32 %v2049_v44, %v1541_v8  ;;  %v1205_v48 = vrot.slane %v4663_v47, 1 }
 0x1ba   : > { %v1397_v18 = vrot.slane %v9069_v46, 1  ;;  %v7302_v28 = vadd.f32 %v1615_v3, %v7269_v17  ;;  %v982_v27 = vsel %vm917_vm9, %v979_v50, %v981_v21  ;;  %v1542_v4 = vrot.slane %v865_v39, 2 }
 0x1bb   : > { %v2761_v37 = vadd.f32 %v2729_v7, %v2632_v34  ;;  %v7308_v49 = vadd.f32 %v7290_v52, %v1759_v42  ;;  %v2398_v43 = vadd.f32 %v2286_v10, %v980_v25  ;;  %vm640_vm4 = vcmp.gt.f32.partialorder %v9070_v35, -1e+29 }
 0x1bc   : > { %v830_v40 = vmax.f32 %v9067_v20, -1e+30  ;;  %v2601_v24 = vmax.f32 %v2484_v57, %v7281_v56  ;;  %v1830_v62 = vrot.slane %v9069_v46, 2  ;;  %v2134_v23 = vmax.f32 %v7116_v6, %v7161_v32 }
 0x1bd   : > { %v2826_v41 = vadd.f32 %v2794_v53, %v2761_v37  ;;  %v1055_v36 = vadd.f32 %v982_v27, %v7201_v61  ;;  %v1206_v50 = vsel %vm917_vm9, %v1203_v26, %v1205_v48  ;;  %v7323_v25 = vsel %vm917_vm9, %v1395_v9, %v1397_v18 }
 0x1be   : > { %v1686_v30 = vrot.slane %v4663_v47, 2  ;;  %v7327_v3 = vmax.f32 %v1903_v58, %v9068_v14  ;;  %v2213_v46 = vadd.f32 %v2093_v16, %v1685_v5  ;;  %v1543_v6 = vsel %vm1478_vm10, %v1540_v15, %v1542_v4  ;;  %v9071_v4 = vld [vmem:[#allocation51_spill] sm:$0xff] }
 0x1bf   : > { %2859 = vst.msk [vmem:[#allocation2 + $0x98] sm:$0xff] %vm2839_vm15, %v2826_v41  ;;  %v2323_v32 = vadd.f32 %v7206_v51, %v7233_v54  ;;  %v2523_v26 = vadd.f32 %v2398_v43, %v1541_v8  ;;  %v7337_v9 = vsel %vm640_vm4, %v9070_v35, 0.0  ;;  %v7342_v44 = vsel %vm640_vm4, 1.0, %v9013_v1 }
 0x1c0   : > { %v2251_v5 = vmax.f32 %v2134_v23, %v7181_v19  ;;  %v2795_v39 = vmul.f32 %v9040_v59, %v2601_v24  ;;  %v1279_v15 = vadd.f32 %v7206_v51, %v1206_v50  ;;  %v1471_v11 = vmax.f32 %v830_v40, %v7323_v25 }
 0x1c1   : > { %v2443_v54 = vadd.f32 %v2323_v32, %v1206_v50  ;;  %v1616_v8 = vadd.f32 %v1543_v6, %v1055_v36  ;;  %v1687_v55 = vsel %vm1478_vm10, %v1684_v38, %v1686_v30  ;;  %v7354_v21 = vsel %vm1478_vm10, %v1828_v60, %v1830_v62  ;;  %v2633_v60 = vld [vmem:[#allocation2 + $0xa0] sm:$0xff] }
 0x1c2   : > { %v2050_v47 = vadd.f32 %v7221_v29, %v982_v27  ;;  %v5019_v19 = vpop.eup %5018  ;;  %v2094_v34 = vadd.f32 %v7229_v45, %v1206_v50  ;;  %v2287_v53 = vadd.f32 %v7231_v22, %v7201_v61  ;;  %v983_v10 = vrot.slane %v7269_v17, 1 }
 0x1c3   : > { %v2563_v42 = vadd.f32 %v2443_v54, %v1687_v55  ;;  %v2686_v7 = vmul.f32 %v5019_v19, %v2523_v26  ;;  %v2355_v51 = vmax.f32 %v2251_v5, %v9067_v20  ;;  %v984_v38 = vrot.slane %v7337_v9, 1 }
 0x1c4   : > { %v1207_v16 = vrot.slane %v7290_v52, 1  ;;  %v1208_v29 = vrot.slane %v7342_v44, 1  ;;  %v1399_v57 = vrot.slane %v9068_v14, 1  ;;  %v1400_v45 = vrot.slane %v9070_v35, 1 }
 0x1c5   : > { %5020 = vrcp.f32 %v2563_v42  ;;  %v2730_v61 = vmul.f32 %v5707_v63, %v2686_v7  ;;  %v1760_v22 = vadd.f32 %v1687_v55, %v1279_v15  ;;  %v1904_v58 = vmax.f32 %v1471_v11, %v7354_v21  ;;  %v9072_v42 = vld [vmem:[#allocation50_spill] sm:$0xff] }
 0x1c6   : > { %v7370_v48 = vadd.f32 %v1616_v8, %v7337_v9  ;;  %v7372_v20 = vadd.f32 %v2050_v47, %v1543_v6  ;;  %v7374_v18 = vadd.f32 %v2094_v34, %v1687_v55  ;;  %v2399_v37 = vadd.f32 %v2287_v53, %v982_v27 }
 0x1c7   : > { %vm641_vm5 = vcmp.gt.f32.partialorder %v9071_v4, -1e+29  ;;  %v2762_v43 = vadd.f32 %v2730_v61, %v2633_v60  ;;  %v2485_v40 = vmax.f32 %v2355_v51, %v7323_v25  ;;  %v831_v41 = vmax.f32 %v9068_v14, -1e+30 }
 0x1c8   : > { %v985_v24 = vsel %vm917_vm9, %v983_v10, %v984_v38  ;;  %v1209_v62 = vsel %vm917_vm9, %v1207_v16, %v1208_v29  ;;  %v7388_v23 = vsel %vm917_vm9, %v1399_v57, %v1400_v45  ;;  %v1544_v27 = vrot.slane %v7269_v17, 2 }
 0x1c9   : > { %v2135_v36 = vmax.f32 %v7196_v31, %v7248_v2  ;;  %v2827_v50 = vadd.f32 %v2795_v39, %v2762_v43  ;;  %v1545_v30 = vrot.slane %v7337_v9, 2  ;;  %v1688_v32 = vrot.slane %v7290_v52, 2 }
 0x1ca   : > { %v1689_v26 = vrot.slane %v7342_v44, 2  ;;  %v7397_v5 = vadd.f32 %v7342_v44, %v1760_v22  ;;  %v7400_v15 = vmax.f32 %v1904_v58, %v9070_v35  ;;  %v7405_v11 = vsel %vm641_vm5, %v9071_v4, 0.0  ;;  %v2634_v22 = vld [vmem:[#allocation2 + $0xa8] sm:$0xff] }
 0x1cb   : > { %v2252_v31 = vmax.f32 %v2135_v36, %v7281_v56  ;;  %2860 = vst.msk [vmem:[#allocation2 + $0xa0] sm:$0xff] %vm2839_vm15, %v2827_v50  ;;  %v2524_v2 = vadd.f32 %v2399_v37, %v1543_v6  ;;  %v1832_v39 = vrot.slane %v9068_v14, 2  ;;  %v1833_v54 = vrot.slane %v9070_v35, 2 }
 0x1cc   : > { %v2324_v8 = vadd.f32 %v7290_v52, %v2213_v46  ;;  %v2602_v55 = vmax.f32 %v2485_v40, %v7354_v21  ;;  %v1056_v47 = vadd.f32 %v985_v24, %v7269_v17  ;;  %v1280_v19 = vadd.f32 %v7290_v52, %v1209_v62 }
 0x1cd   : > { %v1472_v34 = vmax.f32 %v831_v41, %v7388_v23  ;;  %v1546_v53 = vsel %vm1478_vm10, %v1544_v27, %v1545_v30  ;;  %v1690_v56 = vsel %vm1478_vm10, %v1688_v32, %v1689_v26  ;;  %vm850_vm6 = vcmp.gt.f32.partialorder %v9072_v42, -1e+29 }
 0x1ce   : > { %v2444_v6 = vadd.f32 %v2324_v8, %v1209_v62  ;;  %v2051_v46 = vadd.f32 %v7302_v28, %v985_v24  ;;  %v2356_v7 = vmax.f32 %v2252_v31, %v9068_v14  ;;  %v866_v51 = vsel %vm850_vm6, %v9072_v42, 0.0 }
 0x1cf   : > { %v5021_v10 = vpop.eup %5020  ;;  %v4664_v52 = vsel %vm850_vm6, 1.0, %v9013_v1  ;;  %v7428_v60 = vsel %vm1478_vm10, %v1832_v39, %v1833_v54  ;;  %v986_v61 = vrot.slane %v866_v51, 1  ;;  %v1617_v58 = vadd.f32 %v1546_v53, %v1056_v47 }
 0x1d0   : > { %v2688_v16 = vmul.f32 %v5021_v10, %v2524_v2  ;;  %v2564_v57 = vadd.f32 %v2444_v6, %v1690_v56  ;;  %v1761_v37 = vadd.f32 %v1690_v56, %v1280_v19  ;;  %v2095_v43 = vadd.f32 %v7308_v49, %v1209_v62  ;;  %v9073_v6 = vld [vmem:[#allocation52_spill] sm:$0xff] }
 0x1d1   : > { %v2288_v14 = vadd.f32 %v7298_v33, %v7269_v17  ;;  %v2796_v40 = vmul.f32 %v9040_v59, %v2602_v55  ;;  %v1210_v41 = vrot.slane %v4664_v52, 1  ;;  %v7438_v27 = vsel %vm641_vm5, 1.0, %v9013_v1 }
 0x1d2   : > { %v2731_v28 = vmul.f32 %v5707_v63, %v2688_v16  ;;  %5022 = vrcp.f32 %v2564_v57  ;;  %v1905_v36 = vmax.f32 %v1472_v34, %v7428_v60  ;;  %v7441_v50 = vadd.f32 %v2051_v46, %v1546_v53 }
 0x1d3   : > { %v2486_v49 = vmax.f32 %v2356_v7, %v7388_v23  ;;  %v987_v17 = vsel %vm917_vm9, %v984_v38, %v986_v61  ;;  %v1402_v33 = vrot.slane %v9072_v42, 1  ;;  %v1547_v32 = vrot.slane %v866_v51, 2 }
 0x1d4   : > { %v2763_v62 = vadd.f32 %v2731_v28, %v2634_v22  ;;  %v7449_v31 = vadd.f32 %v1617_v58, %v7405_v11  ;;  %v7452_v2 = vadd.f32 %v7438_v27, %v1761_v37  ;;  %v7454_v39 = vadd.f32 %v2095_v43, %v1690_v56 }
 0x1d5   : > { %v2400_v8 = vadd.f32 %v2288_v14, %v985_v24  ;;  %v1211_v47 = vsel %vm917_vm9, %v1208_v29, %v1210_v41  ;;  %v1691_v19 = vrot.slane %v4664_v52, 2  ;;  %v2136_v38 = vmax.f32 %v7224_v0, %v7323_v25 }
 0x1d6   : > { %v2828_v55 = vadd.f32 %v2796_v40, %v2763_v62  ;;  %v2603_v34 = vmax.f32 %v2486_v49, %v7428_v60  ;;  %vm642_vm7 = vcmp.gt.f32.partialorder %v9073_v6, -1e+29  ;;  %v832_v10 = vmax.f32 %v9070_v35, -1e+30  ;;  %v2635_v40 = vld [vmem:[#allocation2 + $0xb0] sm:$0xff] }
 0x1d7   : > { %v1057_v46 = vadd.f32 %v987_v17, %v7337_v9  ;;  %v7469_v24 = vsel %vm917_vm9, %v1400_v45, %v1402_v33  ;;  %v1548_v29 = vsel %vm1478_vm10, %v1545_v30, %v1547_v32  ;;  %v1835_v56 = vrot.slane %v9072_v42, 2 }
 0x1d8   : > { %2861 = vst.msk [vmem:[#allocation2 + $0xa8] sm:$0xff] %vm2839_vm15, %v2828_v55  ;;  %v2325_v0 = vadd.f32 %v7342_v44, %v7374_v18  ;;  %v7476_v25 = vmax.f32 %v1905_v36, %v9071_v4  ;;  %v2525_v7 = vadd.f32 %v2400_v8, %v1546_v53  ;;  %v7479_v51 = vsel %vm642_vm7, %v9073_v6, 0.0 }
 0x1d9   : > { %v1281_v52 = vadd.f32 %v7342_v44, %v1211_v47  ;;  %v7483_v16 = vsel %vm642_vm7, 1.0, %v9013_v1  ;;  %v1692_v45 = vsel %vm1478_vm10, %v1689_v26, %v1691_v19  ;;  %v2253_v30 = vmax.f32 %v2136_v38, %v7354_v21 }
 0x1da   : > { %v2445_v42 = vadd.f32 %v2325_v0, %v1211_v47  ;;  %v2797_v18 = vmul.f32 %v9040_v59, %v2603_v34  ;;  %v7491_v57 = vmax.f32 %v832_v10, %v7469_v24  ;;  %v1618_v53 = vadd.f32 %v1548_v29, %v1057_v46 }
 0x1db   : > { %v2052_v61 = vadd.f32 %v7370_v48, %v987_v17  ;;  %v7497_v58 = vsel %vm1478_vm10, %v1833_v54, %v1835_v56  ;;  %v2096_v44 = vadd.f32 %v7397_v5, %v1211_v47  ;;  %v2289_v21 = vadd.f32 %v7372_v20, %v7337_v9 }
 0x1dc   : > { %v5023_v22 = vpop.eup %5022  ;;  %v2565_v26 = vadd.f32 %v2445_v42, %v1692_v45  ;;  %v1762_v43 = vadd.f32 %v1692_v45, %v1281_v52  ;;  %v988_v14 = vrot.slane %v7405_v11, 1  ;;  %v989_v28 = vrot.slane %v7479_v51, 1 }
 0x1dd   : > { %v2690_v37 = vmul.f32 %v5023_v22, %v2525_v7  ;;  %v2357_v48 = vmax.f32 %v2253_v30, %v9070_v35  ;;  %v1212_v41 = vrot.slane %v7438_v27, 1  ;;  %v1213_v54 = vrot.slane %v7483_v16, 1  ;;  %v9075_v22 = vld [vmem:[#allocation53_spill] sm:$0xff] }
 0x1de   : > { %5024 = vrcp.f32 %v2565_v26  ;;  %v1906_v9 = vmax.f32 %v7491_v57, %v7497_v58  ;;  %v7511_v20 = vadd.f32 %v1618_v53, %v7479_v51  ;;  %v7513_v36 = vadd.f32 %v2052_v61, %v1548_v29 }
 0x1df   : > { %v2732_v5 = vmul.f32 %v5707_v63, %v2690_v37  ;;  %v7515_v49 = vadd.f32 %v2096_v44, %v1692_v45  ;;  %v2401_v62 = vadd.f32 %v2289_v21, %v987_v17  ;;  %v1404_v35 = vrot.slane %v9071_v4, 1 }
 0x1e0   : > { %v1405_v33 = vrot.slane %v9073_v6, 1  ;;  %v990_v8 = vsel %vm917_vm9, %v988_v14, %v989_v28  ;;  %v1549_v55 = vrot.slane %v7405_v11, 2  ;;  %v1550_v47 = vrot.slane %v7479_v51, 2 }
 0x1e1   : > { %v2764_v32 = vadd.f32 %v2732_v5, %v2635_v40  ;;  %v7525_v19 = vadd.f32 %v7483_v16, %v1762_v43  ;;  %v2487_v38 = vmax.f32 %v2357_v48, %v7469_v24  ;;  %v833_v17 = vmax.f32 %v9071_v4, -1e+30  ;;  %v2636_v5 = vld [vmem:[#allocation2 + $0xb8] sm:$0xff] }
 0x1e2   : > { %v1214_v34 = vsel %vm917_vm9, %v1212_v41, %v1213_v54  ;;  %v1693_v46 = vrot.slane %v7438_v27, 2  ;;  %v1694_v56 = vrot.slane %v7483_v16, 2  ;;  %v2137_v0 = vmax.f32 %v7327_v3, %v7388_v23 }
 0x1e3   : > { %v2829_v10 = vadd.f32 %v2797_v18, %v2764_v32  ;;  %v1058_v7 = vadd.f32 %v990_v8, %v7405_v11  ;;  %v7540_v52 = vsel %vm917_vm9, %v1404_v35, %v1405_v33  ;;  %v1837_v45 = vrot.slane %v9071_v4, 2  ;;  %v9074_v18 = vld [vmem:[#allocation54_spill] sm:$0xff] }
 0x1e4   : > { %v1838_v30 = vrot.slane %v9073_v6, 2  ;;  %v2526_v42 = vadd.f32 %v2401_v62, %v1548_v29  ;;  %vm643_vm8 = vcmp.gt.f32.partialorder %v9074_v18, -1e+29  ;;  %v1551_v3 = vsel %vm1478_vm10, %v1549_v55, %v1550_v47 }
 0x1e5   : > { %2862 = vst.msk [vmem:[#allocation2 + $0xb0] sm:$0xff] %vm2839_vm15, %v2829_v10  ;;  %v2326_v23 = vadd.f32 %v7438_v27, %v7454_v39  ;;  %v2604_v57 = vmax.f32 %v2487_v38, %v7497_v58  ;;  %v1282_v53 = vadd.f32 %v7438_v27, %v1214_v34  ;;  %v2254_v61 = vmax.f32 %v2137_v0, %v7428_v60 }
 0x1e6   : > { %vm851_vm11 = vcmp.gt.f32.partialorder %v9075_v22, -1e+29  ;;  %v7558_v29 = vsel %vm643_vm8, %v9074_v18, 0.0  ;;  %v1474_v44 = vmax.f32 %v833_v17, %v7540_v52  ;;  %v1695_v21 = vsel %vm1478_vm10, %v1693_v46, %v1694_v56 }
 0x1e7   : > { %v2446_v39 = vadd.f32 %v2326_v23, %v1214_v34  ;;  %v1619_v37 = vadd.f32 %v1551_v3, %v1058_v7  ;;  %v7567_v60 = vsel %vm1478_vm10, %v1837_v45, %v1838_v30  ;;  %v2053_v27 = vadd.f32 %v7449_v31, %v990_v8 }
 0x1e8   : > { %v5025_v26 = vpop.eup %5024  ;;  %v867_v43 = vsel %vm851_vm11, %v9075_v22, 0.0  ;;  %v2290_v40 = vadd.f32 %v7441_v50, %v7405_v11  ;;  %v4665_v41 = vsel %vm851_vm11, 1.0, %v9013_v1  ;;  %v2798_v62 = vmul.f32 %v9040_v59, %v2604_v57 }
 0x1e9   : > { %v2692_v14 = vmul.f32 %v5025_v26, %v2526_v42  ;;  %v2566_v48 = vadd.f32 %v2446_v39, %v1695_v21  ;;  %v1763_v35 = vadd.f32 %v1695_v21, %v1282_v53  ;;  %v2097_v32 = vadd.f32 %v7452_v2, %v1214_v34 }
 0x1ea   : > { %v2358_v55 = vmax.f32 %v2254_v61, %v9071_v4  ;;  %v1907_v31 = vmax.f32 %v1474_v44, %v7567_v60  ;;  %v991_v17 = vrot.slane %v867_v43, 1  ;;  %v7580_v10 = vmax.f32 %v1906_v9, %v9073_v6  ;;  %v9076_v61 = vld [vmem:[#allocation55_spill] sm:$0xff] }
 0x1eb   : > { %v2733_v38 = vmul.f32 %v5707_v63, %v2692_v14  ;;  %5026 = vrcp.f32 %v2566_v48  ;;  %v7585_v11 = vsel %vm643_vm8, 1.0, %v9013_v1  ;;  %v7588_v50 = vadd.f32 %v1619_v37, %v7558_v29 }
 0x1ec   : > { %v1215_v2 = vrot.slane %v4665_v41, 1  ;;  %v7590_v4 = vadd.f32 %v2053_v27, %v1551_v3  ;;  %v2402_v46 = vadd.f32 %v2290_v40, %v990_v8  ;;  %v1407_v0 = vrot.slane %v9075_v22, 1 }
 0x1ed   : > { %v2765_v34 = vadd.f32 %v2733_v38, %v2636_v5  ;;  %v7594_v7 = vadd.f32 %v7585_v11, %v1763_v35  ;;  %v7596_v9 = vadd.f32 %v2097_v32, %v1695_v21  ;;  %v2488_v45 = vmax.f32 %v2358_v55, %v7540_v52  ;;  %v2637_v55 = vld [vmem:[#allocation2 + $0xc0] sm:$0xff] }
 0x1ee   : > { %v1552_v42 = vrot.slane %v867_v43, 2  ;;  %v7600_v57 = vmax.f32 %v1907_v31, %v9074_v18  ;;  %v992_v53 = vsel %vm917_vm9, %v989_v28, %v991_v17  ;;  %v2138_v8 = vmax.f32 %v7400_v15, %v7469_v24 }
 0x1ef   : > { %v2830_v23 = vadd.f32 %v2798_v62, %v2765_v34  ;;  %vm644_vm12 = vcmp.gt.f32.partialorder %v9076_v61, -1e+29  ;;  %v834_v44 = vmax.f32 %v9073_v6, -1e+30  ;;  %v1216_v21 = vsel %vm917_vm9, %v1213_v54, %v1215_v2 }
 0x1f0   : > { %v1696_v39 = vrot.slane %v4665_v41, 2  ;;  %v2527_v26 = vadd.f32 %v2402_v46, %v1551_v3  ;;  %v7616_v37 = vsel %vm644_vm12, %v9076_v61, 0.0  ;;  %v7621_v15 = vsel %vm917_vm9, %v1405_v33, %v1407_v0 }
 0x1f1   : > { %2863 = vst.msk [vmem:[#allocation2 + $0xb8] sm:$0xff] %vm2839_vm15, %v2830_v23  ;;  %v2255_v24 = vmax.f32 %v2138_v8, %v7497_v58  ;;  %v2605_v28 = vmax.f32 %v2488_v45, %v7567_v60  ;;  %v1059_v54 = vadd.f32 %v992_v53, %v7479_v51  ;;  %v1553_v3 = vsel %vm1478_vm10, %v1550_v47, %v1552_v42 }
 0x1f2   : > { %v2327_v27 = vadd.f32 %v7483_v16, %v7515_v49  ;;  %v1283_v43 = vadd.f32 %v7483_v16, %v1216_v21  ;;  %v1840_v14 = vrot.slane %v9075_v22, 2  ;;  %v2054_v33 = vadd.f32 %v7511_v20, %v992_v53 }
 0x1f3   : > { %v2098_v40 = vadd.f32 %v7525_v19, %v1216_v21  ;;  %v7638_v58 = vsel %vm644_vm12, 1.0, %v9013_v1  ;;  %v1697_v47 = vsel %vm1478_vm10, %v1694_v56, %v1696_v39  ;;  %v2291_v49 = vadd.f32 %v7513_v36, %v7479_v51 }
 0x1f4   : > { %v2447_v48 = vadd.f32 %v2327_v27, %v1216_v21  ;;  %v1475_v22 = vmax.f32 %v834_v44, %v7621_v15  ;;  %v2359_v20 = vmax.f32 %v2255_v24, %v9073_v6  ;;  %v993_v19 = vrot.slane %v7558_v29, 1 }
 0x1f5   : > { %v5027_v41 = vpop.eup %5026  ;;  %v994_v5 = vrot.slane %v7616_v37, 1  ;;  %v2799_v35 = vmul.f32 %v9040_v59, %v2605_v28  ;;  %v1620_v32 = vadd.f32 %v1553_v3, %v1059_v54  ;;  %v1764_v56 = vadd.f32 %v1697_v47, %v1283_v43 }
 0x1f6   : > { %v2694_v62 = vmul.f32 %v5027_v41, %v2527_v26  ;;  %v2567_v16 = vadd.f32 %v2447_v48, %v1697_v47  ;;  %v7653_v51 = vsel %vm1478_vm10, %v1838_v30, %v1840_v14  ;;  %v7655_v36 = vadd.f32 %v2054_v33, %v1553_v3  ;;  %v9077_v33 = vld [vmem:[#allocation56_spill] sm:$0xff] }
 0x1f7   : > { %v7657_v38 = vadd.f32 %v2098_v40, %v1697_v47  ;;  %v2403_v17 = vadd.f32 %v2291_v49, %v992_v53  ;;  %v1217_v2 = vrot.slane %v7585_v11, 1  ;;  %v2489_v34 = vmax.f32 %v2359_v20, %v7621_v15 }
 0x1f8   : > { %v2734_v31 = vmul.f32 %v5707_v63, %v2694_v62  ;;  %5028 = vrcp.f32 %v2567_v16  ;;  %v995_v46 = vsel %vm917_vm9, %v993_v19, %v994_v5  ;;  %v1218_v6 = vrot.slane %v7638_v58, 1 }
 0x1f9   : > { %v1409_v30 = vrot.slane %v9074_v18, 1  ;;  %v1410_v45 = vrot.slane %v9076_v61, 1  ;;  %v1554_v42 = vrot.slane %v7558_v29, 2  ;;  %v1555_v23 = vrot.slane %v7616_v37, 2 }
 0x1fa   : > { %v2766_v0 = vadd.f32 %v2734_v31, %v2637_v55  ;;  %v1908_v53 = vmax.f32 %v1475_v22, %v7653_v51  ;;  %v7672_v8 = vadd.f32 %v1620_v32, %v7616_v37  ;;  %v7675_v44 = vadd.f32 %v7638_v58, %v1764_v56 }
 0x1fb   : > { %v2139_v21 = vmax.f32 %v7476_v25, %v7540_v52  ;;  %v835_v26 = vmax.f32 %v9074_v18, -1e+30  ;;  %v1698_v24 = vrot.slane %v7585_v11, 2  ;;  %v1699_v28 = vrot.slane %v7638_v58, 2 }
 0x1fc   : > { %v2831_v39 = vadd.f32 %v2799_v35, %v2766_v0  ;;  %v2528_v54 = vadd.f32 %v2403_v17, %v1553_v3  ;;  %v1060_v27 = vadd.f32 %v995_v46, %v7558_v29  ;;  %v1219_v43 = vsel %vm917_vm9, %v1217_v2, %v1218_v6 }
 0x1fd   : > { %v2328_v14 = vadd.f32 %v7585_v11, %v7596_v9  ;;  %v2606_v25 = vmax.f32 %v2489_v34, %v7653_v51  ;;  %v7691_v52 = vsel %vm917_vm9, %v1409_v30, %v1410_v45  ;;  %v1556_v3 = vsel %vm1478_vm10, %v1554_v42, %v1555_v23 }
 0x1fe   : > { %2864 = vst.msk [vmem:[#allocation2 + $0xc0] sm:$0xff] %vm2839_vm15, %v2831_v39  ;;  %vm852_vm13 = vcmp.gt.f32.partialorder %v9077_v33, -1e+29  ;;  %v1842_v40 = vrot.slane %v9074_v18, 2  ;;  %v1843_v47 = vrot.slane %v9076_v61, 2  ;;  %v2256_v49 = vmax.f32 %v2139_v21, %v7567_v60 }
 0x1ff   : > { %v2448_v9 = vadd.f32 %v2328_v14, %v1219_v43  ;;  %v7701_v48 = vmax.f32 %v1908_v53, %v9076_v61  ;;  %v1284_v41 = vadd.f32 %v7585_v11, %v1219_v43  ;;  %v1700_v22 = vsel %vm1478_vm10, %v1698_v24, %v1699_v28 }
 0x200   : > { %v2292_v20 = vadd.f32 %v7590_v4, %v7558_v29  ;;  %v2055_v19 = vadd.f32 %v7588_v50, %v995_v46  ;;  %v868_v35 = vsel %vm852_vm13, %v9077_v33, 0.0  ;;  %v4666_v32 = vsel %vm852_vm13, 1.0, %v9013_v1  ;;  %v2638_v50 = vld [vmem:[#allocation2 + $0xc8] sm:$0xff] }
 0x201   : > { %v2568_v62 = vadd.f32 %v2448_v9, %v1700_v22  ;;  %v2800_v60 = vmul.f32 %v9040_v59, %v2606_v25  ;;  %v1476_v55 = vmax.f32 %v835_v26, %v7691_v52  ;;  %v7712_v56 = vadd.f32 %v1556_v3, %v1060_v27  ;;  %v9078_v9 = vld [vmem:[#allocation57_spill] sm:$0xff] }
 0x202   : > { %v5029_v16 = vpop.eup %5028  ;;  %v1412_v11 = vrot.slane %v9077_v33, 1  ;;  %v7716_v17 = vsel %vm1478_vm10, %v1842_v40, %v1843_v47  ;;  %v2360_v29 = vmax.f32 %v2256_v49, %v9074_v18  ;;  %v2099_v4 = vadd.f32 %v7594_v7, %v1219_v43 }
 0x203   : > { %v2696_v31 = vmul.f32 %v5029_v16, %v2528_v54  ;;  %5030 = vrcp.f32 %v2568_v62  ;;  %v2404_v2 = vadd.f32 %v2292_v20, %v995_v46  ;;  %v996_v34 = vrot.slane %v868_v35, 1 }
 0x204   : > { %v1220_v30 = vrot.slane %v4666_v32, 1  ;;  %v1765_v42 = vadd.f32 %v1700_v22, %v1284_v41  ;;  %v7721_v53 = vadd.f32 %v2055_v19, %v1556_v3  ;;  %v836_v21 = vmax.f32 %v9076_v61, -1e+30 }
 0x205   : > { %v2735_v0 = vmul.f32 %v5707_v63, %v2696_v31  ;;  %v1909_v39 = vmax.f32 %v1476_v55, %v7716_v17  ;;  %v7726_v26 = vsel %vm917_vm9, %v1410_v45, %v1412_v11  ;;  %v1701_v18 = vrot.slane %v4666_v32, 2 }
 0x206   : > { %v2140_v24 = vmax.f32 %v7580_v10, %v7621_v15  ;;  %v2490_v46 = vmax.f32 %v2360_v29, %v7691_v52  ;;  %v1557_v54 = vrot.slane %v868_v35, 2  ;;  %v2329_v27 = vadd.f32 %v7638_v58, %v7657_v38 }
 0x207   : > { %v2767_v7 = vadd.f32 %v2735_v0, %v2638_v50  ;;  %v2529_v43 = vadd.f32 %v2404_v2, %v1556_v3  ;;  %v997_v14 = vsel %vm917_vm9, %v994_v5, %v996_v34  ;;  %v1221_v45 = vsel %vm917_vm9, %v1218_v6, %v1220_v30  ;;  %v9079_v5 = vld [vmem:[#allocation58_spill] sm:$0xff] }
 0x208   : > { %v1845_v25 = vrot.slane %v9077_v33, 2  ;;  %v1477_v10 = vmax.f32 %v836_v21, %v7726_v26  ;;  %v2293_v15 = vadd.f32 %v7655_v36, %v7616_v37  ;;  %v2449_v49 = vadd.f32 %v2329_v27, %v1221_v45 }
 0x209   : > { %v2832_v40 = vadd.f32 %v2800_v60, %v2767_v7  ;;  %v7744_v38 = vsel %vm1478_vm10, %v1699_v28, %v1701_v18  ;;  %v2257_v3 = vmax.f32 %v2140_v24, %v7653_v51  ;;  %vm1911_vm14 = vcmp.gt.f32.partialorder %v9078_v9, -1e+29  ;;  %v2639_v60 = vld [vmem:[#allocation2 + $0xd0] sm:$0xff] }
 0x20a   : > { %vm1912_vm0 = vcmp.gt.f32.partialorder %v9079_v5, -1e+29  ;;  %v2607_v6 = vmax.f32 %v2490_v46, %v7716_v17  ;;  %v1061_v33 = vadd.f32 %v997_v14, %v7616_v37  ;;  %v7755_v36 = vsel %vm1478_vm10, %v1555_v23, %v1557_v54 }
 0x20b   : > { %2865 = vst.msk [vmem:[#allocation2 + $0xc8] sm:$0xff] %vm2839_vm15, %v2832_v40  ;;  %v2569_v28 = vadd.f32 %v2449_v49, %v7744_v38  ;;  %v1285_v41 = vadd.f32 %v7638_v58, %v1221_v45  ;;  %v7760_v51 = vsel %vm1478_vm10, %v1843_v47, %v1845_v25  ;;  %v1913_v20 = vsel %vm1911_vm14, %v9078_v9, 0.0 }
 0x20c   : > { %v7764_v19 = vsel %vm1912_vm0, %v9079_v5, 0.0  ;;  %v2405_v35 = vadd.f32 %v2293_v15, %v997_v14  ;;  %v4667_v37 = vsel %vm1911_vm14, 1.0, %v9013_v1  ;;  %v7768_v23 = vsel %vm1912_vm0, 1.0, %v9013_v1 }
 0x20d   : > { %v5031_v62 = vpop.eup %5030  ;;  %5032 = vrcp.f32 %v2569_v28  ;;  %v7771_v32 = vmax.f32 %v1909_v39, %v9078_v9  ;;  %v2219_v58 = vadd.f32 %v2099_v4, %v1700_v22  ;;  %v2361_v47 = vmax.f32 %v2257_v3, %v9076_v61 }
 0x20e   : > { %v2698_v16 = vmul.f32 %v5031_v62, %v2529_v43  ;;  %v2801_v55 = vmul.f32 %v9040_v59, %v2607_v6  ;;  %v7776_v11 = vadd.f32 %v7755_v36, %v1061_v33  ;;  %v2020_v31 = vrot.slane %v1913_v20, 1 }
 0x20f   : > { %v2021_v29 = vrot.slane %v7764_v19, 1  ;;  %v1910_v2 = vmax.f32 %v1477_v10, %v7760_v51  ;;  %v2064_v34 = vrot.slane %v4667_v37, 1  ;;  %v2065_v30 = vrot.slane %v7768_v23, 1  ;;  %v9080_v10 = vld [vmem:[#allocation59_spill] sm:$0xff] }
 0x210   : > { %v2736_v50 = vmul.f32 %v5707_v63, %v2698_v16  ;;  %v1766_v22 = vadd.f32 %v7744_v38, %v1285_v41  ;;  %v2056_v61 = vadd.f32 %v7672_v8, %v997_v14  ;;  %v2100_v4 = vadd.f32 %v7675_v44, %v1221_v45 }
 0x211   : > { %v2530_v0 = vadd.f32 %v2405_v35, %v7755_v36  ;;  %v2491_v39 = vmax.f32 %v2361_v47, %v7726_v26  ;;  %v1945_v18 = vadd.f32 %v1913_v20, %v7712_v56  ;;  %v2141_v24 = vmax.f32 %v7600_v57, %v7691_v52 }
 0x212   : > { %v2768_v21 = vadd.f32 %v2736_v50, %v2639_v60  ;;  %v1981_v7 = vadd.f32 %v4667_v37, %v1765_v42  ;;  %v2022_v46 = vsel %vm917_vm9, %v2020_v31, %v2021_v29  ;;  %v2106_v54 = vrot.slane %v9078_v9, 1 }
 0x213   : > { %v2107_v8 = vrot.slane %v9079_v5, 1  ;;  %v2066_v27 = vsel %vm917_vm9, %v2064_v34, %v2065_v30  ;;  %v2184_v43 = vrot.slane %v4667_v37, 2  ;;  %v2185_v14 = vrot.slane %v7768_v23, 2 }
 0x214   : > { %v2833_v44 = vadd.f32 %v2801_v55, %v2768_v21  ;;  %v7798_v56 = vmax.f32 %v1910_v2, %v9079_v5  ;;  %v2145_v45 = vrot.slane %v1913_v20, 2  ;;  %v2146_v57 = vrot.slane %v7764_v19, 2 }
 0x215   : > { %v2330_v52 = vadd.f32 %v4667_v37, %v2219_v58  ;;  %v2608_v42 = vmax.f32 %v2491_v39, %v7760_v51  ;;  %v2057_v25 = vadd.f32 %v2022_v46, %v1945_v18  ;;  %v2258_v40 = vmax.f32 %v2141_v24, %v7716_v17  ;;  %v2640_v37 = vld [vmem:[#allocation2 + $0xd8] sm:$0xff] }
 0x216   : > { %2866 = vst.msk [vmem:[#allocation2 + $0xd0] sm:$0xff] %vm2839_vm15, %v2833_v44  ;;  %vm2015_vm1 = vcmp.gt.f32.partialorder %v9080_v10, -1e+29  ;;  %v2101_v49 = vadd.f32 %v2066_v27, %v1981_v7  ;;  %v2108_v3 = vsel %vm917_vm9, %v2106_v54, %v2107_v8  ;;  %v2223_v6 = vrot.slane %v9078_v9, 2 }
 0x217   : > { %v5033_v15 = vpop.eup %5032  ;;  %v2450_v33 = vadd.f32 %v2330_v52, %v2066_v27  ;;  %v2186_v41 = vsel %vm1478_vm10, %v2184_v43, %v2185_v14  ;;  %v2224_v62 = vrot.slane %v9079_v5, 2  ;;  %v4669_v35 = vsel %vm2015_vm1, 1.0, %v9013_v1  ;;  %v9081_v27 = vld [vmem:[#allocation60_spill] sm:$0xff]  ;;  %v9082_v43 = vld [vmem:[#allocation61_spill] sm:$0xff] }
 0x218   : > { %v2700_v28 = vmul.f32 %v5033_v15, %v2530_v0  ;;  %v2147_v17 = vsel %vm1478_vm10, %v2145_v45, %v2146_v57  ;;  %v2294_v58 = vadd.f32 %v7721_v53, %v1913_v20  ;;  %v2016_v47 = vsel %vm2015_vm1, %v9080_v10, 0.0 }
 0x219   : > { %v2570_v16 = vadd.f32 %v2450_v33, %v2186_v41  ;;  %v2220_v60 = vadd.f32 %v2100_v4, %v7744_v38  ;;  %v2802_v31 = vmul.f32 %v9040_v59, %v2608_v42  ;;  %v2362_v50 = vmax.f32 %v2258_v40, %v9078_v9 }
 0x21a   : > { %v2737_v55 = vmul.f32 %v5707_v63, %v2700_v28  ;;  %v2181_v2 = vadd.f32 %v2056_v61, %v7755_v36  ;;  %v2143_v34 = vmax.f32 %v7771_v32, %v2108_v3  ;;  %v2067_v0 = vrot.slane %v4669_v35, 1 }
 0x21b   : > { %5034 = vrcp.f32 %v2570_v16  ;;  %v7823_v39 = vadd.f32 %v2147_v17, %v2057_v25  ;;  %v2221_v53 = vadd.f32 %v2186_v41, %v2101_v49  ;;  %v2023_v20 = vrot.slane %v2016_v47, 1 }
 0x21c   : > { %v2769_v21 = vadd.f32 %v2737_v55, %v2640_v37  ;;  %v2225_v38 = vsel %vm1478_vm10, %v2223_v6, %v2224_v62  ;;  %v2406_v4 = vadd.f32 %v2294_v58, %v2022_v46  ;;  %v2142_v18 = vmax.f32 %v7701_v48, %v7726_v26  ;;  %v2641_v58 = vld [vmem:[#allocation2 + $0xe0] sm:$0xff] }
 0x21d   : > { %v2187_v9 = vrot.slane %v4669_v35, 2  ;;  %v2492_v36 = vmax.f32 %v2362_v50, %v2108_v3  ;;  %v1946_v32 = vadd.f32 %v7764_v19, %v7776_v11  ;;  %v2331_v61 = vadd.f32 %v7768_v23, %v2220_v60 }
 0x21e   : > { %v2834_v24 = vadd.f32 %v2802_v31, %v2769_v21  ;;  %v1982_v7 = vadd.f32 %v7768_v23, %v1766_v22  ;;  %v2068_v54 = vsel %vm917_vm9, %v2065_v30, %v2067_v0  ;;  %v2109_v44 = vrot.slane %v9080_v10, 1 }
 0x21f   : > { %vm2262_vm2 = vcmp.gt.f32.partialorder %v9081_v27, -1e+29  ;;  %v2024_v48 = vsel %vm917_vm9, %v2021_v29, %v2023_v20  ;;  %v2148_v26 = vrot.slane %v2016_v47, 2  ;;  %v2451_v46 = vadd.f32 %v2331_v61, %v2068_v54 }
 0x220   : > { %2867 = vst.msk [vmem:[#allocation2 + $0xd8] sm:$0xff] %vm2839_vm15, %v2834_v24  ;;  %vm2263_vm3 = vcmp.gt.f32.partialorder %v9082_v43, -1e+29  ;;  %v7842_v11 = vmax.f32 %v2143_v34, %v2225_v38  ;;  %v2188_v23 = vsel %vm1478_vm10, %v2185_v14, %v2187_v9  ;;  %v2259_v30 = vmax.f32 %v2142_v18, %v7760_v51 }
 0x221   : > { %v2295_v22 = vadd.f32 %v2181_v2, %v7764_v19  ;;  %v2531_v45 = vadd.f32 %v2406_v4, %v2147_v17  ;;  %v2609_v52 = vmax.f32 %v2492_v36, %v2225_v38  ;;  %v2571_v42 = vadd.f32 %v2451_v46, %v2188_v23  ;;  %v9083_v38 = vld [vmem:[#allocation62_spill] sm:$0xff] }
 0x222   : > { %v4670_v25 = vsel %vm2262_vm2, 1.0, %v9013_v1  ;;  %v2058_v29 = vadd.f32 %v2024_v48, %v1946_v32  ;;  %v2102_v40 = vadd.f32 %v2068_v54, %v1982_v7  ;;  %v2110_v15 = vsel %vm917_vm9, %v2107_v8, %v2109_v44 }
 0x223   : > { %v4671_v14 = vsel %vm2263_vm3, 1.0, %v9013_v1  ;;  %v2149_v51 = vsel %vm1478_vm10, %v2146_v57, %v2148_v26  ;;  %5036 = vrcp.f32 %v2571_v42  ;;  %v2332_v49 = vadd.f32 %v4670_v25, %v2221_v53 }
 0x224   : > { %v2415_v3 = vrot.slane %v4670_v25, 1  ;;  %v2226_v33 = vrot.slane %v9080_v10, 2  ;;  %v2363_v28 = vmax.f32 %v2259_v30, %v9079_v5  ;;  %v2407_v41 = vadd.f32 %v2295_v22, %v2024_v48  ;;  %v2642_v22 = vld [vmem:[#allocation2 + $0xe8] sm:$0xff] }
 0x225   : > { %v5035_v6 = vpop.eup %5034  ;;  %v2416_v35 = vrot.slane %v4671_v14, 1  ;;  %v2364_v8 = vmax.f32 %v7842_v11, %v9081_v27  ;;  %v2803_v17 = vmul.f32 %v9040_v59, %v2609_v52  ;;  %v2144_v19 = vmax.f32 %v7798_v56, %v2110_v15 }
 0x226   : > { %v2702_v37 = vmul.f32 %v5035_v6, %v2531_v45  ;;  %v2264_v57 = vsel %vm2262_vm2, %v9081_v27, 0.0  ;;  %v7871_v10 = vsel %vm2263_vm3, %v9082_v43, 0.0  ;;  %v2535_v47 = vrot.slane %v4670_v25, 2 }
 0x227   : > { %v2417_v16 = vsel %vm917_vm9, %v2415_v3, %v2416_v35  ;;  %v2183_v55 = vadd.f32 %v2149_v51, %v2058_v29  ;;  %v2222_v31 = vadd.f32 %v2188_v23, %v2102_v40  ;;  %v2227_v56 = vsel %vm1478_vm10, %v2224_v62, %v2226_v33 }
 0x228   : > { %v2738_v60 = vmul.f32 %v5707_v63, %v2702_v37  ;;  %v2452_v50 = vadd.f32 %v2417_v16, %v2332_v49  ;;  %v2493_v2 = vmax.f32 %v2363_v28, %v2110_v15  ;;  %v2532_v34 = vadd.f32 %v2407_v41, %v2149_v51 }
 0x229   : > { %v2536_v0 = vrot.slane %v4671_v14, 2  ;;  %v2371_v53 = vrot.slane %v2264_v57, 1  ;;  %v2372_v20 = vrot.slane %v7871_v10, 1  ;;  %vm2366_vm4 = vcmp.gt.f32.partialorder %v9083_v38, -1e+29 }
 0x22a   : > { %v2770_v21 = vadd.f32 %v2738_v60, %v2641_v58  ;;  %v2457_v4 = vrot.slane %v9081_v27, 1  ;;  %v2458_v18 = vrot.slane %v9082_v43, 1  ;;  %v4672_v24 = vsel %vm2366_vm4, 1.0, %v9013_v1 }
 0x22b   : > { %v2537_v9 = vsel %vm1478_vm10, %v2535_v47, %v2536_v0  ;;  %v2296_v62 = vadd.f32 %v2264_v57, %v7823_v39  ;;  %v2333_v36 = vadd.f32 %v4671_v14, %v2222_v31  ;;  %v2610_v61 = vmax.f32 %v2493_v2, %v2227_v56  ;;  %v2643_v31 = vld [vmem:[#allocation2 + $0xf0] sm:$0xff] }
 0x22c   : > { %v2835_v5 = vadd.f32 %v2803_v17, %v2770_v21  ;;  %v2572_v32 = vadd.f32 %v2537_v9, %v2452_v50  ;;  %v2367_v7 = vsel %vm2366_vm4, %v9083_v38, 0.0  ;;  %v2418_v54 = vrot.slane %v4672_v24, 1 }
 0x22d   : > { %v2538_v44 = vrot.slane %v4672_v24, 2  ;;  %v5037_v48 = vpop.eup %5036  ;;  %v2373_v26 = vsel %vm917_vm9, %v2371_v53, %v2372_v20  ;;  %v2496_v46 = vrot.slane %v2264_v57, 2  ;;  %v2497_v11 = vrot.slane %v7871_v10, 2 }
 0x22e   : > { %2868 = vst.msk [vmem:[#allocation2 + $0xe0] sm:$0xff] %vm2839_vm15, %v2835_v5  ;;  %5038 = vrcp.f32 %v2572_v32  ;;  %v2704_v1 = vmul.f32 %v5037_v48, %v2532_v34  ;;  %v2459_v23 = vsel %vm917_vm9, %v2457_v4, %v2458_v18  ;;  %v2574_v39 = vrot.slane %v9081_v27, 2 }
 0x22f   : > { %v2419_v30 = vsel %vm917_vm9, %v2416_v35, %v2418_v54  ;;  %v2575_v45 = vrot.slane %v9082_v43, 2  ;;  %v2374_v52 = vrot.slane %v2367_v7, 1  ;;  %v2539_v25 = vsel %vm1478_vm10, %v2536_v0, %v2538_v44 }
 0x230   : > { %v2453_v42 = vadd.f32 %v2419_v30, %v2333_v36  ;;  %v2261_v29 = vmax.f32 %v2144_v19, %v2227_v56  ;;  %v2739_v40 = vmul.f32 %v5707_v63, %v2704_v1  ;;  %v2804_v15 = vmul.f32 %v9040_v59, %v2610_v61 }
 0x231   : > { %v2408_v14 = vadd.f32 %v2373_v26, %v2296_v62  ;;  %v2498_v51 = vsel %vm1478_vm10, %v2496_v46, %v2497_v11  ;;  %v2460_v49 = vrot.slane %v9083_v38, 1  ;;  %v2494_v6 = vmax.f32 %v2364_v8, %v2459_v23 }
 0x232   : > { %v2573_v27 = vadd.f32 %v2539_v25, %v2453_v42  ;;  %v2771_v3 = vadd.f32 %v2739_v40, %v2642_v22  ;;  %v2297_v33 = vadd.f32 %v7871_v10, %v2183_v55  ;;  %v2576_v28 = vsel %vm1478_vm10, %v2574_v39, %v2575_v45 }
 0x233   : > { %v2375_v41 = vsel %vm917_vm9, %v2372_v20, %v2374_v52  ;;  %v2499_v35 = vrot.slane %v2367_v7, 2  ;;  %v2365_v37 = vmax.f32 %v2261_v29, %v9082_v43  ;;  %v2533_v19 = vadd.f32 %v2498_v51, %v2408_v14 }
 0x234   : > { %5040 = vrcp.f32 %v2573_v27  ;;  %v2836_v17 = vadd.f32 %v2804_v15, %v2771_v3  ;;  %v2461_v58 = vsel %vm917_vm9, %v2458_v18, %v2460_v49  ;;  %v2577_v57 = vrot.slane %v9083_v38, 2  ;;  %v2644_v38 = vld [vmem:[#allocation2 + $0xf8] sm:$0xff] }
 0x235   : > { %v2611_v16 = vmax.f32 %v2494_v6, %v2576_v28  ;;  %v2409_v8 = vadd.f32 %v2375_v41, %v2297_v33  ;;  %v2500_v10 = vsel %vm1478_vm10, %v2497_v11, %v2499_v35  ;;  %v2495_v55 = vmax.f32 %v2365_v37, %v2461_v58 }
 0x236   : > { %2869 = vst.msk [vmem:[#allocation2 + $0xe8] sm:$0xff] %vm2839_vm15, %v2836_v17  ;;  %v2578_v50 = vsel %vm1478_vm10, %v2575_v45, %v2577_v57 }
 0x237   : > { %v2805_v56 = vmul.f32 %v9040_v59, %v2611_v16  ;;  %v2534_v2 = vadd.f32 %v2500_v10, %v2409_v8  ;;  %v2612_v0 = vmax.f32 %v2495_v55, %v2578_v50 }
 0x238   : > { %v5039_v47 = vpop.eup %5038 }
 0x239   : > { %v2706_v60 = vmul.f32 %v5039_v47, %v2533_v19  ;;  %v2806_v18 = vmul.f32 %v9040_v59, %v2612_v0 }
 0x23b   : > { %v2740_v43 = vmul.f32 %v5707_v63, %v2706_v60 }
 0x23d   : > { %v2772_v34 = vadd.f32 %v2740_v43, %v2643_v31 }
 0x23e   : > { %v5041_v21 = vpop.eup %5040 }
 0x23f   : > { %v2837_v53 = vadd.f32 %v2805_v56, %v2772_v34  ;;  %v2708_v20 = vmul.f32 %v5041_v21, %v2534_v2 }
 0x241   : > { %2870 = vst.msk [vmem:[#allocation2 + $0xf0] sm:$0xff] %vm2839_vm15, %v2837_v53  ;;  %v2741_v4 = vmul.f32 %v5707_v63, %v2708_v20 }
 0x243   : > { %v2773_v9 = vadd.f32 %v2741_v4, %v2644_v38 }
 0x245   : > { %v2838_v24 = vadd.f32 %v2806_v18, %v2773_v9 }
 0x247   : > { %2871 = vst.msk [vmem:[#allocation2 + $0xf8] sm:$0xff] %vm2839_vm15, %v2838_v24 }
 0x248 PF: > { %p2872_p11 = scmp.ne.f32.partialorder %s5384_s15, 0.0 }
 0x249   : > { %v9084_v5 = vld [vmem:[#allocation17_spill] sm:$0xff] (%p2872_p11)  ;;  %v9085_v36 = vld [vmem:[#allocation18_spill] sm:$0xff] (%p2872_p11)  ;;  %v9087_v54 = vld [vmem:[#allocation15_spill] sm:$0xff] (%p2872_p11)  ;;  %vm3273_vm9 = vcmask (%p2872_p11), 1046528   ;;  %s5173_s16 = smov (%p2872_p11), 64   ;;  %vm2966_vm10 = vcmask (%p2872_p11), 261120  }
 0x24a   : > { %2875 = sbr.rel (!%p2872_p11) target bundleno = 1131 (0x46b), region = 44  ;;  %v2882_v62 = vmax.f32 (%p2872_p11), %v9084_v5, 0.0  ;;  %v2883_v32 = vmax.f32 (%p2872_p11), %v9085_v36, 0.0  ;;  %v9086_v61 = vld [vmem:[#allocation14_spill] sm:$0xff] (%p2872_p11)  ;;  %v2880_v44 = vmax.f32 (%p2872_p11), %v9087_v54, 0.0  ;;  %v9088_v63 = vld [vmem:[#allocation16_spill] sm:$0xff] (%p2872_p11) }
 0x24b   : > { %v2879_v7 = vmax.f32 (%p2872_p11), %v9086_v61, 0.0  ;;  %v2881_v48 = vmax.f32 (%p2872_p11), %v9088_v63, 0.0  ;;  %v9089_v59 = vld [vmem:[#allocation11_spill] sm:$0xff] (%p2872_p11)  ;;  %v9090_v46 = vld [vmem:[#allocation12_spill] sm:$0xff] (%p2872_p11)  ;;  %v9091_v30 = vld [vmem:[#allocation13_spill] sm:$0xff] (%p2872_p11)  ;;  %s5174_s25 = smov (%p2872_p11), 32  }
 0x24c   : > { %v2876_v26 = vmax.f32 (%p2872_p11), %v9089_v59, 0.0  ;;  %v2877_v11 = vmax.f32 (%p2872_p11), %v9090_v46, 0.0  ;;  %v5042_v1 = vld [vmem:[%s5281_s24 + $0x40] sm:$0xff] (%p2872_p11)   ;;  %v7922_v23 = vpack.c.bf16 (%p2872_p11), %v2883_v32, %v2882_v62  ;;  %v2878_v22 = vmax.f32 (%p2872_p11), %v9091_v30, 0.0  ;;  %v9092_v45 = vld [vmem:[#allocation48_spill] sm:$0xff] (%p2872_p11)  ;;  %v9093_v29 = vld [vmem:[#allocation49_spill] sm:$0xff] (%p2872_p11) }
 0x24d   : > { %v7924_v39 = vpack.c.bf16 (%p2872_p11), %v2880_v44, %v2879_v7  ;;  %v2915_v52 = vmax.f32 (%p2872_p11), %v9092_v45, 0.0  ;;  %v7928_v42 = vpack.c.bf16 (%p2872_p11), %v2881_v48, %v2881_v48  ;;  %v2916_v40 = vmax.f32 (%p2872_p11), %v9093_v29, 0.0  ;;  %v9094_v15 = vld [vmem:[#allocation50_spill] sm:$0xff] (%p2872_p11)  ;;  %4714 = vmatprep.subr.bf16.mxu0 (%p2872_p11), %v5042_v1  ;;  %4880 = vmatprep.subr.bf16.mxu1 (%p2872_p11), %v5042_v1  ;;  %v9095_v27 = vld [vmem:[#allocation19_spill] sm:$0xff] (%p2872_p11)  ;;  %v5044_v37 = vld [vmem:[%s5281_s24 + $0x48] sm:$0xff] (%p2872_p11)   ;;  %s5175_s30 = smov (%p2872_p11), 96  }
 0x24e   : > { %v7930_v25 = vpack.c.bf16 (%p2872_p11), %v2877_v11, %v2876_v26  ;;  %v2917_v14 = vmax.f32 (%p2872_p11), %v9094_v15, 0.0  ;;  %3566 = vrot.lane.b32.xlu1 (%p2872_p11), %v7922_v23, %s5173_s16  ;;  %v2931_v49 = vpack.c.bf16 (%p2872_p11), %v2878_v22, %v2878_v22  ;;  %v2884_v3 = vmax.f32 (%p2872_p11), %v9095_v27, 0.0  ;;  %v5043_v6 = vld [vmem:[%s5281_s24] sm:$0xff] (%p2872_p11)   ;;  %2969 = vst.msk [vmem:[#allocation3 + $0x30] sm:$0xff] (%p2872_p11), %vm2966_vm10, %v7922_v23  ;;  %v5045_v17 = vld [vmem:[%s5281_s24 + $0x8] sm:$0xff] (%p2872_p11)   ;;  %v5046_v60 = vld [vmem:[%s5281_s24 + $0x50] sm:$0xff] (%p2872_p11)  }
 0x24f   : > { %v3277_v51 = vrot.slane (%p2872_p11), %v7924_v39, 1  ;;  %v3278_v33 = vrot.slane (%p2872_p11), %v7928_v42, 1  ;;  %v7941_v41 = vpack.c.bf16 (%p2872_p11), %v2916_v40, %v2915_v52  ;;  %2968 = vst.msk [vmem:[#allocation3 + $0x18] sm:$0xff] (%p2872_p11), %vm2966_vm10, %v7924_v39  ;;  %vm2983_vm15 = vsmask.f32 (%p2872_p11), 7424  ;;  %4715 = vmatpush3.bf16.msra.mxu0 (%p2872_p11), %v5043_v6  ;;  %4888 = vmatpush3.bf16.msra.mxu1 (%p2872_p11), %v5043_v6  ;;  %v9096_v0 = vld [vmem:[#allocation45_spill] sm:$0xff] (%p2872_p11) }
 0x250   : > { %v3274_v28 = vrot.slane (%p2872_p11), %v7930_v25, 1  ;;  %v7943_v35 = vpack.c.bf16 (%p2872_p11), %v2917_v14, %v2917_v14  ;;  %2967 = vst.msk [vmem:[#allocation3] sm:$0xff] (%p2872_p11), %vm2966_vm10, %v7930_v25  ;;  %v3275_v19 = vrot.slane (%p2872_p11), %v2931_v49, 1  ;;  %v7953_v58 = vpack.c.bf16 (%p2872_p11), %v2884_v3, %v2884_v3  ;;  %4716 = vmatprep.subr.bf16.mxu0 (%p2872_p11), %v5044_v37  ;;  %4881 = vmatprep.subr.bf16.mxu1 (%p2872_p11), %v5044_v37  ;;  %v5047_v53 = vld [vmem:[%s5281_s24 + $0x10] sm:$0xff] (%p2872_p11)   ;;  %v9097_v4 = vld [vmem:[#allocation46_spill] sm:$0xff] (%p2872_p11)  ;;  %v9098_v9 = vld [vmem:[#allocation47_spill] sm:$0xff] (%p2872_p11) }
 0x251   : > { %v3009_v57 = vshrl.u32 %v7922_v23, 16  ;;  %v7957_v16 = vsel %vm3273_vm9, %v3277_v51, %v3278_v33  ;;  %v3313_v8 = vrot.slane %v7941_v41, 1  ;;  %2980 = vst.msk [vmem:[#allocation3 + $0x138] sm:$0xff] %vm2966_vm10, %v7941_v41  ;;  %v3011_v10 = vshll.u32 %v7922_v23, 16  ;;  %v9099_v36 = vld [vmem:[#allocation51_spill] sm:$0xff]  ;;  %v9100_v61 = vld [vmem:[#allocation52_spill] sm:$0xff] }
 0x252   : > { %v3314_v47 = vrot.slane %v7943_v35, 1  ;;  %3501 = vrot.lane.b32.xlu0 %v7957_v16, %s5174_s25  ;;  %v3276_v55 = vsel %vm3273_vm9, %v3274_v28, %v3275_v19  ;;  %v3016_v31 = vshll.u32 %v7953_v58, 16  ;;  %v2985_v50 = vshrl.u32 %v7930_v25, 16  ;;  %v5048_v54 = vld [vmem:[%s5281_s24 + $0x58] sm:$0xff]   ;;  %v9101_v59 = vld [vmem:[#allocation53_spill] sm:$0xff]  ;;  %v5051_v28 = vld [vmem:[%s5281_s24 + $0x20] sm:$0xff]  }
 0x253   : > { %v2987_v43 = vshll.u32 %v7930_v25, 16  ;;  %3322 = vrot.lane.b32.xlu1 %v3276_v55, %s5173_s16  ;;  %v3013_v2 = vrot.slane %v3011_v10, 1  ;;  %v2992_v34 = vshll.u32 %v2931_v49, 16  ;;  %v2912_v21 = vmax.f32 %v9096_v0, 0.0  ;;  %4717 = vmatpush3.bf16.msra.mxu0 %v5045_v17  ;;  %v5049_v29 = vld [vmem:[%s5281_s24 + $0x18] sm:$0xff]   ;;  %v5050_v49 = vld [vmem:[%s5281_s24 + $0x60] sm:$0xff]  }
 0x254   : > { %v7973_v56 = vsel %vm3273_vm9, %v3313_v8, %v3314_v47  ;;  %v3018_v20 = vrot.slane %v3016_v31, 1  ;;  %v2913_v18 = vmax.f32 %v9097_v4, 0.0  ;;  %v2914_v24 = vmax.f32 %v9098_v9, 0.0  ;;  %4889 = vmatpush3.bf16.msra.mxu1 %v5045_v17  ;;  %4718 = vmatprep.subr.bf16.mxu0 %v5046_v60  ;;  %v5052_v8 = vld [vmem:[%s5281_s24 + $0x68] sm:$0xff]  }
 0x255   : > { %3737 = vst.msk [vmem:[#allocation3 + $0x118] sm:$0xff] %vm2966_vm10, %v7973_v56  ;;  %v2989_v38 = vrot.slane %v2987_v43, 1  ;;  %v3014_v5 = vor.u32 %v3013_v2, %v3009_v57  ;;  %v2994_v62 = vrot.slane %v2992_v34, 1  ;;  %v2918_v32 = vmax.f32 %v9099_v36, 0.0  ;;  %4882 = vmatprep.subr.bf16.mxu1 %v5046_v60  ;;  %v9102_v43 = vld [vmem:[#allocation20_spill] sm:$0xff] }
 0x256   : > { %v2919_v7 = vmax.f32 %v9100_v61, 0.0  ;;  %3525 = vrot.lane.b32.xlu0 %v7973_v56, %s5174_s25  ;;  %v7986_v63 = vpack.c.bf16 %v2913_v18, %v2912_v21  ;;  %v2955_v48 = vpack.c.bf16 %v2914_v24, %v2914_v24  ;;  %v2920_v26 = vmax.f32 %v9101_v59, 0.0 }
 0x257   : > { %v2990_v44 = vor.u32 %v2989_v38, %v2985_v50  ;;  %v7990_v46 = vsel %vm2983_vm15, %v3014_v5, %v3018_v20  ;;  %v2997_v1 = vshrl.u32 %v7924_v39, 16  ;;  %v2999_v30 = vshll.u32 %v7924_v39, 16  ;;  %4719 = vmatpush3.bf16.msra.mxu0 %v5047_v53  ;;  %v5053_v5 = vld [vmem:[%s5281_s24 + $0x28] sm:$0xff]  }
 0x258   : > { %v7992_v11 = vpack.c.bf16 %v2919_v7, %v2918_v32  ;;  %3642 = vrot.lane.b32.xlu1 %v7990_v46, %s5175_s30  ;;  %3482 = vst.msk [vmem:[#allocation3 + $0x20] sm:$0xff] %vm2966_vm10, %v7990_v46  ;;  %v3129_v45 = vshrl.u32 %v7986_v63, 16  ;;  %v3131_v52 = vshll.u32 %v7986_v63, 16  ;;  %v3136_v25 = vshll.u32 %v2955_v48, 16  ;;  %2979 = vst.msk [vmem:[#allocation3 + $0x120] sm:$0xff] %vm2966_vm10, %v7986_v63  ;;  %4720 = vmatprep.subr.bf16.mxu0 %v5048_v54  ;;  %v5054_v7 = vld [vmem:[%s5281_s24 + $0x70] sm:$0xff]  }
 0x259   : > { %v2995_v22 = vsel %vm2983_vm15, %v2990_v44, %v2994_v62  ;;  %v3310_v40 = vrot.slane %v7986_v63, 1  ;;  %v3311_v15 = vrot.slane %v2955_v48, 1  ;;  %v2959_v14 = vpack.c.bf16 %v2920_v26, %v2920_v26  ;;  %4890 = vmatpush3.bf16.msra.mxu1 %v5047_v53  ;;  %v9104_v48 = vld [vmem:[#allocation54_spill] sm:$0xff]  ;;  %v9105_v26 = vld [vmem:[#allocation55_spill] sm:$0xff] }
 0x25a   : > { %2981 = vst.msk [vmem:[#allocation3 + $0x150] sm:$0xff] %vm2966_vm10, %v7992_v11  ;;  %v3153_v51 = vshrl.u32 %v7992_v11, 16  ;;  %3176 = vrot.lane.b32.xlu0 %v2995_v22, %s5174_s25  ;;  %v3133_v27 = vrot.slane %v3131_v52, 1  ;;  %v3138_v3 = vrot.slane %v3136_v25, 1  ;;  %v3155_v6 = vshll.u32 %v7992_v11, 16  ;;  %4883 = vmatprep.subr.bf16.mxu1 %v5048_v54 }
 0x25b   : > { %v3001_v33 = vrot.slane %v2999_v30, 1  ;;  %v8015_v37 = vsel %vm3273_vm9, %v3310_v40, %v3311_v15  ;;  %v3160_v17 = vshll.u32 %v2959_v14, 16  ;;  %v3004_v19 = vshll.u32 %v7928_v42, 16  ;;  %4721 = vmatpush3.bf16.msra.mxu0 %v5049_v29  ;;  %v9103_v42 = vld [vmem:[#allocation21_spill] sm:$0xff] }
 0x25c   : > { %v3280_v57 = vrot.slane %v7922_v23, 1  ;;  %3388 = vrot.lane.b32.xlu1 %v7924_v39, %s5175_s30  ;;  %v3134_v47 = vor.u32 %v3133_v27, %v3129_v45  ;;  %3736 = vst.msk [vmem:[#allocation3 + $0x100] sm:$0xff] %vm2966_vm10, %v8015_v37  ;;  %v3157_v10 = vrot.slane %v3155_v6, 1  ;;  %v3281_v55 = vrot.slane %v7953_v58, 1  ;;  %4722 = vmatprep.subr.bf16.mxu0 %v5050_v49  ;;  %v5055_v30 = vld [vmem:[%s5281_s24 + $0x30] sm:$0xff]   ;;  %v9106_v45 = vld [vmem:[#allocation56_spill] sm:$0xff] }
 0x25d   : > { %v3002_v60 = vor.u32 %v3001_v33, %v2997_v1  ;;  %v3162_v31 = vrot.slane %v3160_v17, 1  ;;  %v3006_v50 = vrot.slane %v3004_v19, 1  ;;  %v2885_v2 = vmax.f32 %v9102_v43, 0.0  ;;  %4891 = vmatpush3.bf16.msra.mxu1 %v5049_v29  ;;  %v5056_v29 = vld [vmem:[%s5281_s24 + $0x78] sm:$0xff]   ;;  %v9109_v43 = vld [vmem:[#allocation57_spill] sm:$0xff] }
 0x25e   : > { %v2886_v34 = vmax.f32 %v9103_v42, 0.0  ;;  %v8028_v0 = vsel %vm2983_vm15, %v3134_v47, %v3138_v3  ;;  %v3158_v39 = vor.u32 %v3157_v10, %v3153_v51  ;;  %v8031_v21 = vsel %vm3273_vm9, %v3280_v57, %v3281_v55  ;;  %4884 = vmatprep.subr.bf16.mxu1 %v5050_v49  ;;  %v9107_v6 = vld [vmem:[#allocation22_spill] sm:$0xff]  ;;  %v9108_v10 = vld [vmem:[#allocation23_spill] sm:$0xff] }
 0x25f   : > { %v2887_v53 = vmax.f32 %v5358_v12, 0.0  ;;  %3200 = vrot.lane.b32.xlu0 %v8028_v0, %s5174_s25  ;;  %3492 = vst.msk [vmem:[#allocation3 + $0x110] sm:$0xff] %vm2966_vm10, %v8028_v0  ;;  %v3007_v58 = vsel %vm2983_vm15, %v3002_v60, %v3006_v50  ;;  %3726 = vst.msk [vmem:[#allocation3 + $0x10] sm:$0xff] %vm2966_vm10, %v8031_v21  ;;  %v3316_v38 = vrot.slane %v7992_v11, 1  ;;  %v3317_v4 = vrot.slane %v2959_v14, 1  ;;  %4723 = vmatpush3.bf16.msra.mxu0 %v5051_v28  ;;  %v5057_v42 = vld [vmem:[%s5281_s24 + $0x38] sm:$0xff]  }
 0x260   : > { %v8041_v20 = vpack.c.bf16 %v2886_v34, %v2885_v2  ;;  %3346 = vrot.lane.b32.xlu1 %v8015_v37, %s5173_s16  ;;  %v8047_v12 = vsel %vm2983_vm15, %v3158_v39, %v3162_v31  ;;  %3481 = vst.msk [vmem:[#allocation3 + $0x8] sm:$0xff] %vm2966_vm10, %v3007_v58  ;;  %v3141_v9 = vshrl.u32 %v7941_v41, 16  ;;  %v3143_v24 = vshll.u32 %v7941_v41, 16  ;;  %4724 = vmatprep.subr.bf16.mxu0 %v5052_v8 }
 0x261   : > { %v2937_v18 = vpack.c.bf16 %v2887_v53, %v2887_v53  ;;  %3494 = vst.msk [vmem:[#allocation3 + $0x140] sm:$0xff] %vm2966_vm10, %v8047_v12  ;;  %v8060_v32 = vsel %vm3273_vm9, %v3316_v38, %v3317_v4  ;;  %v3148_v61 = vshll.u32 %v7943_v35, 16  ;;  %4892 = vmatpush3.bf16.msra.mxu1 %v5051_v28  ;;  %v2921_v59 = vmax.f32 %v9104_v48, 0.0 }
 0x262   : > { %2970 = vst.msk [vmem:[#allocation3 + $0x48] sm:$0xff] %vm2966_vm10, %v8041_v20  ;;  %v3021_v62 = vshrl.u32 %v8041_v20, 16  ;;  %v3023_v36 = vshll.u32 %v8041_v20, 16  ;;  %3738 = vst.msk [vmem:[#allocation3 + $0x130] sm:$0xff] %vm2966_vm10, %v8060_v32  ;;  %v3145_v44 = vrot.slane %v3143_v24, 1  ;;  %v2922_v1 = vmax.f32 %v9105_v26, 0.0  ;;  %4885 = vmatprep.subr.bf16.mxu1 %v5052_v8 }
 0x263   : > { %v3028_v54 = vshll.u32 %v2937_v18, 16  ;;  %3590 = vrot.lane.b32.xlu0 %v7992_v11, %s5173_s16  ;;  %v3150_v35 = vrot.slane %v3148_v61, 1  ;;  %v2923_v52 = vmax.f32 %v9106_v45, 0.0  ;;  %v3283_v25 = vrot.slane %v8041_v20, 1  ;;  %4725 = vmatpush3.bf16.msra.mxu0 %v5053_v5  ;;  %v9111_v24 = vld [vmem:[#allocation59_spill] sm:$0xff] }
 0x264   : > { %v3025_v22 = vrot.slane %v3023_v36, 1  ;;  %3412 = vrot.lane.b32.xlu1 %v7941_v41, %s5175_s30  ;;  %v3146_v15 = vor.u32 %v3145_v44, %v3141_v9  ;;  %v8076_v14 = vpack.c.bf16 %v2922_v1, %v2921_v59  ;;  %v3284_v51 = vrot.slane %v2937_v18, 1  ;;  %4726 = vmatprep.subr.bf16.mxu0 %v5054_v7  ;;  %v9110_v18 = vld [vmem:[#allocation58_spill] sm:$0xff]  ;;  %v9112_v59 = vld [vmem:[#allocation24_spill] sm:$0xff] }
 0x265   : > { %v3030_v40 = vrot.slane %v3028_v54, 1  ;;  %v2961_v27 = vpack.c.bf16 %v2923_v52, %v2923_v52  ;;  %v2888_v3 = vmax.f32 %v5365_v13, 0.0  ;;  %v2889_v33 = vmax.f32 %v9107_v6, 0.0  ;;  %4893 = vmatpush3.bf16.msra.mxu1 %v5053_v5 }
 0x266   : > { %v3026_v49 = vor.u32 %v3025_v22, %v3021_v62  ;;  %v8081_v28 = vsel %vm2983_vm15, %v3146_v15, %v3150_v35  ;;  %2982 = vst.msk [vmem:[#allocation3 + $0x168] sm:$0xff] %vm2966_vm10, %v8076_v14  ;;  %v3165_v17 = vshrl.u32 %v8076_v14, 16  ;;  %v3167_v19 = vshll.u32 %v8076_v14, 16  ;;  %4886 = vmatprep.subr.bf16.mxu1 %v5054_v7  ;;  %v9113_v35 = vld [vmem:[#allocation25_spill] sm:$0xff] }
 0x267   : > { %v8088_v57 = vsel %vm3273_vm9, %v3283_v25, %v3284_v51  ;;  %3666 = vrot.lane.b32.xlu0 %v8047_v12, %s5175_s30  ;;  %3493 = vst.msk [vmem:[#allocation3 + $0x128] sm:$0xff] %vm2966_vm10, %v8081_v28  ;;  %v3172_v8 = vshll.u32 %v2961_v27, 16  ;;  %v8099_v47 = vpack.c.bf16 %v2889_v33, %v2888_v3  ;;  %v2890_v60 = vmax.f32 %v9108_v10, 0.0  ;;  %4727 = vmatpush3.bf16.msra.mxu0 %v5055_v30 }
 0x268   : > { %v8093_v13 = vsel %vm2983_vm15, %v3026_v49, %v3030_v40  ;;  %3727 = vst.msk [vmem:[#allocation3 + $0x28] sm:$0xff] %vm2966_vm10, %v8088_v57  ;;  %3178 = vrot.lane.b32.xlu1 %v3007_v58, %s5174_s25  ;;  %v3169_v55 = vrot.slane %v3167_v19, 1  ;;  %v3319_v31 = vrot.slane %v8076_v14, 1  ;;  %v3320_v50 = vrot.slane %v2961_v27, 1  ;;  %4728 = vmatprep.subr.bf16.mxu0 %v5056_v29 }
 0x269   : > { %3483 = vst.msk [vmem:[#allocation3 + $0x38] sm:$0xff] %vm2966_vm10, %v8093_v13  ;;  %v2924_v2 = vmax.f32 %v9109_v43, 0.0  ;;  %v3174_v34 = vrot.slane %v3172_v8, 1  ;;  %2971 = vst.msk [vmem:[#allocation3 + $0x60] sm:$0xff] %vm2966_vm10, %v8099_v47  ;;  %v2939_v39 = vpack.c.bf16 %v2890_v60, %v2890_v60  ;;  %v3033_v53 = vshrl.u32 %v8099_v47, 16  ;;  %4894 = vmatpush3.bf16.msra.mxu1 %v5055_v30 }
 0x26a   : > { %v3035_v58 = vshll.u32 %v8099_v47, 16  ;;  %v3170_v38 = vor.u32 %v3169_v55, %v3165_v17  ;;  %v8113_v4 = vsel %vm3273_vm9, %v3319_v31, %v3320_v50  ;;  %v2925_v9 = vmax.f32 %v9110_v18, 0.0  ;;  %4887 = vmatprep.subr.bf16.mxu1 %v5056_v29  ;;  %v9114_v29 = vld [vmem:[#allocation26_spill] sm:$0xff]  ;;  %v9115_v17 = vld [vmem:[#allocation60_spill] sm:$0xff]  ;;  %v9116_v55 = vld [vmem:[#allocation61_spill] sm:$0xff] }
 0x26b   : > { %v2926_v5 = vmax.f32 %v9111_v24, 0.0  ;;  %3503 = vrot.lane.b32.xlu0 %v8031_v21, %s5174_s25  ;;  %v3040_v36 = vshll.u32 %v2939_v39, 16  ;;  %3739 = vst.msk [vmem:[#allocation3 + $0x148] sm:$0xff] %vm2966_vm10, %v8113_v4  ;;  %v3286_v61 = vrot.slane %v8099_v47, 1  ;;  %v3287_v7 = vrot.slane %v2939_v39, 1  ;;  %4729 = vmatpush3.bf16.msra.mxu0 %v5057_v42 }
 0x26c   : > { %v3037_v62 = vrot.slane %v3035_v58, 1  ;;  %3324 = vrot.lane.b32.xlu1 %v7957_v16, %s5173_s16  ;;  %v8125_v54 = vsel %vm2983_vm15, %v3170_v38, %v3174_v34  ;;  %v8127_v44 = vpack.c.bf16 %v2925_v9, %v2924_v2  ;;  %v2891_v26 = vmax.f32 %v9112_v59, 0.0  ;;  %v9117_v2 = vld [vmem:[#allocation62_spill] sm:$0xff]  ;;  %v9118_v38 = vld [vmem:[#allocation27_spill] sm:$0xff] }
 0x26d   : > { %v2963_v48 = vpack.c.bf16 %v2926_v5, %v2926_v5  ;;  %3495 = vst.msk [vmem:[#allocation3 + $0x158] sm:$0xff] %vm2966_vm10, %v8125_v54  ;;  %v3042_v30 = vrot.slane %v3040_v36, 1  ;;  %v8133_v22 = vsel %vm3273_vm9, %v3286_v61, %v3287_v7  ;;  %v2892_v45 = vmax.f32 %v9113_v35, 0.0  ;;  %4895 = vmatpush3.bf16.msra.mxu1 %v5057_v42  ;;  %v9121_v35 = vld [vmem:[#allocation30_spill] sm:$0xff] }
 0x26e   : > { %v3038_v1 = vor.u32 %v3037_v62, %v3033_v53  ;;  %v3454_v16 = vshrl.u32 %v8127_v44, 16  ;;  %v3456_v52 = vshll.u32 %v8127_v44, 16  ;;  %3728 = vst.msk [vmem:[#allocation3 + $0x40] sm:$0xff] %vm2966_vm10, %v8133_v22  ;;  %v2893_v40 = vmax.f32 %v9114_v29, 0.0  ;;  %v9119_v62 = vld [vmem:[#allocation28_spill] sm:$0xff] }
 0x26f   : > { %v3461_v25 = vshll.u32 %v2963_v48, 16  ;;  %3568 = vrot.lane.b32.xlu0 %v8041_v20, %s5173_s16  ;;  %v8146_v51 = vpack.c.bf16 %v2892_v45, %v2891_v26  ;;  %v3498_v49 = vrot.slane %v8127_v44, 1  ;;  %v3499_v27 = vrot.slane %v2963_v48, 1 }
 0x270   : > { %v8144_v15 = vsel %vm2983_vm15, %v3038_v1, %v3042_v30  ;;  %3644 = vrot.lane.b32.xlu1 %v8093_v13, %s5175_s30  ;;  %v3458_v3 = vrot.slane %v3456_v52, 1  ;;  %v2941_v33 = vpack.c.bf16 %v2893_v40, %v2893_v40  ;;  %v2927_v19 = vmax.f32 %v9115_v17, 0.0  ;;  %v9120_v1 = vld [vmem:[#allocation29_spill] sm:$0xff] }
 0x271   : > { %3484 = vst.msk [vmem:[#allocation3 + $0x50] sm:$0xff] %vm2966_vm10, %v8144_v15  ;;  %v3463_v6 = vrot.slane %v3461_v25, 1  ;;  %2972 = vst.msk [vmem:[#allocation3 + $0x78] sm:$0xff] %vm2966_vm10, %v8146_v51  ;;  %v3045_v8 = vshrl.u32 %v8146_v51, 16  ;;  %v3047_v10 = vshll.u32 %v8146_v51, 16  ;;  %v8159_v60 = vsel %vm3273_vm9, %v3498_v49, %v3499_v27  ;;  %v9122_v49 = vld [vmem:[#allocation31_spill] sm:$0xff] }
 0x272   : > { %v2928_v31 = vmax.f32 %v9116_v55, 0.0  ;;  %v3459_v50 = vor.u32 %v3458_v3, %v3454_v16  ;;  %v3052_v43 = vshll.u32 %v2941_v33, 16  ;;  %3740 = vst.msk [vmem:[#allocation3 + $0x160] sm:$0xff] %vm2966_vm10, %v8159_v60  ;;  %v2929_v42 = vmax.f32 %v9117_v2, 0.0  ;;  %v9123_v3 = vld [vmem:[#allocation32_spill] sm:$0xff]  ;;  %v9124_v55 = vld [vmem:[#allocation33_spill] sm:$0xff] }
 0x273   : > { %v3289_v34 = vrot.slane %v8146_v51, 1  ;;  %3527 = vrot.lane.b32.xlu0 %v8060_v32, %s5174_s25  ;;  %v3049_v39 = vrot.slane %v3047_v10, 1  ;;  %v3290_v58 = vrot.slane %v2941_v33, 1  ;;  %v2894_v18 = vmax.f32 %v9118_v38, 0.0 }
 0x274   : > { %v8168_v53 = vpack.c.bf16 %v2928_v31, %v2927_v19  ;;  %3390 = vrot.lane.b32.xlu1 %v7922_v23, %s5175_s30  ;;  %v8174_v9 = vsel %vm2983_vm15, %v3459_v50, %v3463_v6  ;;  %v3054_v24 = vrot.slane %v3052_v43, 1  ;;  %v8176_v5 = vpack.c.bf16 %v2929_v42, %v2929_v42 }
 0x275   : > { %v2895_v36 = vmax.f32 %v9119_v62, 0.0  ;;  %3496 = vst.msk [vmem:[#allocation3 + $0x170] sm:$0xff] %vm2966_vm10, %v8174_v9  ;;  %v3050_v61 = vor.u32 %v3049_v39, %v3045_v8  ;;  %v8184_v59 = vsel %vm3273_vm9, %v3289_v34, %v3290_v58  ;;  %v2896_v30 = vmax.f32 %v9120_v1, 0.0  ;;  %v9125_v58 = vld [vmem:[#allocation34_spill] sm:$0xff]  ;;  %v9126_v62 = vld [vmem:[#allocation35_spill] sm:$0xff] }
 0x276   : > { %v3707_v7 = vrot.slane %v8168_v53, 1  ;;  %v3708_v48 = vrot.slane %v8176_v5, 1  ;;  %3729 = vst.msk [vmem:[#allocation3 + $0x58] sm:$0xff] %vm2966_vm10, %v8184_v59  ;;  %v2897_v45 = vmax.f32 %v9121_v35, 0.0  ;;  %v2898_v27 = vmax.f32 %v9122_v49, 0.0  ;;  %v9128_v35 = vld [vmem:[#allocation37_spill] sm:$0xff] }
 0x277   : > { %v8186_v23 = vpack.c.bf16 %v2895_v36, %v2894_v18  ;;  %3202 = vrot.lane.b32.xlu0 %v8081_v28, %s5174_s25  ;;  %v8191_v26 = vsel %vm2983_vm15, %v3050_v61, %v3054_v24  ;;  %v2943_v29 = vpack.c.bf16 %v2896_v30, %v2896_v30  ;;  %v2899_v6 = vmax.f32 %v9123_v3, 0.0  ;;  %v9127_v61 = vld [vmem:[#allocation36_spill] sm:$0xff] }
 0x278   : > { %3348 = vrot.lane.b32.xlu1 %v7973_v56, %s5173_s16  ;;  %3485 = vst.msk [vmem:[#allocation3 + $0x68] sm:$0xff] %vm2966_vm10, %v8191_v26  ;;  %v3709_v16 = vsel %vm3273_vm9, %v3707_v7, %v3708_v48  ;;  %v8212_v19 = vpack.c.bf16 %v2898_v27, %v2897_v45  ;;  %v2900_v31 = vmax.f32 %v9124_v55, 0.0  ;;  %v2901_v38 = vmax.f32 %v9125_v58, 0.0  ;;  %v9131_v58 = vld [vmem:[#allocation40_spill] sm:$0xff] }
 0x279   : > { %2973 = vst.msk [vmem:[#allocation3 + $0x90] sm:$0xff] %vm2966_vm10, %v8186_v23  ;;  %v3057_v52 = vshrl.u32 %v8186_v23, 16  ;;  %v3059_v25 = vshll.u32 %v8186_v23, 16  ;;  %3741 = vst.msk [vmem:[#allocation3 + $0x178] sm:$0xff] %vm2966_vm10, %v3709_v16  ;;  %v3292_v40 = vrot.slane %v8186_v23, 1  ;;  %v3064_v33 = vshll.u32 %v2943_v29, 16 }
 0x27a   : > { %v3293_v17 = vrot.slane %v2943_v29, 1  ;;  %v2945_v10 = vpack.c.bf16 %v2899_v6, %v2899_v6  ;;  %2974 = vst.msk [vmem:[#allocation3 + $0xa8] sm:$0xff] %vm2966_vm10, %v8212_v19  ;;  %v3069_v2 = vshrl.u32 %v8212_v19, 16  ;;  %v3071_v42 = vshll.u32 %v8212_v19, 16 }
 0x27b   : > { %v3061_v56 = vrot.slane %v3059_v25, 1  ;;  %3592 = vrot.lane.b32.xlu0 %v8076_v14, %s5173_s16  ;;  %v3066_v50 = vrot.slane %v3064_v33, 1  ;;  %v2902_v36 = vmax.f32 %v9126_v62, 0.0  ;;  %v2903_v7 = vmax.f32 %v9127_v61, 0.0  ;;  %v9129_v25 = vld [vmem:[#allocation38_spill] sm:$0xff] }
 0x27c   : > { %3414 = vrot.lane.b32.xlu1 %v7992_v11, %s5175_s30  ;;  %v8218_v43 = vsel %vm3273_vm9, %v3292_v40, %v3293_v17  ;;  %v3076_v34 = vshll.u32 %v2945_v10, 16  ;;  %v3295_v11 = vrot.slane %v8212_v19, 1  ;;  %v3296_v39 = vrot.slane %v2945_v10, 1  ;;  %v9130_v40 = vld [vmem:[#allocation39_spill] sm:$0xff] }
 0x27d   : > { %v3062_v8 = vor.u32 %v3061_v56, %v3057_v52  ;;  %3730 = vst.msk [vmem:[#allocation3 + $0x70] sm:$0xff] %vm2966_vm10, %v8218_v43  ;;  %v3073_v24 = vrot.slane %v3071_v42, 1  ;;  %v8242_v30 = vpack.c.bf16 %v2901_v38, %v2900_v31  ;;  %v2904_v45 = vmax.f32 %v9128_v35, 0.0  ;;  %v9134_v35 = vld [vmem:[#allocation43_spill] sm:$0xff] }
 0x27e   : > { %v3078_v48 = vrot.slane %v3076_v34, 1  ;;  %v8240_v1 = vsel %vm3273_vm9, %v3295_v11, %v3296_v39  ;;  %v2947_v52 = vpack.c.bf16 %v2902_v36, %v2902_v36  ;;  %v2905_v29 = vmax.f32 %v9129_v25, 0.0 }
 0x27f   : > { %3668 = vrot.lane.b32.xlu0 %v8125_v54, %s5175_s30  ;;  %v8231_v18 = vsel %vm2983_vm15, %v3062_v8, %v3066_v50  ;;  %v3074_v16 = vor.u32 %v3073_v24, %v3069_v2  ;;  %3731 = vst.msk [vmem:[#allocation3 + $0x88] sm:$0xff] %vm2966_vm10, %v8240_v1  ;;  %2975 = vst.msk [vmem:[#allocation3 + $0xc0] sm:$0xff] %vm2966_vm10, %v8242_v30  ;;  %v3081_v49 = vshrl.u32 %v8242_v30, 16  ;;  %v3083_v27 = vshll.u32 %v8242_v30, 16  ;;  %v9132_v24 = vld [vmem:[#allocation41_spill] sm:$0xff] }
 0x280   : > { %3180 = vrot.lane.b32.xlu1 %v7990_v46, %s5174_s25  ;;  %3486 = vst.msk [vmem:[#allocation3 + $0x80] sm:$0xff] %vm2966_vm10, %v8231_v18  ;;  %v2906_v46 = vmax.f32 %v9130_v40, 0.0  ;;  %v3298_v56 = vrot.slane %v8242_v30, 1  ;;  %v8254_v3 = vpack.c.bf16 %v2904_v45, %v2903_v7  ;;  %v3088_v33 = vshll.u32 %v2947_v52, 16  ;;  %v9133_v7 = vld [vmem:[#allocation42_spill] sm:$0xff] }
 0x281   : > { %v8259_v6 = vsel %vm2983_vm15, %v3074_v16, %v3078_v48  ;;  %v3299_v17 = vrot.slane %v2947_v52, 1  ;;  %v2949_v8 = vpack.c.bf16 %v2905_v29, %v2905_v29  ;;  %v3085_v10 = vrot.slane %v3083_v27, 1 }
 0x282   : > { %3487 = vst.msk [vmem:[#allocation3 + $0x98] sm:$0xff] %vm2966_vm10, %v8259_v6  ;;  %2976 = vst.msk [vmem:[#allocation3 + $0xd8] sm:$0xff] %vm2966_vm10, %v8254_v3  ;;  %v3093_v55 = vshrl.u32 %v8254_v3, 16  ;;  %v3095_v31 = vshll.u32 %v8254_v3, 16  ;;  %v3301_v50 = vrot.slane %v8254_v3, 1  ;;  %v3090_v2 = vrot.slane %v3088_v33, 1 }
 0x283   : > { %3505 = vrot.lane.b32.xlu0 %v8088_v57, %s5174_s25  ;;  %v8271_v42 = vsel %vm3273_vm9, %v3298_v56, %v3299_v17  ;;  %v3100_v34 = vshll.u32 %v2949_v8, 16  ;;  %v3302_v11 = vrot.slane %v2949_v8, 1  ;;  %v2907_v38 = vmax.f32 %v9131_v58, 0.0 }
 0x284   : > { %3326 = vrot.lane.b32.xlu1 %v8031_v21, %s5173_s16  ;;  %v3086_v21 = vor.u32 %v3085_v10, %v3081_v49  ;;  %3732 = vst.msk [vmem:[#allocation3 + $0xa0] sm:$0xff] %vm2966_vm10, %v8271_v42  ;;  %v3097_v39 = vrot.slane %v3095_v31, 1  ;;  %v2908_v62 = vmax.f32 %v9132_v24, 0.0  ;;  %v2909_v48 = vmax.f32 %v9133_v7, 0.0  ;;  %v9135_v49 = vld [vmem:[#allocation44_spill] sm:$0xff] }
 0x285   : > { %v3102_v36 = vrot.slane %v3100_v34, 1  ;;  %v8280_v61 = vsel %vm3273_vm9, %v3301_v50, %v3302_v11  ;;  %v2910_v45 = vmax.f32 %v9134_v35, 0.0  ;;  %v8291_v25 = vpack.c.bf16 %v2907_v38, %v2906_v46  ;;  %v8369_v35 = vld [vmem:[%s5281_s24 + $0x80] sm:$0xff]  }
 0x286   : > { %v8287_v16 = vsel %vm2983_vm15, %v3086_v21, %v3090_v2  ;;  %v3098_v52 = vor.u32 %v3097_v39, %v3093_v55  ;;  %3733 = vst.msk [vmem:[#allocation3 + $0xb8] sm:$0xff] %vm2966_vm10, %v8280_v61  ;;  %v2951_v29 = vpack.c.bf16 %v2908_v62, %v2908_v62  ;;  %v2911_v27 = vmax.f32 %v9135_v49, 0.0  ;;  %4844 = vmatprep.subr.bf16.mxu1 %v8369_v35  ;;  %v5059_v49 = vld [vmem:[%s5281_s24 + $0x88] sm:$0xff]  }
 0x287   : > { %3570 = vrot.lane.b32.xlu0 %v8099_v47, %s5173_s16  ;;  %3488 = vst.msk [vmem:[#allocation3 + $0xb0] sm:$0xff] %vm2966_vm10, %v8287_v16  ;;  %v8295_v40 = vpack.c.bf16 %v2910_v45, %v2909_v48  ;;  %2977 = vst.msk [vmem:[#allocation3 + $0xf0] sm:$0xff] %vm2966_vm10, %v8291_v25  ;;  %v3105_v33 = vshrl.u32 %v8291_v25, 16  ;;  %v3107_v17 = vshll.u32 %v8291_v25, 16  ;;  %v3304_v8 = vrot.slane %v8291_v25, 1 }
 0x288   : > { %3646 = vrot.lane.b32.xlu1 %v8144_v15, %s5175_s30  ;;  %v8299_v56 = vsel %vm2983_vm15, %v3098_v52, %v3102_v36  ;;  %v3112_v46 = vshll.u32 %v2951_v29, 16  ;;  %v3305_v10 = vrot.slane %v2951_v29, 1  ;;  %v2953_v55 = vpack.c.bf16 %v2911_v27, %v2911_v27 }
 0x289   : > { %3489 = vst.msk [vmem:[#allocation3 + $0xc8] sm:$0xff] %vm2966_vm10, %v8299_v56  ;;  %2978 = vst.msk [vmem:[#allocation3 + $0x108] sm:$0xff] %vm2966_vm10, %v8295_v40  ;;  %v3117_v31 = vshrl.u32 %v8295_v40, 16  ;;  %v3109_v50 = vrot.slane %v3107_v17, 1  ;;  %v3119_v34 = vshll.u32 %v8295_v40, 16  ;;  %v3307_v11 = vrot.slane %v8295_v40, 1 }
 0x28a   : > { %v3114_v2 = vrot.slane %v3112_v46, 1  ;;  %v8318_v21 = vsel %vm3273_vm9, %v3304_v8, %v3305_v10  ;;  %v3124_v39 = vshll.u32 %v2953_v55, 16  ;;  %v3308_v58 = vrot.slane %v2953_v55, 1 }
 0x28b   : > { %3529 = vrot.lane.b32.xlu0 %v8113_v4, %s5174_s25  ;;  %v3110_v38 = vor.u32 %v3109_v50, %v3105_v33  ;;  %3734 = vst.msk [vmem:[#allocation3 + $0xd0] sm:$0xff] %vm2966_vm10, %v8318_v21  ;;  %v3121_v24 = vrot.slane %v3119_v34, 1  ;;  %vm3224_vm5 = vcmask 523520   ;;  %vm3370_vm6 = vcmask 785920  }
 0x28c   : > { %3392 = vrot.lane.b32.xlu1 %v8041_v20, %s5175_s30  ;;  %v3126_v20 = vrot.slane %v3124_v39, 1  ;;  %v8325_v62 = vsel %vm3273_vm9, %v3307_v11, %v3308_v58  ;;  %vm3436_vm7 = vcmask 1048320  }
 0x28d   : > { %v8330_v36 = vsel %vm2983_vm15, %v3110_v38, %v3114_v2  ;;  %v3122_v7 = vor.u32 %v3121_v24, %v3117_v31  ;;  %3735 = vst.msk [vmem:[#allocation3 + $0xe8] sm:$0xff] %vm2966_vm10, %v8325_v62 }
 0x28e   : > { %3490 = vst.msk [vmem:[#allocation3 + $0xe0] sm:$0xff] %vm2966_vm10, %v8330_v36 }
 0x28f   : > { %3204 = vrot.lane.b32.xlu0 %v8047_v12, %s5174_s25  ;;  %v8337_v48 = vsel %vm2983_vm15, %v3122_v7, %v3126_v20  ;;  %v3633_v12 = vshll.u32 %v8168_v53, 16 }
 0x290   : > { %3350 = vrot.lane.b32.xlu1 %v8060_v32, %s5173_s16  ;;  %3491 = vst.msk [vmem:[#allocation3 + $0xf8] sm:$0xff] %vm2966_vm10, %v8337_v48  ;;  %v3631_v32 = vshrl.u32 %v8168_v53, 16 }
 0x293   : > { %3594 = vrot.lane.b32.xlu0 %v8127_v44, %s5173_s16 }
 0x294   : > { %3416 = vrot.lane.b32.xlu1 %v8076_v14, %s5175_s30  ;;  %v3635_v14 = vrot.slane %v3633_v12, 1 }
 0x297   : > { %3670 = vrot.lane.b32.xlu0 %v8174_v9, %s5175_s30 }
 0x298   : > { %3182 = vrot.lane.b32.xlu1 %v8093_v13, %s5174_s25  ;;  %v3638_v13 = vshll.u32 %v8176_v5, 16 }
 0x29a   : > { %v3640_v9 = vrot.slane %v3638_v13, 1 }
 0x29b   : > { %3507 = vrot.lane.b32.xlu0 %v8133_v22, %s5174_s25 }
 0x29c   : > { %3328 = vrot.lane.b32.xlu1 %v8088_v57, %s5173_s16  ;;  %v3636_v57 = vor.u32 %v3635_v14, %v3631_v32 }
 0x29f   : > { %3572 = vrot.lane.b32.xlu0 %v8146_v51, %s5173_s16 }
 0x2a0   : > { %3648 = vrot.lane.b32.xlu1 %v8191_v26, %s5175_s30 }
 0x2a3   : > { %3531 = vrot.lane.b32.xlu0 %v8159_v60, %s5174_s25 }
 0x2a4   : > { %3394 = vrot.lane.b32.xlu1 %v8099_v47, %s5175_s30  ;;  %v3641_v47 = vsel %vm2983_vm15, %v3636_v57, %v3640_v9 }
 0x2a7   : > { %3206 = vrot.lane.b32.xlu0 %v8125_v54, %s5174_s25 }
 0x2a8   : > { %3352 = vrot.lane.b32.xlu1 %v8113_v4, %s5173_s16 }
 0x2ab   : > { %3596 = vrot.lane.b32.xlu0 %v8168_v53, %s5173_s16 }
 0x2ac   : > { %3418 = vrot.lane.b32.xlu1 %v8127_v44, %s5175_s30 }
 0x2af   : > { %3672 = vrot.lane.b32.xlu0 %v3641_v47, %s5175_s30 }
 0x2b0   : > { %3184 = vrot.lane.b32.xlu1 %v8144_v15, %s5174_s25 }
 0x2b3   : > { %3509 = vrot.lane.b32.xlu0 %v8184_v59, %s5174_s25 }
 0x2b4   : > { %3330 = vrot.lane.b32.xlu1 %v8133_v22, %s5173_s16 }
 0x2b7   : > { %3574 = vrot.lane.b32.xlu0 %v8186_v23, %s5173_s16 }
 0x2b8   : > { %3396 = vrot.lane.b32.xlu1 %v8146_v51, %s5175_s30 }
 0x2bb   : > { %3650 = vrot.lane.b32.xlu0 %v8231_v18, %s5175_s30 }
 0x2bc   : > { %3186 = vrot.lane.b32.xlu1 %v8191_v26, %s5174_s25 }
 0x2bf   : > { %3511 = vrot.lane.b32.xlu0 %v8218_v43, %s5174_s25 }
 0x2c0   : > { %v3567_v4 = vpop.permute.xlu1 %3566  ;;  %3332 = vrot.lane.b32.xlu1 %v8184_v59, %s5173_s16 }
 0x2c3   : > { %3576 = vrot.lane.b32.xlu0 %v8212_v19, %s5173_s16 }
 0x2c4   : > { %v3502_v54 = vpop.permute.xlu0 %3501  ;;  %3398 = vrot.lane.b32.xlu1 %v8186_v23, %s5175_s30 }
 0x2c5   : > { %3549 = vst.msk [vmem:[#allocation3 + $0x8] sm:$0xff] %vm3224_vm5, %v3502_v54  ;;  %v3323_v44 = vpop.permute.xlu1 %3322 }
 0x2c6   : > { %3614 = vst.msk [vmem:[#allocation3 + $0x8] sm:$0xff] %vm3370_vm6, %v3567_v4 }
 0x2c7   : > { %3652 = vrot.lane.b32.xlu0 %v8259_v6, %s5175_s30 }
 0x2c8   : > { %v3526_v22 = vpop.permute.xlu0 %3525  ;;  %3188 = vrot.lane.b32.xlu1 %v8231_v18, %s5174_s25 }
 0x2c9   : > { %3561 = vst.msk [vmem:[#allocation3 + $0x128] sm:$0xff] %vm3224_vm5, %v3526_v22 }
 0x2ca   : > { %v3643_v15 = vpop.permute.xlu1 %3642 }
 0x2cb   : > { %3690 = vst.msk [vmem:[#allocation3 + $0x8] sm:$0xff] %vm3436_vm7, %v3643_v15  ;;  %3513 = vrot.lane.b32.xlu0 %v8240_v1, %s5174_s25 }
 0x2cc   : > { %v3177_v51 = vpop.permute.xlu0 %3176  ;;  %3334 = vrot.lane.b32.xlu1 %v8218_v43, %s5173_s16 }
 0x2cd   : > { %3225 = vst.msk [vmem:[#allocation3] sm:$0xff] %vm3224_vm5, %v3177_v51  ;;  %v3744_v51 = vld [vmem:[#allocation3 + $0x10] sm:$0xff] }
 0x2ce   : > { %3371 = vst.msk [vmem:[#allocation3] sm:$0xff] %vm3370_vm6, %v3323_v44  ;;  %v3389_v60 = vpop.permute.xlu1 %3388 }
 0x2cf   : > { %3437 = vst.msk [vmem:[#allocation3] sm:$0xff] %vm3436_vm7, %v3389_v60  ;;  %3578 = vrot.lane.b32.xlu0 %v8242_v30, %s5173_s16 }
 0x2d0   : > { %3400 = vrot.lane.b32.xlu1 %v8212_v19, %s5175_s30 }
 0x2d1   : > { %v3201_v53 = vpop.permute.xlu0 %3200 }
 0x2d2   : > { %3237 = vst.msk [vmem:[#allocation3 + $0x120] sm:$0xff] %vm3224_vm5, %v3201_v53  ;;  %v3347_v5 = vpop.permute.xlu1 %3346  ;;  %v3743_v59 = vld [vmem:[#allocation3 + $0x8] sm:$0xff] }
 0x2d3   : > { %3383 = vst.msk [vmem:[#allocation3 + $0x120] sm:$0xff] %vm3370_vm6, %v3347_v5  ;;  %3654 = vrot.lane.b32.xlu0 %v8287_v16, %s5175_s30  ;;  %4014 = vmatprep.mubr.bf16.mxu0 %v3743_v59  ;;  %v3747_v59 = vld [vmem:[#allocation3 + $0x28] sm:$0xff] }
 0x2d4   : > { %3190 = vrot.lane.b32.xlu1 %v8259_v6, %s5174_s25 }
 0x2d5   : > { %v3591_v23 = vpop.permute.xlu0 %3590 }
 0x2d6   : > { %3626 = vst.msk [vmem:[#allocation3 + $0x128] sm:$0xff] %vm3370_vm6, %v3591_v23  ;;  %v3413_v26 = vpop.permute.xlu1 %3412  ;;  %v3742_v43 = vld [vmem:[#allocation3] sm:$0xff] }
 0x2d7   : > { %3449 = vst.msk [vmem:[#allocation3 + $0x120] sm:$0xff] %vm3436_vm7, %v3413_v26  ;;  %3515 = vrot.lane.b32.xlu0 %v8271_v42, %s5174_s25  ;;  %4015 = vmatmul.mubr.bf16.vlgmr.msra.gmra.mrb[0].mxu0 %v3742_v43  ;;  %v3750_v26 = vld [vmem:[#allocation3 + $0x40] sm:$0xff] }
 0x2d8   : > { %3336 = vrot.lane.b32.xlu1 %v8240_v1, %s5173_s16 }
 0x2d9   : > { %v3667_v19 = vpop.permute.xlu0 %3666 }
 0x2da   : > { %3702 = vst.msk [vmem:[#allocation3 + $0x128] sm:$0xff] %vm3436_vm7, %v3667_v19  ;;  %v3179_v18 = vpop.permute.xlu1 %3178 }
 0x2db   : > { %3226 = vst.msk [vmem:[#allocation3 + $0x18] sm:$0xff] %vm3224_vm5, %v3179_v18  ;;  %3580 = vrot.lane.b32.xlu0 %v8254_v3, %s5173_s16 }
 0x2dc   : > { %3402 = vrot.lane.b32.xlu1 %v8242_v30, %s5175_s30 }
 0x2dd   : > { %v3504_v6 = vpop.permute.xlu0 %3503 }
 0x2de   : > { %3550 = vst.msk [vmem:[#allocation3 + $0x20] sm:$0xff] %vm3224_vm5, %v3504_v6  ;;  %v3325_v45 = vpop.permute.xlu1 %3324  ;;  %v3778_v1 = vld [vmem:[#allocation3 + $0x120] sm:$0xff] }
 0x2df   : > { %3372 = vst.msk [vmem:[#allocation3 + $0x18] sm:$0xff] %vm3370_vm6, %v3325_v45  ;;  %3656 = vrot.lane.b32.xlu0 %v8299_v56, %s5175_s30 }
 0x2e0   : > { %3192 = vrot.lane.b32.xlu1 %v8287_v16, %s5174_s25 }
 0x2e1   : > { %v3569_v52 = vpop.permute.xlu0 %3568  ;;  %v3779_v29 = vld [vmem:[#allocation3 + $0x128] sm:$0xff] }
 0x2e2   : > { %3615 = vst.msk [vmem:[#allocation3 + $0x20] sm:$0xff] %vm3370_vm6, %v3569_v52  ;;  %4110 = vmatprep.mubr.bf16.mxu1 %v3779_v29  ;;  %v3645_v30 = vpop.permute.xlu1 %3644  ;;  %v3756_v29 = vld [vmem:[#allocation3 + $0x70] sm:$0xff] }
 0x2e3   : > { %3691 = vst.msk [vmem:[#allocation3 + $0x20] sm:$0xff] %vm3436_vm7, %v3645_v30  ;;  %3517 = vrot.lane.b32.xlu0 %v8280_v61, %s5174_s25  ;;  %4111 = vmatmul.mubr.bf16.vlgmr.msra.gmra.mrb[0].mxu1 %v3778_v1  ;;  %v3753_v1 = vld [vmem:[#allocation3 + $0x58] sm:$0xff] }
 0x2e4   : > { %3338 = vrot.lane.b32.xlu1 %v8271_v42, %s5173_s16  ;;  %4845 = vmatpush3.bf16.msra.mxu1 %v8369_v35 }
 0x2e5   : > { %v3528_v27 = vpop.permute.xlu0 %3527  ;;  %4846 = vmatprep.subr.bf16.mxu1 %v5059_v49 }
 0x2e6   : > { %3562 = vst.msk [vmem:[#allocation3 + $0x140] sm:$0xff] %vm3224_vm5, %v3528_v27  ;;  %v3391_v16 = vpop.permute.xlu1 %3390 }
 0x2e7   : > { %3438 = vst.msk [vmem:[#allocation3 + $0x18] sm:$0xff] %vm3436_vm7, %v3391_v16  ;;  %3582 = vrot.lane.b32.xlu0 %v8291_v25, %s5173_s16 }
 0x2e8   : > { %3404 = vrot.lane.b32.xlu1 %v8254_v3, %s5175_s30  ;;  %4847 = vmatpush3.bf16.msra.mxu1 %v5059_v49 }
 0x2e9   : > { %v3203_v33 = vpop.permute.xlu0 %3202 }
 0x2ea   : > { %3238 = vst.msk [vmem:[#allocation3 + $0x138] sm:$0xff] %vm3224_vm5, %v3203_v33  ;;  %v3349_v42 = vpop.permute.xlu1 %3348  ;;  %v3746_v17 = vld [vmem:[#allocation3 + $0x20] sm:$0xff]  ;;  %v3759_v33 = vld [vmem:[#allocation3 + $0x88] sm:$0xff] }
 0x2eb   : > { %3384 = vst.msk [vmem:[#allocation3 + $0x138] sm:$0xff] %vm3370_vm6, %v3349_v42  ;;  %3658 = vrot.lane.b32.xlu0 %v8330_v36, %s5175_s30  ;;  %4022 = vmatprep.mubr.bf16.mxu0 %v3746_v17 }
 0x2ec   : > { %3194 = vrot.lane.b32.xlu1 %v8299_v56, %s5174_s25 }
 0x2ed   : > { %v3593_v46 = vpop.permute.xlu0 %3592 }
 0x2ee   : > { %3627 = vst.msk [vmem:[#allocation3 + $0x140] sm:$0xff] %vm3370_vm6, %v3593_v46  ;;  %v3415_v8 = vpop.permute.xlu1 %3414  ;;  %v3745_v3 = vld [vmem:[#allocation3 + $0x18] sm:$0xff]  ;;  %v3762_v46 = vld [vmem:[#allocation3 + $0xa0] sm:$0xff] }
 0x2ef   : > { %3450 = vst.msk [vmem:[#allocation3 + $0x138] sm:$0xff] %vm3436_vm7, %v3415_v8  ;;  %3519 = vrot.lane.b32.xlu0 %v8318_v21, %s5174_s25  ;;  %4023 = vmatmul.mubr.bf16.gmra.mrb[4].mxu0 %v3745_v3 }
 0x2f0   : > { %3340 = vrot.lane.b32.xlu1 %v8280_v61, %s5173_s16 }
 0x2f1   : > { %v3669_v10 = vpop.permute.xlu0 %3668 }
 0x2f2   : > { %3703 = vst.msk [vmem:[#allocation3 + $0x140] sm:$0xff] %vm3436_vm7, %v3669_v10  ;;  %v3181_v55 = vpop.permute.xlu1 %3180 }
 0x2f3   : > { %3227 = vst.msk [vmem:[#allocation3 + $0x30] sm:$0xff] %vm3224_vm5, %v3181_v55  ;;  %3584 = vrot.lane.b32.xlu0 %v8295_v40, %s5173_s16  ;;  %v3765_v55 = vld [vmem:[#allocation3 + $0xb8] sm:$0xff] }
 0x2f4   : > { %3406 = vrot.lane.b32.xlu1 %v8291_v25, %s5175_s30 }
 0x2f5   : > { %v3506_v56 = vpop.permute.xlu0 %3505 }
 0x2f6   : > { %3551 = vst.msk [vmem:[#allocation3 + $0x38] sm:$0xff] %vm3224_vm5, %v3506_v56  ;;  %v3327_v31 = vpop.permute.xlu1 %3326  ;;  %v3781_v61 = vld [vmem:[#allocation3 + $0x138] sm:$0xff] }
 0x2f7   : > { %3373 = vst.msk [vmem:[#allocation3 + $0x30] sm:$0xff] %vm3370_vm6, %v3327_v31  ;;  %3660 = vrot.lane.b32.xlu0 %v8337_v48, %s5175_s30  ;;  %v3768_v31 = vld [vmem:[#allocation3 + $0xd0] sm:$0xff] }
 0x2f8   : > { %3196 = vrot.lane.b32.xlu1 %v8330_v36, %s5174_s25 }
 0x2f9   : > { %v3571_v50 = vpop.permute.xlu0 %3570  ;;  %v3782_v2 = vld [vmem:[#allocation3 + $0x140] sm:$0xff] }
 0x2fa   : > { %3616 = vst.msk [vmem:[#allocation3 + $0x38] sm:$0xff] %vm3370_vm6, %v3571_v50  ;;  %4118 = vmatprep.mubr.bf16.mxu1 %v3782_v2  ;;  %v3647_v34 = vpop.permute.xlu1 %3646 }
 0x2fb   : > { %3692 = vst.msk [vmem:[#allocation3 + $0x38] sm:$0xff] %vm3436_vm7, %v3647_v34  ;;  %3521 = vrot.lane.b32.xlu0 %v8325_v62, %s5174_s25  ;;  %4119 = vmatmul.mubr.bf16.gmra.mrb[4].mxu1 %v3781_v61 }
 0x2fc   : > { %3342 = vrot.lane.b32.xlu1 %v8318_v21, %s5173_s16 }
 0x2fd   : > { %v3530_v25 = vpop.permute.xlu0 %3529 }
 0x2fe   : > { %3563 = vst.msk [vmem:[#allocation3 + $0x158] sm:$0xff] %vm3224_vm5, %v3530_v25  ;;  %v3393_v11 = vpop.permute.xlu1 %3392 }
 0x2ff   : > { %3439 = vst.msk [vmem:[#allocation3 + $0x30] sm:$0xff] %vm3436_vm7, %v3393_v11  ;;  %3586 = vrot.lane.b32.xlu0 %v7986_v63, %s5173_s16  ;;  %v3771_v11 = vld [vmem:[#allocation3 + $0xe8] sm:$0xff] }
 0x300   : > { %3408 = vrot.lane.b32.xlu1 %v8295_v40, %s5175_s30 }
 0x301   : > { %v3205_v39 = vpop.permute.xlu0 %3204 }
 0x302   : > { %3239 = vst.msk [vmem:[#allocation3 + $0x150] sm:$0xff] %vm3224_vm5, %v3205_v39  ;;  %v3351_v58 = vpop.permute.xlu1 %3350  ;;  %v3749_v38 = vld [vmem:[#allocation3 + $0x38] sm:$0xff] }
 0x303   : > { %3385 = vst.msk [vmem:[#allocation3 + $0x150] sm:$0xff] %vm3370_vm6, %v3351_v58  ;;  %3662 = vrot.lane.b32.xlu0 %v8028_v0, %s5175_s30  ;;  %4030 = vmatprep.mubr.bf16.mxu0 %v3749_v38  ;;  %v3774_v58 = vld [vmem:[#allocation3 + $0x100] sm:$0xff] }
 0x304   : > { %3198 = vrot.lane.b32.xlu1 %v8337_v48, %s5174_s25 }
 0x305   : > { %v3595_v21 = vpop.permute.xlu0 %3594 }
 0x306   : > { %3628 = vst.msk [vmem:[#allocation3 + $0x158] sm:$0xff] %vm3370_vm6, %v3595_v21  ;;  %v3417_v24 = vpop.permute.xlu1 %3416  ;;  %v3748_v20 = vld [vmem:[#allocation3 + $0x30] sm:$0xff] }
 0x307   : > { %3451 = vst.msk [vmem:[#allocation3 + $0x150] sm:$0xff] %vm3436_vm7, %v3417_v24  ;;  %3523 = vrot.lane.b32.xlu0 %v8015_v37, %s5174_s25  ;;  %4031 = vmatmul.mubr.bf16.gmra.mrb[8].mxu0 %v3748_v20 }
 0x308   : > { %3344 = vrot.lane.b32.xlu1 %v8325_v62, %s5173_s16 }
 0x309   : > { %v3671_v40 = vpop.permute.xlu0 %3670 }
 0x30a   : > { %3704 = vst.msk [vmem:[#allocation3 + $0x158] sm:$0xff] %vm3436_vm7, %v3671_v40  ;;  %v3183_v0 = vpop.permute.xlu1 %3182  ;;  %v3777_v40 = vld [vmem:[#allocation3 + $0x118] sm:$0xff] }
 0x30b   : > { %3228 = vst.msk [vmem:[#allocation3 + $0x48] sm:$0xff] %vm3224_vm5, %v3183_v0  ;;  %3588 = vrot.lane.b32.xlu0 %v7941_v41, %s5173_s16 }
 0x30c   : > { %3410 = vrot.lane.b32.xlu1 %v7986_v63, %s5175_s30 }
 0x30d   : > { %v3508_v36 = vpop.permute.xlu0 %3507 }
 0x30e   : > { %3552 = vst.msk [vmem:[#allocation3 + $0x50] sm:$0xff] %vm3224_vm5, %v3508_v36  ;;  %v3329_v37 = vpop.permute.xlu1 %3328  ;;  %v3784_v62 = vld [vmem:[#allocation3 + $0x150] sm:$0xff] }
 0x30f   : > { %3374 = vst.msk [vmem:[#allocation3 + $0x48] sm:$0xff] %vm3370_vm6, %v3329_v37  ;;  %3664 = vrot.lane.b32.xlu0 %v8081_v28, %s5175_s30  ;;  %v3780_v37 = vld [vmem:[#allocation3 + $0x130] sm:$0xff] }
 0x311   : > { %v3573_v7 = vpop.permute.xlu0 %3572  ;;  %v3785_v48 = vld [vmem:[#allocation3 + $0x158] sm:$0xff] }
 0x312   : > { %3617 = vst.msk [vmem:[#allocation3 + $0x50] sm:$0xff] %vm3370_vm6, %v3573_v7  ;;  %4126 = vmatprep.mubr.bf16.mxu1 %v3785_v48  ;;  %v3649_v12 = vpop.permute.xlu1 %3648 }
 0x313   : > { %3693 = vst.msk [vmem:[#allocation3 + $0x50] sm:$0xff] %vm3436_vm7, %v3649_v12  ;;  %4127 = vmatmul.mubr.bf16.gmra.mrb[8].mxu1 %v3784_v62  ;;  %v3783_v12 = vld [vmem:[#allocation3 + $0x148] sm:$0xff] }
 0x315   : > { %v3532_v41 = vpop.permute.xlu0 %3531 }
 0x316   : > { %3564 = vst.msk [vmem:[#allocation3 + $0x170] sm:$0xff] %vm3224_vm5, %v3532_v41  ;;  %v3395_v63 = vpop.permute.xlu1 %3394 }
 0x317   : > { %3440 = vst.msk [vmem:[#allocation3 + $0x48] sm:$0xff] %vm3436_vm7, %v3395_v63  ;;  %v3786_v63 = vld [vmem:[#allocation3 + $0x160] sm:$0xff] }
 0x319   : > { %v3207_v32 = vpop.permute.xlu0 %3206 }
 0x31a   : > { %3240 = vst.msk [vmem:[#allocation3 + $0x168] sm:$0xff] %vm3224_vm5, %v3207_v32  ;;  %v3353_v28 = vpop.permute.xlu1 %3352  ;;  %v3752_v14 = vld [vmem:[#allocation3 + $0x50] sm:$0xff] }
 0x31b   : > { %3386 = vst.msk [vmem:[#allocation3 + $0x168] sm:$0xff] %vm3370_vm6, %v3353_v28  ;;  %4038 = vmatprep.mubr.bf16.mxu0 %v3752_v14 }
 0x31d   : > { %v3597_v13 = vpop.permute.xlu0 %3596 }
 0x31e   : > { %3629 = vst.msk [vmem:[#allocation3 + $0x170] sm:$0xff] %vm3370_vm6, %v3597_v13  ;;  %v3751_v57 = vld [vmem:[#allocation3 + $0x48] sm:$0xff]  ;;  %v3419_v9 = vpop.permute.xlu1 %3418 }
 0x31f   : > { %4039 = vmatmul.mubr.bf16.gmra.mrb[12].mxu0 %v3751_v57  ;;  %3452 = vst.msk [vmem:[#allocation3 + $0x168] sm:$0xff] %vm3436_vm7, %v3419_v9  ;;  %v3789_v9 = vld [vmem:[#allocation3 + $0x178] sm:$0xff] }
 0x321   : > { %v3673_v35 = vpop.permute.xlu0 %3672 }
 0x322   : > { %3705 = vst.msk [vmem:[#allocation3 + $0x170] sm:$0xff] %vm3436_vm7, %v3673_v35  ;;  %v3185_v47 = vpop.permute.xlu1 %3184 }
 0x323   : > { %3229 = vst.msk [vmem:[#allocation3 + $0x60] sm:$0xff] %vm3224_vm5, %v3185_v47 }
 0x325   : > { %v3510_v4 = vpop.permute.xlu0 %3509 }
 0x326   : > { %3553 = vst.msk [vmem:[#allocation3 + $0x68] sm:$0xff] %vm3224_vm5, %v3510_v4  ;;  %v3331_v54 = vpop.permute.xlu1 %3330  ;;  %v3787_v44 = vld [vmem:[#allocation3 + $0x168] sm:$0xff] }
 0x327   : > { %3375 = vst.msk [vmem:[#allocation3 + $0x60] sm:$0xff] %vm3370_vm6, %v3331_v54 }
 0x329   : > { %v3575_v22 = vpop.permute.xlu0 %3574  ;;  %v3788_v15 = vld [vmem:[#allocation3 + $0x170] sm:$0xff] }
 0x32a   : > { %3618 = vst.msk [vmem:[#allocation3 + $0x68] sm:$0xff] %vm3370_vm6, %v3575_v22  ;;  %4134 = vmatprep.mubr.bf16.mxu1 %v3788_v15  ;;  %v3397_v60 = vpop.permute.xlu1 %3396 }
 0x32b   : > { %4135 = vmatmul.mubr.bf16.gmra.mrb[12].mxu1 %v3787_v44  ;;  %3441 = vst.msk [vmem:[#allocation3 + $0x60] sm:$0xff] %vm3436_vm7, %v3397_v60 }
 0x32c   : > { %4848 = vmatprep.mubr.msk.bf16.mxu1 %vm2966_vm10, %v3744_v51 }
 0x32d   : > { %v3651_v53 = vpop.permute.xlu0 %3650 }
 0x32e   : > { %3694 = vst.msk [vmem:[#allocation3 + $0x68] sm:$0xff] %vm3436_vm7, %v3651_v53  ;;  %v3187_v5 = vpop.permute.xlu1 %3186 }
 0x32f   : > { %3230 = vst.msk [vmem:[#allocation3 + $0x78] sm:$0xff] %vm3224_vm5, %v3187_v5 }
 0x331   : > { %v3512_v23 = vpop.permute.xlu0 %3511 }
 0x332   : > { %3554 = vst.msk [vmem:[#allocation3 + $0x80] sm:$0xff] %vm3224_vm5, %v3512_v23  ;;  %v3333_v43 = vpop.permute.xlu1 %3332  ;;  %v3754_v19 = vld [vmem:[#allocation3 + $0x60] sm:$0xff] }
 0x333   : > { %4849 = vmatmul.mubr.msk.bf16.vlgmr.msra.gmra.mrb[16].mxu1 %vm2966_vm10, %v3747_v59  ;;  %3376 = vst.msk [vmem:[#allocation3 + $0x78] sm:$0xff] %vm3370_vm6, %v3333_v43 }
 0x334   : > { %4852 = vmatprep.mubr.msk.bf16.mxu1 %vm2966_vm10, %v3750_v26 }
 0x335   : > { %v3577_v18 = vpop.permute.xlu0 %3576  ;;  %v3755_v6 = vld [vmem:[#allocation3 + $0x68] sm:$0xff] }
 0x336   : > { %3619 = vst.msk [vmem:[#allocation3 + $0x80] sm:$0xff] %vm3370_vm6, %v3577_v18  ;;  %4046 = vmatprep.mubr.bf16.mxu0 %v3755_v6  ;;  %v3399_v45 = vpop.permute.xlu1 %3398 }
 0x337   : > { %4047 = vmatmul.mubr.bf16.gmra.mrb[16].mxu0 %v3754_v19  ;;  %3442 = vst.msk [vmem:[#allocation3 + $0x78] sm:$0xff] %vm3436_vm7, %v3399_v45 }
 0x339   : > { %v3653_v52 = vpop.permute.xlu0 %3652 }
 0x33a   : > { %3695 = vst.msk [vmem:[#allocation3 + $0x80] sm:$0xff] %vm3436_vm7, %v3653_v52  ;;  %v3189_v49 = vpop.permute.xlu1 %3188 }
 0x33b   : > { %4853 = vmatmul.mubr.msk.bf16.gmra.mrb[20].mxu1 %vm2966_vm10, %v3753_v1  ;;  %3231 = vst.msk [vmem:[#allocation3 + $0x90] sm:$0xff] %vm3224_vm5, %v3189_v49 }
 0x33c   : > { %4856 = vmatprep.mubr.msk.bf16.mxu1 %vm2966_vm10, %v3756_v29 }
 0x33d   : > { %v3514_v30 = vpop.permute.xlu0 %3513 }
 0x33e   : > { %3555 = vst.msk [vmem:[#allocation3 + $0x98] sm:$0xff] %vm3224_vm5, %v3514_v30  ;;  %v3335_v27 = vpop.permute.xlu1 %3334  ;;  %v3757_v16 = vld [vmem:[#allocation3 + $0x78] sm:$0xff] }
 0x33f   : > { %3377 = vst.msk [vmem:[#allocation3 + $0x90] sm:$0xff] %vm3370_vm6, %v3335_v27 }
 0x341   : > { %v3579_v42 = vpop.permute.xlu0 %3578  ;;  %v3758_v17 = vld [vmem:[#allocation3 + $0x80] sm:$0xff] }
 0x342   : > { %3620 = vst.msk [vmem:[#allocation3 + $0x98] sm:$0xff] %vm3370_vm6, %v3579_v42  ;;  %4054 = vmatprep.mubr.bf16.mxu0 %v3758_v17  ;;  %v3401_v8 = vpop.permute.xlu1 %3400 }
 0x343   : > { %4055 = vmatmul.mubr.bf16.gmra.mrb[20].mxu0 %v3757_v16  ;;  %4857 = vmatmul.mubr.msk.bf16.gmra.mrb[24].mxu1 %vm2966_vm10, %v3759_v33  ;;  %3443 = vst.msk [vmem:[#allocation3 + $0x90] sm:$0xff] %vm3436_vm7, %v3401_v8 }
 0x344   : > { %4860 = vmatprep.mubr.msk.bf16.mxu1 %vm2966_vm10, %v3762_v46 }
 0x345   : > { %v3655_v3 = vpop.permute.xlu0 %3654 }
 0x346   : > { %3696 = vst.msk [vmem:[#allocation3 + $0x98] sm:$0xff] %vm3436_vm7, %v3655_v3  ;;  %v3191_v10 = vpop.permute.xlu1 %3190 }
 0x347   : > { %3232 = vst.msk [vmem:[#allocation3 + $0xa8] sm:$0xff] %vm3224_vm5, %v3191_v10 }
 0x349   : > { %v3516_v56 = vpop.permute.xlu0 %3515 }
 0x34a   : > { %3556 = vst.msk [vmem:[#allocation3 + $0xb0] sm:$0xff] %vm3224_vm5, %v3516_v56  ;;  %v3337_v61 = vpop.permute.xlu1 %3336  ;;  %v3760_v50 = vld [vmem:[#allocation3 + $0x90] sm:$0xff] }
 0x34b   : > { %4861 = vmatmul.mubr.msk.bf16.gmra.mrb[28].mxu1 %vm2966_vm10, %v3765_v55  ;;  %3378 = vst.msk [vmem:[#allocation3 + $0xa8] sm:$0xff] %vm3370_vm6, %v3337_v61 }
 0x34c   : > { %4864 = vmatprep.mubr.msk.bf16.mxu1 %vm2966_vm10, %v3768_v31 }
 0x34d   : > { %v3581_v2 = vpop.permute.xlu0 %3580  ;;  %v3761_v34 = vld [vmem:[#allocation3 + $0x98] sm:$0xff] }
 0x34e   : > { %3621 = vst.msk [vmem:[#allocation3 + $0xb0] sm:$0xff] %vm3370_vm6, %v3581_v2  ;;  %4062 = vmatprep.mubr.bf16.mxu0 %v3761_v34  ;;  %v3403_v25 = vpop.permute.xlu1 %3402 }
 0x34f   : > { %4063 = vmatmul.mubr.bf16.gmra.mrb[24].mxu0 %v3760_v50  ;;  %3444 = vst.msk [vmem:[#allocation3 + $0xa8] sm:$0xff] %vm3436_vm7, %v3403_v25 }
 0x351   : > { %v3657_v39 = vpop.permute.xlu0 %3656 }
 0x352   : > { %3697 = vst.msk [vmem:[#allocation3 + $0xb0] sm:$0xff] %vm3436_vm7, %v3657_v39  ;;  %v3193_v38 = vpop.permute.xlu1 %3192 }
 0x353   : > { %4865 = vmatmul.mubr.msk.bf16.gmra.mrb[32].mxu1 %vm2966_vm10, %v3771_v11  ;;  %3233 = vst.msk [vmem:[#allocation3 + $0xc0] sm:$0xff] %vm3224_vm5, %v3193_v38 }
 0x354   : > { %4868 = vmatprep.mubr.msk.bf16.mxu1 %vm2966_vm10, %v3774_v58 }
 0x355   : > { %v3518_v21 = vpop.permute.xlu0 %3517 }
 0x356   : > { %3557 = vst.msk [vmem:[#allocation3 + $0xc8] sm:$0xff] %vm3224_vm5, %v3518_v21  ;;  %v3339_v24 = vpop.permute.xlu1 %3338  ;;  %v3763_v20 = vld [vmem:[#allocation3 + $0xa8] sm:$0xff] }
 0x357   : > { %3379 = vst.msk [vmem:[#allocation3 + $0xc0] sm:$0xff] %vm3370_vm6, %v3339_v24 }
 0x359   : > { %v3583_v0 = vpop.permute.xlu0 %3582  ;;  %v3764_v36 = vld [vmem:[#allocation3 + $0xb0] sm:$0xff] }
 0x35a   : > { %3622 = vst.msk [vmem:[#allocation3 + $0xc8] sm:$0xff] %vm3370_vm6, %v3583_v0  ;;  %4070 = vmatprep.mubr.bf16.mxu0 %v3764_v36  ;;  %v3405_v62 = vpop.permute.xlu1 %3404 }
 0x35b   : > { %4071 = vmatmul.mubr.bf16.gmra.mrb[28].mxu0 %v3763_v20  ;;  %4869 = vmatmul.mubr.msk.bf16.gmra.mrb[36].mxu1 %vm2966_vm10, %v3777_v40  ;;  %3445 = vst.msk [vmem:[#allocation3 + $0xc0] sm:$0xff] %vm3436_vm7, %v3405_v62 }
 0x35c   : > { %4872 = vmatprep.mubr.msk.bf16.mxu1 %vm2966_vm10, %v3780_v37 }
 0x35d   : > { %v3659_v7 = vpop.permute.xlu0 %3658 }
 0x35e   : > { %3698 = vst.msk [vmem:[#allocation3 + $0xc8] sm:$0xff] %vm3436_vm7, %v3659_v7  ;;  %v3195_v48 = vpop.permute.xlu1 %3194 }
 0x35f   : > { %3234 = vst.msk [vmem:[#allocation3 + $0xd8] sm:$0xff] %vm3224_vm5, %v3195_v48 }
 0x361   : > { %v3520_v41 = vpop.permute.xlu0 %3519 }
 0x362   : > { %3558 = vst.msk [vmem:[#allocation3 + $0xe0] sm:$0xff] %vm3224_vm5, %v3520_v41  ;;  %v3341_v32 = vpop.permute.xlu1 %3340  ;;  %v3766_v28 = vld [vmem:[#allocation3 + $0xc0] sm:$0xff] }
 0x363   : > { %4873 = vmatmul.mubr.msk.bf16.gmra.mrb[40].mxu1 %vm2966_vm10, %v3783_v12  ;;  %3380 = vst.msk [vmem:[#allocation3 + $0xd8] sm:$0xff] %vm3370_vm6, %v3341_v32 }
 0x364   : > { %4876 = vmatprep.mubr.msk.bf16.mxu1 %vm2966_vm10, %v3786_v63 }
 0x365   : > { %v3585_v14 = vpop.permute.xlu0 %3584  ;;  %v3767_v13 = vld [vmem:[#allocation3 + $0xc8] sm:$0xff] }
 0x366   : > { %3623 = vst.msk [vmem:[#allocation3 + $0xe0] sm:$0xff] %vm3370_vm6, %v3585_v14  ;;  %4078 = vmatprep.mubr.bf16.mxu0 %v3767_v13  ;;  %v3407_v57 = vpop.permute.xlu1 %3406 }
 0x367   : > { %4079 = vmatmul.mubr.bf16.gmra.mrb[32].mxu0 %v3766_v28  ;;  %3446 = vst.msk [vmem:[#allocation3 + $0xd8] sm:$0xff] %vm3436_vm7, %v3407_v57 }
 0x369   : > { %v3661_v35 = vpop.permute.xlu0 %3660 }
 0x36a   : > { %3699 = vst.msk [vmem:[#allocation3 + $0xe0] sm:$0xff] %vm3436_vm7, %v3661_v35  ;;  %v3197_v47 = vpop.permute.xlu1 %3196 }
 0x36b   : > { %4877 = vmatmul.mubr.msk.bf16.gmra.mrb[44].mxu1 %vm2966_vm10, %v3789_v9  ;;  %3235 = vst.msk [vmem:[#allocation3 + $0xf0] sm:$0xff] %vm3224_vm5, %v3197_v47 }
 0x36d   : > { %v3522_v4 = vpop.permute.xlu0 %3521 }
 0x36e   : > { %3559 = vst.msk [vmem:[#allocation3 + $0xf8] sm:$0xff] %vm3224_vm5, %v3522_v4  ;;  %v3343_v54 = vpop.permute.xlu1 %3342  ;;  %v3769_v44 = vld [vmem:[#allocation3 + $0xd8] sm:$0xff] }
 0x36f   : > { %3381 = vst.msk [vmem:[#allocation3 + $0xf0] sm:$0xff] %vm3370_vm6, %v3343_v54 }
 0x371   : > { %v3587_v22 = vpop.permute.xlu0 %3586  ;;  %v3770_v15 = vld [vmem:[#allocation3 + $0xe0] sm:$0xff] }
 0x372   : > { %3624 = vst.msk [vmem:[#allocation3 + $0xf8] sm:$0xff] %vm3370_vm6, %v3587_v22  ;;  %4086 = vmatprep.mubr.bf16.mxu0 %v3770_v15  ;;  %v3409_v51 = vpop.permute.xlu1 %3408 }
 0x373   : > { %4087 = vmatmul.mubr.bf16.gmra.mrb[36].mxu0 %v3769_v44  ;;  %3447 = vst.msk [vmem:[#allocation3 + $0xf0] sm:$0xff] %vm3436_vm7, %v3409_v51  ;;  %v8605_v44 = vstv %s5384_s15  ;;  %v4306_v51 = vld [vmem:[#allocation2 + $0x10] sm:$0xff] }
 0x375   : > { %v3663_v60 = vpop.permute.xlu0 %3662 }
 0x376   : > { %3700 = vst.msk [vmem:[#allocation3 + $0xf8] sm:$0xff] %vm3436_vm7, %v3663_v60  ;;  %v3199_v53 = vpop.permute.xlu1 %3198 }
 0x377   : > { %3236 = vst.msk [vmem:[#allocation3 + $0x108] sm:$0xff] %vm3224_vm5, %v3199_v53 }
 0x379   : > { %v3524_v5 = vpop.permute.xlu0 %3523 }
 0x37a   : > { %3560 = vst.msk [vmem:[#allocation3 + $0x110] sm:$0xff] %vm3224_vm5, %v3524_v5  ;;  %v3345_v59 = vpop.permute.xlu1 %3344  ;;  %v3772_v23 = vld [vmem:[#allocation3 + $0xf0] sm:$0xff] }
 0x37b   : > { %3382 = vst.msk [vmem:[#allocation3 + $0x108] sm:$0xff] %vm3370_vm6, %v3345_v59  ;;  %v4304_v59 = vld [vmem:[#allocation2] sm:$0xff] }
 0x37d   : > { %v3589_v26 = vpop.permute.xlu0 %3588  ;;  %v3773_v43 = vld [vmem:[#allocation3 + $0xf8] sm:$0xff] }
 0x37e   : > { %3625 = vst.msk [vmem:[#allocation3 + $0x110] sm:$0xff] %vm3370_vm6, %v3589_v26  ;;  %4094 = vmatprep.mubr.bf16.mxu0 %v3773_v43  ;;  %v3411_v19 = vpop.permute.xlu1 %3410 }
 0x37f   : > { %4095 = vmatmul.mubr.bf16.gmra.mrb[40].mxu0 %v3772_v23  ;;  %3448 = vst.msk [vmem:[#allocation3 + $0x108] sm:$0xff] %vm3436_vm7, %v3411_v19  ;;  %v4307_v19 = vld [vmem:[#allocation2 + $0x18] sm:$0xff] }
 0x381   : > { %v3665_v18 = vpop.permute.xlu0 %3664 }
 0x382   : > { %3701 = vst.msk [vmem:[#allocation3 + $0x110] sm:$0xff] %vm3436_vm7, %v3665_v18 }
 0x386   : > { %v3775_v6 = vld [vmem:[#allocation3 + $0x108] sm:$0xff] }
 0x389   : > { %v3776_v45 = vld [vmem:[#allocation3 + $0x110] sm:$0xff] }
 0x38a   : > { %4102 = vmatprep.mubr.bf16.mxu0 %v3776_v45 }
 0x38b   : > { %4103 = vmatmul.mubr.bf16.gmra.mrb[44].mxu0 %v3775_v6 }
 0x3aa   : > { %v4730_v1 = vpop.f32.mrb[0].mxu0 }
 0x3ab   : > { %v4731_v52 = vpop.f32.mrb[1].mxu0 }
 0x3ac   : > { %v4732_v29 = vadd.f32 %v4731_v52, %v4730_v1  ;;  %v4733_v49 = vpop.f32.mrb[2].mxu0  ;;  %v4305_v52 = vld [vmem:[#allocation2 + $0x8] sm:$0xff] }
 0x3ad   : > { %v4734_v30 = vpop.f32.mrb[3].mxu0 }
 0x3ae   : > { %v4735_v27 = vadd.f32 %v4734_v30, %v4733_v49 }
 0x3b6   : > { %v4802_v16 = vpop.f32.mrb[0].mxu1 }
 0x3b7   : > { %v4803_v33 = vpop.f32.mrb[1].mxu1 }
 0x3b8   : > { %v8588_v42 = vadd.f32 %v4803_v33, %v4802_v16  ;;  %v4805_v17 = vpop.f32.mrb[2].mxu1 }
 0x3b9   : > { %v4806_v46 = vpop.f32.mrb[3].mxu1 }
 0x3ba   : > { %v8590_v8 = vadd.f32 %v4806_v46, %v4805_v17 }
 0x3c2   : > { %v4736_v3 = vpop.f32.mrb[4].mxu0 }
 0x3c3   : > { %v4737_v10 = vpop.f32.mrb[5].mxu0 }
 0x3c4   : > { %v4738_v55 = vadd.f32 %v4737_v10, %v4736_v3  ;;  %v4739_v56 = vpop.f32.mrb[6].mxu0 }
 0x3c5   : > { %v4740_v31 = vpop.f32.mrb[7].mxu0 }
 0x3c6   : > { %v4741_v61 = vadd.f32 %v4740_v31, %v4739_v56  ;;  %v4310_v31 = vld [vmem:[#allocation2 + $0x30] sm:$0xff] }
 0x3ce   : > { %v4808_v50 = vpop.f32.mrb[4].mxu1 }
 0x3cf   : > { %v4809_v2 = vpop.f32.mrb[5].mxu1 }
 0x3d0   : > { %v8592_v34 = vadd.f32 %v4809_v2, %v4808_v50  ;;  %v4811_v25 = vpop.f32.mrb[6].mxu1 }
 0x3d1   : > { %v4812_v11 = vpop.f32.mrb[7].mxu1 }
 0x3d2   : > { %v8594_v39 = vadd.f32 %v4812_v11, %v4811_v25  ;;  %v4308_v25 = vld [vmem:[#allocation2 + $0x20] sm:$0xff] }
 0x3da   : > { %v4742_v58 = vpop.f32.mrb[8].mxu0 }
 0x3db   : > { %v4743_v38 = vpop.f32.mrb[9].mxu0 }
 0x3dc   : > { %v4744_v21 = vadd.f32 %v4743_v38, %v4742_v58  ;;  %v4745_v24 = vpop.f32.mrb[10].mxu0 }
 0x3dd   : > { %v4746_v20 = vpop.f32.mrb[11].mxu0 }
 0x3de   : > { %v4747_v40 = vadd.f32 %v4746_v20, %v4745_v24  ;;  %v4311_v24 = vld [vmem:[#allocation2 + $0x38] sm:$0xff] }
 0x3e6   : > { %v4814_v0 = vpop.f32.mrb[8].mxu1 }
 0x3e7   : > { %v4815_v36 = vpop.f32.mrb[9].mxu1 }
 0x3e8   : > { %v8596_v37 = vadd.f32 %v4815_v36, %v4814_v0  ;;  %v4817_v62 = vpop.f32.mrb[10].mxu1 }
 0x3e9   : > { %v4818_v7 = vpop.f32.mrb[11].mxu1 }
 0x3ea   : > { %v8598_v48 = vadd.f32 %v4818_v7, %v4817_v62  ;;  %v4309_v62 = vld [vmem:[#allocation2 + $0x28] sm:$0xff] }
 0x3f2   : > { %v4748_v12 = vpop.f32.mrb[12].mxu0 }
 0x3f3   : > { %v4749_v41 = vpop.f32.mrb[13].mxu0 }
 0x3f4   : > { %v4750_v63 = vadd.f32 %v4749_v41, %v4748_v12  ;;  %v4751_v32 = vpop.f32.mrb[14].mxu0 }
 0x3f5   : > { %v4752_v28 = vpop.f32.mrb[15].mxu0 }
 0x3f6   : > { %v4753_v14 = vadd.f32 %v4752_v28, %v4751_v32 }
 0x3fe   : > { %v4820_v13 = vpop.f32.mrb[12].mxu1 }
 0x3ff   : > { %v4821_v57 = vpop.f32.mrb[13].mxu1 }
 0x400   : > { %v8600_v9 = vadd.f32 %v4821_v57, %v4820_v13  ;;  %v4823_v35 = vpop.f32.mrb[14].mxu1 }
 0x401   : > { %v4824_v47 = vpop.f32.mrb[15].mxu1 }
 0x402   : > { %v8602_v4 = vadd.f32 %v4824_v47, %v4823_v35  ;;  %v4312_v47 = vld [vmem:[#allocation2 + $0x40] sm:$0xff] }
 0x406   : > { %v4850_v54 = vpop.f32.mrb[16].mxu1 }
 0x407   : > { %v4186_v22 = vadd.f32 %v4850_v54, %v4738_v55  ;;  %v4177_v15 = vpop.f32.mrb[17].mxu1 }
 0x408   : > { %v4178_v60 = vadd.f32 %v4732_v29, %v4177_v15  ;;  %v4851_v53 = vpop.f32.mrb[18].mxu1 }
 0x409   : > { %v4339_v5 = vmul.f32 %v8605_v44, %v4186_v22  ;;  %v4189_v23 = vadd.f32 %v4851_v53, %v4741_v61  ;;  %v4180_v26 = vpop.f32.mrb[19].mxu1 }
 0x40a   : > { %v4337_v43 = vmul.f32 %v8605_v44, %v4178_v60  ;;  %v4181_v18 = vadd.f32 %v4735_v27, %v4180_v26  ;;  %v4754_v6 = vpop.f32.mrb[16].mxu0 }
 0x40b   : > { %v4371_v45 = vadd.f32 %v4339_v5, %v4306_v51  ;;  %v4340_v1 = vmul.f32 %v8605_v44, %v4189_v23  ;;  %v4755_v49 = vpop.f32.mrb[17].mxu0  ;;  %v4314_v5 = vld [vmem:[#allocation2 + $0x50] sm:$0xff] }
 0x40c   : > { %v4369_v30 = vadd.f32 %v4337_v43, %v4304_v59  ;;  %v4338_v16 = vmul.f32 %v8605_v44, %v4181_v18  ;;  %v4756_v29 = vadd.f32 %v4755_v49, %v4754_v6  ;;  %v4757_v33 = vpop.f32.mrb[18].mxu0  ;;  %v4313_v59 = vld [vmem:[#allocation2 + $0x48] sm:$0xff]  ;;  %v4315_v18 = vld [vmem:[#allocation2 + $0x58] sm:$0xff] }
 0x40d   : > { %4403 = vst.msk [vmem:[#allocation2 + $0x10] sm:$0xff] %vm2966_vm10, %v4371_v45  ;;  %v4372_v17 = vadd.f32 %v4340_v1, %v4307_v19  ;;  %v4758_v46 = vpop.f32.mrb[19].mxu0 }
 0x40e   : > { %4401 = vst.msk [vmem:[#allocation2] sm:$0xff] %vm2966_vm10, %v4369_v30  ;;  %v4370_v3 = vadd.f32 %v4338_v16, %v4305_v52  ;;  %v4759_v10 = vadd.f32 %v4758_v46, %v4757_v33  ;;  %v4854_v27 = vpop.f32.mrb[20].mxu1 }
 0x40f   : > { %4404 = vst.msk [vmem:[#allocation2 + $0x18] sm:$0xff] %vm2966_vm10, %v4372_v17  ;;  %v4202_v55 = vadd.f32 %v4854_v27, %v4750_v63  ;;  %v4193_v56 = vpop.f32.mrb[21].mxu1 }
 0x410   : > { %4402 = vst.msk [vmem:[#allocation2 + $0x8] sm:$0xff] %vm2966_vm10, %v4370_v3  ;;  %v4194_v61 = vadd.f32 %v4744_v21, %v4193_v56  ;;  %v4855_v50 = vpop.f32.mrb[22].mxu1 }
 0x411   : > { %v4343_v2 = vmul.f32 %v8605_v44, %v4202_v55  ;;  %v4205_v11 = vadd.f32 %v4855_v50, %v4753_v14  ;;  %v4196_v58 = vpop.f32.mrb[23].mxu1 }
 0x412   : > { %v4341_v38 = vmul.f32 %v8605_v44, %v4194_v61  ;;  %v4197_v20 = vadd.f32 %v4747_v40, %v4196_v58 }
 0x413   : > { %v4375_v0 = vadd.f32 %v4343_v2, %v4310_v31  ;;  %v4344_v36 = vmul.f32 %v8605_v44, %v4205_v11  ;;  %v4316_v31 = vld [vmem:[#allocation2 + $0x60] sm:$0xff]  ;;  %v4317_v11 = vld [vmem:[#allocation2 + $0x68] sm:$0xff] }
 0x414   : > { %v4373_v7 = vadd.f32 %v4341_v38, %v4308_v25  ;;  %v4342_v12 = vmul.f32 %v8605_v44, %v4197_v20 }
 0x415   : > { %4407 = vst.msk [vmem:[#allocation2 + $0x30] sm:$0xff] %vm2966_vm10, %v4375_v0  ;;  %v4376_v21 = vadd.f32 %v4344_v36, %v4311_v24 }
 0x416   : > { %4405 = vst.msk [vmem:[#allocation2 + $0x20] sm:$0xff] %vm2966_vm10, %v4373_v7  ;;  %v4374_v41 = vadd.f32 %v4342_v12, %v4309_v62  ;;  %v4760_v63 = vpop.f32.mrb[20].mxu0  ;;  %v4858_v32 = vpop.f32.mrb[24].mxu1 }
 0x417   : > { %4408 = vst.msk [vmem:[#allocation2 + $0x38] sm:$0xff] %vm2966_vm10, %v4376_v21  ;;  %v4761_v28 = vpop.f32.mrb[21].mxu0  ;;  %v4209_v14 = vpop.f32.mrb[25].mxu1 }
 0x418   : > { %4406 = vst.msk [vmem:[#allocation2 + $0x28] sm:$0xff] %vm2966_vm10, %v4374_v41  ;;  %v4762_v40 = vadd.f32 %v4761_v28, %v4760_v63  ;;  %v4210_v13 = vadd.f32 %v4756_v29, %v4209_v14  ;;  %v4763_v57 = vpop.f32.mrb[22].mxu0  ;;  %v4859_v35 = vpop.f32.mrb[26].mxu1 }
 0x419   : > { %v4764_v54 = vpop.f32.mrb[23].mxu0  ;;  %v4212_v22 = vpop.f32.mrb[27].mxu1 }
 0x41a   : > { %v4218_v15 = vadd.f32 %v4858_v32, %v4762_v40  ;;  %v4345_v51 = vmul.f32 %v8605_v44, %v4210_v13  ;;  %v4765_v60 = vadd.f32 %v4764_v54, %v4763_v57  ;;  %v4213_v53 = vadd.f32 %v4759_v10, %v4212_v22  ;;  %v4318_v40 = vld [vmem:[#allocation2 + $0x70] sm:$0xff] }
 0x41c   : > { %v4347_v23 = vmul.f32 %v8605_v44, %v4218_v15  ;;  %v4377_v26 = vadd.f32 %v4345_v51, %v4312_v47  ;;  %v4221_v43 = vadd.f32 %v4859_v35, %v4765_v60  ;;  %v4346_v19 = vmul.f32 %v8605_v44, %v4213_v53  ;;  %v4319_v35 = vld [vmem:[#allocation2 + $0x78] sm:$0xff]  ;;  %v4330_v53 = vld [vmem:[#allocation2 + $0xd0] sm:$0xff] }
 0x41e   : > { %v4379_v6 = vadd.f32 %v4347_v23, %v4314_v5  ;;  %4409 = vst.msk [vmem:[#allocation2 + $0x40] sm:$0xff] %vm2966_vm10, %v4377_v26  ;;  %v4348_v45 = vmul.f32 %v8605_v44, %v4221_v43  ;;  %v4378_v1 = vadd.f32 %v4346_v19, %v4313_v59  ;;  %v4862_v52 = vpop.f32.mrb[28].mxu1  ;;  %v4328_v26 = vld [vmem:[#allocation2 + $0xc0] sm:$0xff] }
 0x41f   : > { %v4225_v49 = vpop.f32.mrb[29].mxu1 }
 0x420   : > { %4411 = vst.msk [vmem:[#allocation2 + $0x50] sm:$0xff] %vm2966_vm10, %v4379_v6  ;;  %v4380_v30 = vadd.f32 %v4348_v45, %v4315_v18  ;;  %4410 = vst.msk [vmem:[#allocation2 + $0x48] sm:$0xff] %vm2966_vm10, %v4378_v1  ;;  %v4863_v16 = vpop.f32.mrb[30].mxu1  ;;  %v4331_v6 = vld [vmem:[#allocation2 + $0xd8] sm:$0xff] }
 0x421   : > { %v4228_v29 = vpop.f32.mrb[31].mxu1 }
 0x422   : > { %4412 = vst.msk [vmem:[#allocation2 + $0x58] sm:$0xff] %vm2966_vm10, %v4380_v30  ;;  %v4766_v33 = vpop.f32.mrb[24].mxu0 }
 0x423   : > { %v4767_v17 = vpop.f32.mrb[25].mxu0 }
 0x424   : > { %v4768_v46 = vadd.f32 %v4767_v17, %v4766_v33  ;;  %v4769_v3 = vpop.f32.mrb[26].mxu0 }
 0x425   : > { %v4770_v10 = vpop.f32.mrb[27].mxu0 }
 0x426   : > { %v4771_v27 = vadd.f32 %v4770_v10, %v4769_v3  ;;  %v4226_v55 = vadd.f32 %v4768_v46, %v4225_v49  ;;  %v8631_v56 = vpop.f32.mrb[32].mxu1  ;;  %v4329_v49 = vld [vmem:[#allocation2 + $0xc8] sm:$0xff] }
 0x427   : > { %v4241_v61 = vpop.f32.mrb[33].mxu1 }
 0x428   : > { %v4349_v50 = vmul.f32 %v8605_v44, %v4226_v55  ;;  %v4229_v2 = vadd.f32 %v4771_v27, %v4228_v29  ;;  %v8634_v25 = vpop.f32.mrb[34].mxu1  ;;  %v4320_v27 = vld [vmem:[#allocation2 + $0x80] sm:$0xff] }
 0x429   : > { %v4244_v58 = vpop.f32.mrb[35].mxu1 }
 0x42a   : > { %v4381_v38 = vadd.f32 %v4349_v50, %v4316_v31  ;;  %v4350_v24 = vmul.f32 %v8605_v44, %v4229_v2 }
 0x42c   : > { %4413 = vst.msk [vmem:[#allocation2 + $0x60] sm:$0xff] %vm2966_vm10, %v4381_v38  ;;  %v4382_v20 = vadd.f32 %v4350_v24, %v4317_v11  ;;  %v4334_v11 = vld [vmem:[#allocation2 + $0xf0] sm:$0xff] }
 0x42e   : > { %4414 = vst.msk [vmem:[#allocation2 + $0x68] sm:$0xff] %vm2966_vm10, %v4382_v20  ;;  %v4772_v0 = vpop.f32.mrb[28].mxu0  ;;  %v8639_v36 = vpop.f32.mrb[36].mxu1  ;;  %v4321_v20 = vld [vmem:[#allocation2 + $0x88] sm:$0xff] }
 0x42f   : > { %v4773_v62 = vpop.f32.mrb[29].mxu0  ;;  %v8641_v7 = vpop.f32.mrb[37].mxu1 }
 0x430   : > { %v4774_v12 = vadd.f32 %v4773_v62, %v4772_v0  ;;  %v4775_v21 = vpop.f32.mrb[30].mxu0  ;;  %v8643_v41 = vpop.f32.mrb[38].mxu1  ;;  %v4332_v0 = vld [vmem:[#allocation2 + $0xe0] sm:$0xff] }
 0x431   : > { %v4776_v63 = vpop.f32.mrb[31].mxu0  ;;  %v8645_v32 = vpop.f32.mrb[39].mxu1 }
 0x432   : > { %v4234_v28 = vadd.f32 %v4862_v52, %v4774_v12  ;;  %v4777_v14 = vadd.f32 %v4776_v63, %v4775_v21 }
 0x434   : > { %v4351_v13 = vmul.f32 %v8605_v44, %v4234_v28  ;;  %v4237_v57 = vadd.f32 %v4863_v16, %v4777_v14  ;;  %v4335_v28 = vld [vmem:[#allocation2 + $0xf8] sm:$0xff] }
 0x436   : > { %v4383_v47 = vadd.f32 %v4351_v13, %v4318_v40  ;;  %v4352_v54 = vmul.f32 %v8605_v44, %v4237_v57  ;;  %v4874_v22 = vpop.f32.mrb[40].mxu1 }
 0x437   : > { %v4282_v15 = vadd.f32 %v4874_v22, %v8592_v34  ;;  %v4273_v51 = vpop.f32.mrb[41].mxu1 }
 0x438   : > { %4415 = vst.msk [vmem:[#allocation2 + $0x70] sm:$0xff] %vm2966_vm10, %v4383_v47  ;;  %v4384_v60 = vadd.f32 %v4352_v54, %v4319_v35  ;;  %v4274_v5 = vadd.f32 %v8588_v42, %v4273_v51  ;;  %v4875_v59 = vpop.f32.mrb[42].mxu1 }
 0x439   : > { %v4363_v23 = vmul.f32 %v8605_v44, %v4282_v15  ;;  %v4285_v43 = vadd.f32 %v4875_v59, %v8594_v39  ;;  %v4276_v19 = vpop.f32.mrb[43].mxu1 }
 0x43a   : > { %4416 = vst.msk [vmem:[#allocation2 + $0x78] sm:$0xff] %vm2966_vm10, %v4384_v60  ;;  %v4361_v18 = vmul.f32 %v8605_v44, %v4274_v5  ;;  %v4277_v34 = vadd.f32 %v8590_v8, %v4276_v19  ;;  %v4778_v45 = vpop.f32.mrb[32].mxu0  ;;  %v4322_v5 = vld [vmem:[#allocation2 + $0x90] sm:$0xff] }
 0x43b   : > { %v4395_v1 = vadd.f32 %v4363_v23, %v4330_v53  ;;  %v4364_v52 = vmul.f32 %v8605_v44, %v4285_v43  ;;  %v4779_v42 = vpop.f32.mrb[33].mxu0 }
 0x43c   : > { %v4393_v30 = vadd.f32 %v4361_v18, %v4328_v26  ;;  %v4362_v16 = vmul.f32 %v8605_v44, %v4277_v34  ;;  %v4780_v29 = vadd.f32 %v4779_v42, %v4778_v45  ;;  %v4781_v33 = vpop.f32.mrb[34].mxu0  ;;  %v4323_v26 = vld [vmem:[#allocation2 + $0x98] sm:$0xff]  ;;  %v4324_v42 = vld [vmem:[#allocation2 + $0xa0] sm:$0xff] }
 0x43d   : > { %4427 = vst.msk [vmem:[#allocation2 + $0xd0] sm:$0xff] %vm2966_vm10, %v4395_v1  ;;  %v4396_v39 = vadd.f32 %v4364_v52, %v4331_v6  ;;  %v4782_v17 = vpop.f32.mrb[35].mxu0 }
 0x43e   : > { %4425 = vst.msk [vmem:[#allocation2 + $0xc0] sm:$0xff] %vm2966_vm10, %v4393_v30  ;;  %v4394_v46 = vadd.f32 %v4362_v16, %v4329_v49  ;;  %v4242_v3 = vadd.f32 %v4780_v29, %v4241_v61  ;;  %v4783_v8 = vadd.f32 %v4782_v17, %v4781_v33  ;;  %v4878_v10 = vpop.f32.mrb[44].mxu1  ;;  %v4325_v16 = vld [vmem:[#allocation2 + $0xa8] sm:$0xff] }
 0x43f   : > { %4428 = vst.msk [vmem:[#allocation2 + $0xd8] sm:$0xff] %vm2966_vm10, %v4396_v39  ;;  %v4298_v55 = vadd.f32 %v4878_v10, %v8600_v9  ;;  %v4289_v31 = vpop.f32.mrb[45].mxu1 }
 0x440   : > { %4426 = vst.msk [vmem:[#allocation2 + $0xc8] sm:$0xff] %vm2966_vm10, %v4394_v46  ;;  %v4353_v50 = vmul.f32 %v8605_v44, %v4242_v3  ;;  %v4245_v2 = vadd.f32 %v4783_v8, %v4244_v58  ;;  %v4290_v38 = vadd.f32 %v8596_v37, %v4289_v31  ;;  %v4879_v24 = vpop.f32.mrb[46].mxu1  ;;  %v4333_v37 = vld [vmem:[#allocation2 + $0xe8] sm:$0xff] }
 0x441   : > { %v4367_v61 = vmul.f32 %v8605_v44, %v4298_v55  ;;  %v4301_v62 = vadd.f32 %v4879_v24, %v8602_v4  ;;  %v4292_v12 = vpop.f32.mrb[47].mxu1  ;;  %v4326_v55 = vld [vmem:[#allocation2 + $0xb0] sm:$0xff] }
 0x442   : > { %v4385_v21 = vadd.f32 %v4353_v50, %v4320_v27  ;;  %v4354_v9 = vmul.f32 %v8605_v44, %v4245_v2  ;;  %v4365_v63 = vmul.f32 %v8605_v44, %v4290_v38  ;;  %v4293_v14 = vadd.f32 %v8598_v48, %v4292_v12  ;;  %v4327_v50 = vld [vmem:[#allocation2 + $0xb8] sm:$0xff] }
 0x443   : > { %v4399_v58 = vadd.f32 %v4367_v61, %v4334_v11  ;;  %v4368_v40 = vmul.f32 %v8605_v44, %v4301_v62 }
 0x444   : > { %4417 = vst.msk [vmem:[#allocation2 + $0x80] sm:$0xff] %vm2966_vm10, %v4385_v21  ;;  %v4386_v13 = vadd.f32 %v4354_v9, %v4321_v20  ;;  %v4397_v57 = vadd.f32 %v4365_v63, %v4332_v0  ;;  %v4366_v35 = vmul.f32 %v8605_v44, %v4293_v14 }
 0x445   : > { %4431 = vst.msk [vmem:[#allocation2 + $0xf0] sm:$0xff] %vm2966_vm10, %v4399_v58  ;;  %v4400_v4 = vadd.f32 %v4368_v40, %v4335_v28 }
 0x446   : > { %4418 = vst.msk [vmem:[#allocation2 + $0x88] sm:$0xff] %vm2966_vm10, %v4386_v13  ;;  %4429 = vst.msk [vmem:[#allocation2 + $0xe0] sm:$0xff] %vm2966_vm10, %v4397_v57  ;;  %v4398_v47 = vadd.f32 %v4366_v35, %v4333_v37  ;;  %v4784_v54 = vpop.f32.mrb[36].mxu0 }
 0x447   : > { %4432 = vst.msk [vmem:[#allocation2 + $0xf8] sm:$0xff] %vm2966_vm10, %v4400_v4  ;;  %v4785_v48 = vpop.f32.mrb[37].mxu0 }
 0x448   : > { %4430 = vst.msk [vmem:[#allocation2 + $0xe8] sm:$0xff] %vm2966_vm10, %v4398_v47  ;;  %v4786_v22 = vadd.f32 %v4785_v48, %v4784_v54  ;;  %v4787_v15 = vpop.f32.mrb[38].mxu0 }
 0x449   : > { %v4788_v51 = vpop.f32.mrb[39].mxu0 }
 0x44a   : > { %v4250_v60 = vadd.f32 %v8631_v56, %v4786_v22  ;;  %v4789_v53 = vadd.f32 %v4788_v51, %v4787_v15 }
 0x44c   : > { %v4355_v59 = vmul.f32 %v8605_v44, %v4250_v60  ;;  %v4253_v23 = vadd.f32 %v8634_v25, %v4789_v53 }
 0x44e   : > { %v4387_v43 = vadd.f32 %v4355_v59, %v4322_v5  ;;  %v4356_v19 = vmul.f32 %v8605_v44, %v4253_v23 }
 0x450   : > { %4419 = vst.msk [vmem:[#allocation2 + $0x90] sm:$0xff] %vm2966_vm10, %v4387_v43  ;;  %v4388_v18 = vadd.f32 %v4356_v19, %v4323_v26 }
 0x452   : > { %4420 = vst.msk [vmem:[#allocation2 + $0x98] sm:$0xff] %vm2966_vm10, %v4388_v18  ;;  %v4790_v6 = vpop.f32.mrb[40].mxu0 }
 0x453   : > { %v4791_v34 = vpop.f32.mrb[41].mxu0 }
 0x454   : > { %v4792_v45 = vadd.f32 %v4791_v34, %v4790_v6  ;;  %v4793_v1 = vpop.f32.mrb[42].mxu0 }
 0x455   : > { %v4794_v56 = vpop.f32.mrb[43].mxu0 }
 0x456   : > { %v4258_v52 = vadd.f32 %v4792_v45, %v8641_v7  ;;  %v4795_v49 = vadd.f32 %v4794_v56, %v4793_v1 }
 0x458   : > { %v4357_v25 = vmul.f32 %v8605_v44, %v4258_v52  ;;  %v4261_v30 = vadd.f32 %v4795_v49, %v8645_v32 }
 0x45a   : > { %v4389_v29 = vadd.f32 %v4357_v25, %v4324_v42  ;;  %v4358_v33 = vmul.f32 %v8605_v44, %v4261_v30 }
 0x45c   : > { %4421 = vst.msk [vmem:[#allocation2 + $0xa0] sm:$0xff] %vm2966_vm10, %v4389_v29  ;;  %v4390_v39 = vadd.f32 %v4358_v33, %v4325_v16 }
 0x45e   : > { %4422 = vst.msk [vmem:[#allocation2 + $0xa8] sm:$0xff] %vm2966_vm10, %v4390_v39  ;;  %v4796_v17 = vpop.f32.mrb[44].mxu0 }
 0x45f   : > { %v4797_v46 = vpop.f32.mrb[45].mxu0 }
 0x460   : > { %v4798_v3 = vadd.f32 %v4797_v46, %v4796_v17  ;;  %v4799_v8 = vpop.f32.mrb[46].mxu0 }
 0x461   : > { %v4800_v7 = vpop.f32.mrb[47].mxu0 }
 0x462   : > { %v4266_v10 = vadd.f32 %v8639_v36, %v4798_v3  ;;  %v4801_v27 = vadd.f32 %v4800_v7, %v4799_v8 }
 0x464   : > { %v4359_v32 = vmul.f32 %v8605_v44, %v4266_v10  ;;  %v4269_v31 = vadd.f32 %v8643_v41, %v4801_v27 }
 0x466   : > { %v4391_v2 = vadd.f32 %v4359_v32, %v4326_v55  ;;  %v4360_v11 = vmul.f32 %v8605_v44, %v4269_v31 }
 0x468   : > { %4423 = vst.msk [vmem:[#allocation2 + $0xb0] sm:$0xff] %vm2966_vm10, %v4391_v2  ;;  %v4392_v38 = vadd.f32 %v4360_v11, %v4327_v50 }
 0x46a   : > { %4424 = vst.msk [vmem:[#allocation2 + $0xb8] sm:$0xff] %vm2966_vm10, %v4392_v38 }
 0x46b PF: > { %p4707_p12 = scmp.ne.s32.totalorder %s5152_s19, 1 }
 0x46c   : > { %v4437_v36 = vld [vmem:[#allocation2] sm:$0xff] (!%p4707_p12)  ;;  %vm4469_vm8 = vcmask (!%p4707_p12), 261120   ;;  %v4438_v44 = vld [vmem:[#allocation2 + $0x8] sm:$0xff] (!%p4707_p12)  ;;  %v4439_v41 = vld [vmem:[#allocation2 + $0x10] sm:$0xff] (!%p4707_p12) }
 0x46d   : > { %4436 = sbr.rel (%p4707_p12) target bundleno = 1149 (0x47d), region = 48  ;;  %4470 = vst.msk [vmem:[%s5288_s27] sm:$0xff] (!%p4707_p12), %vm4469_vm8, %v4437_v36  ;;  %4471 = vst.msk [vmem:[%s5288_s27 + $0x8] sm:$0xff] (!%p4707_p12), %vm4469_vm8, %v4438_v44  ;;  %v4440_v24 = vld [vmem:[#allocation2 + $0x18] sm:$0xff] (!%p4707_p12)  ;;  %v4441_v20 = vld [vmem:[#allocation2 + $0x20] sm:$0xff] (!%p4707_p12) }
 0x46e   : > { %4472 = vst.msk [vmem:[%s5288_s27 + $0x10] sm:$0xff] (!%p4707_p12), %vm4469_vm8, %v4439_v41  ;;  %v4442_v61 = vld [vmem:[#allocation2 + $0x28] sm:$0xff] (!%p4707_p12)  ;;  %4473 = vst.msk [vmem:[%s5288_s27 + $0x18] sm:$0xff] (!%p4707_p12), %vm4469_vm8, %v4440_v24  ;;  %v4443_v0 = vld [vmem:[#allocation2 + $0x30] sm:$0xff] (!%p4707_p12) }
 0x46f   : > { %4474 = vst.msk [vmem:[%s5288_s27 + $0x20] sm:$0xff] (!%p4707_p12), %vm4469_vm8, %v4441_v20  ;;  %4475 = vst.msk [vmem:[%s5288_s27 + $0x28] sm:$0xff] (!%p4707_p12), %vm4469_vm8, %v4442_v61  ;;  %v4444_v62 = vld [vmem:[#allocation2 + $0x38] sm:$0xff] (!%p4707_p12)  ;;  %v4445_v12 = vld [vmem:[#allocation2 + $0x40] sm:$0xff] (!%p4707_p12) }
 0x470   : > { %4476 = vst.msk [vmem:[%s5288_s27 + $0x30] sm:$0xff] (!%p4707_p12), %vm4469_vm8, %v4443_v0  ;;  %4477 = vst.msk [vmem:[%s5288_s27 + $0x38] sm:$0xff] (!%p4707_p12), %vm4469_vm8, %v4444_v62  ;;  %v4446_v21 = vld [vmem:[#allocation2 + $0x48] sm:$0xff] (!%p4707_p12)  ;;  %v4447_v9 = vld [vmem:[#allocation2 + $0x50] sm:$0xff] (!%p4707_p12) }
 0x471   : > { %4478 = vst.msk [vmem:[%s5288_s27 + $0x40] sm:$0xff] (!%p4707_p12), %vm4469_vm8, %v4445_v12  ;;  %v4448_v63 = vld [vmem:[#allocation2 + $0x58] sm:$0xff] (!%p4707_p12)  ;;  %4479 = vst.msk [vmem:[%s5288_s27 + $0x48] sm:$0xff] (!%p4707_p12), %vm4469_vm8, %v4446_v21  ;;  %v4449_v28 = vld [vmem:[#allocation2 + $0x60] sm:$0xff] (!%p4707_p12) }
 0x472   : > { %4480 = vst.msk [vmem:[%s5288_s27 + $0x50] sm:$0xff] (!%p4707_p12), %vm4469_vm8, %v4447_v9  ;;  %4481 = vst.msk [vmem:[%s5288_s27 + $0x58] sm:$0xff] (!%p4707_p12), %vm4469_vm8, %v4448_v63  ;;  %v4450_v14 = vld [vmem:[#allocation2 + $0x68] sm:$0xff] (!%p4707_p12)  ;;  %v4451_v58 = vld [vmem:[#allocation2 + $0x70] sm:$0xff] (!%p4707_p12) }
 0x473   : > { %4482 = vst.msk [vmem:[%s5288_s27 + $0x60] sm:$0xff] (!%p4707_p12), %vm4469_vm8, %v4449_v28  ;;  %4483 = vst.msk [vmem:[%s5288_s27 + $0x68] sm:$0xff] (!%p4707_p12), %vm4469_vm8, %v4450_v14  ;;  %v4452_v40 = vld [vmem:[#allocation2 + $0x78] sm:$0xff] (!%p4707_p12)  ;;  %v4453_v37 = vld [vmem:[#allocation2 + $0x80] sm:$0xff] (!%p4707_p12) }
 0x474   : > { %4484 = vst.msk [vmem:[%s5288_s27 + $0x70] sm:$0xff] %vm4469_vm8, %v4451_v58  ;;  %v4454_v13 = vld [vmem:[#allocation2 + $0x88] sm:$0xff]  ;;  %4485 = vst.msk [vmem:[%s5288_s27 + $0x78] sm:$0xff] %vm4469_vm8, %v4452_v40  ;;  %v4455_v57 = vld [vmem:[#allocation2 + $0x90] sm:$0xff] }
 0x475   : > { %4486 = vst.msk [vmem:[%s5288_s27 + $0x80] sm:$0xff] %vm4469_vm8, %v4453_v37  ;;  %4487 = vst.msk [vmem:[%s5288_s27 + $0x88] sm:$0xff] %vm4469_vm8, %v4454_v13  ;;  %v4456_v35 = vld [vmem:[#allocation2 + $0x98] sm:$0xff]  ;;  %v4457_v4 = vld [vmem:[#allocation2 + $0xa0] sm:$0xff] }
 0x476   : > { %4488 = vst.msk [vmem:[%s5288_s27 + $0x90] sm:$0xff] %vm4469_vm8, %v4455_v57  ;;  %4489 = vst.msk [vmem:[%s5288_s27 + $0x98] sm:$0xff] %vm4469_vm8, %v4456_v35  ;;  %v4458_v47 = vld [vmem:[#allocation2 + $0xa8] sm:$0xff]  ;;  %v4459_v54 = vld [vmem:[#allocation2 + $0xb0] sm:$0xff] }
 0x477   : > { %4490 = vst.msk [vmem:[%s5288_s27 + $0xa0] sm:$0xff] %vm4469_vm8, %v4457_v4  ;;  %v4460_v48 = vld [vmem:[#allocation2 + $0xb8] sm:$0xff]  ;;  %4491 = vst.msk [vmem:[%s5288_s27 + $0xa8] sm:$0xff] %vm4469_vm8, %v4458_v47  ;;  %v4461_v22 = vld [vmem:[#allocation2 + $0xc0] sm:$0xff] }
 0x478   : > { %4492 = vst.msk [vmem:[%s5288_s27 + $0xb0] sm:$0xff] %vm4469_vm8, %v4459_v54  ;;  %4493 = vst.msk [vmem:[%s5288_s27 + $0xb8] sm:$0xff] %vm4469_vm8, %v4460_v48  ;;  %v4462_v15 = vld [vmem:[#allocation2 + $0xc8] sm:$0xff]  ;;  %v4463_v51 = vld [vmem:[#allocation2 + $0xd0] sm:$0xff] }
 0x479   : > { %4494 = vst.msk [vmem:[%s5288_s27 + $0xc0] sm:$0xff] %vm4469_vm8, %v4461_v22  ;;  %4495 = vst.msk [vmem:[%s5288_s27 + $0xc8] sm:$0xff] %vm4469_vm8, %v4462_v15  ;;  %v4464_v60 = vld [vmem:[#allocation2 + $0xd8] sm:$0xff]  ;;  %v4465_v53 = vld [vmem:[#allocation2 + $0xe0] sm:$0xff] }
 0x47a   : > { %4496 = vst.msk [vmem:[%s5288_s27 + $0xd0] sm:$0xff] %vm4469_vm8, %v4463_v51  ;;  %v4466_v5 = vld [vmem:[#allocation2 + $0xe8] sm:$0xff]  ;;  %4497 = vst.msk [vmem:[%s5288_s27 + $0xd8] sm:$0xff] %vm4469_vm8, %v4464_v60  ;;  %v4467_v59 = vld [vmem:[#allocation2 + $0xf0] sm:$0xff] }
 0x47b   : > { %4498 = vst.msk [vmem:[%s5288_s27 + $0xe0] sm:$0xff] %vm4469_vm8, %v4465_v53  ;;  %4499 = vst.msk [vmem:[%s5288_s27 + $0xe8] sm:$0xff] %vm4469_vm8, %v4466_v5  ;;  %v4468_v23 = vld [vmem:[#allocation2 + $0xf8] sm:$0xff] }
 0x47c   : > { %4500 = vst.msk [vmem:[%s5288_s27 + $0xf0] sm:$0xff] %vm4469_vm8, %v4467_v59  ;;  %4501 = vst.msk [vmem:[%s5288_s27 + $0xf8] sm:$0xff] %vm4469_vm8, %v4468_v23 }
 0x47d PF: > { %s4713_s19 = sshll.u32 %s5156_s20, 12  ;;  %s4516_s8 = sshll.u32 %s5288_s27, 4  ;;  %s8769_s8 = int_to_ptr.vmem [resolvable:$true] %s4516_s8 }
 0x47e   : > { %s8766_s7 = scalar_lea.hbm %s8828_s3, %s4713_s19  ;;  %s8773_s9 = scalar_lea.sflag [#allocation7], %s178_s6 }
 0x47f   : > { %s5072_s10 = scalar_lea.vmem %s8769_s8, 4096  ;;  %s5176_s20 = smov [#allocation6]  }
 0x480   : > { %p5073_p13 = scmp.ne.s32.totalorder %s8769_s8, %s5072_s10  ;;  %s5076_s11 = sshll.u32 %s5176_s20, 4  ;;  %s5077_s11 = int_to_ptr.vmem [resolvable:$false] %s5076_s11 }
 0x481   : > { %s5078_s12 = scalar_lea.vmem %s5077_s11, 8192  ;;  %p5079_p3 = scmp.lt.s32.totalorder %s8769_s8, %s5077_s11 }
 0x482   : > { %p5074_p1 = pnand %p5073_p13, %p5251_p8  ;;  %p5080_p4 = scmp.lt.s32.totalorder %s5078_s12, %s5072_s10 }
 0x484   : > { %p5075_p2 = pneg %p5074_p1  ;;  %p5081_p5 = por %p5080_p4, %p5079_p3 }
 0x486   : > { %p5082_p6 = pnand %p5081_p5, %p5075_p2 }
 0x488   : > { %5085 = shalt.err (!%p5082_p6)
}
 0x489   : > { %s5086_s27 = scalar_lea.hbm %s8766_s7, 4096  ;;  %s5090_s14 = scalar_lea.hbm %s8828_s3, 8192 }
 0x48a   : > { %p5087_p7 = scmp.ne.s32.totalorder %s8766_s7, %s5086_s27  ;;  %p5091_p11 = scmp.lt.u32.totalorder %s8766_s7, %s8828_s3 }
 0x48b   : > { %p5092_p12 = scmp.lt.u32.totalorder %s5090_s14, %s5086_s27  ;;  %p5094_p1 = scmp.lt.u32.totalorder %s5086_s27, %s8766_s7 }
 0x48c   : > { %p5088_p9 = pnand %p5087_p7, %p5251_p8 }
 0x48d   : > { %p5093_p13 = por %p5092_p12, %p5091_p11 }
 0x48e   : > { %p5089_p10 = pneg %p5088_p9 }
 0x48f   : > { %p5095_p2 = por %p5094_p1, %p5093_p13 }
 0x491   : > { %p5096_p3 = pnand %p5095_p2, %p5089_p10 }
 0x493   : > { %5099 = shalt.err (!%p5096_p3)
}
 0x494   : > { %s5177_s25 = smov 128   ;;  %s5178_s30 = smov 8  }
 0x495   : > { %4899 = dma.vmem_to_hbm [thread:$0]  (%p5251_p8), %s8769_s8, 4096, %s8766_s7, %s8773_s9, %s5177_s25, %s5177_s25, %s5178_s30  }
 0x496 PF: > { %p4905_p4 = scmp.ge.s32.totalorder %s5168_s23, 2  ;;  %s4531_s19 = sand.u32 1, %s5140_s17  }
 0x497   : > { %s4532_s24 = scalar_lea.sflag [#allocation7], %s4531_s19 }
 0x498   : > { %p4902_p5 = pnand %p4905_p4, %p5261_p0 }
 0x49a   : > { %5135 = dma.done.wait (!%p4902_p5), %s4532_s24, 4096  }
 0x49b   : > { %5137 = vsyncadd (!%p4902_p5), %s4532_s24, 4294963200  ;;  %s22_s23 = sadd.s32 1, %s5168_s23   ;;  %s9136_s28 = sld [smem:[#allocation10_spill]] }
 0x49c   : > { %p19_p6 = scmp.ge.s32.totalorder %s22_s23, 6   ;;  %s9137_s17 = smov %s5144_s18 }
 0x49d   : > { %s9138_s18 = smov %s5148_s0  ;;  %s9139_s0 = smov %s5269_s5 }
 0x49e   : > { %s9140_s19 = smov %s5160_s21  ;;  %s9141_s20 = smov %s5164_s22 }
 0x49f   : > { %s9142_s21 = smov %s9145_s26  ;;  %21 = sbr.rel (!%p19_p6) target bundleno = 20 (0x14), region = 86 }
 0x4a1   : > { %s9143_s22 = smov %s9136_s28 }
 0x4a6   :  { %4537 = vsyncpa [#allocation7], 1 }
 0x4a7   :  { %4539 = vsyncpa [#allocation7 + $0x1], 1 }

</bundles_post_ra>
